<compile_context>
chip_gen: v5e
topology: v5e:2x2
jax: 0.10.0
libtpu: 0.0.40
codegen_flags: <defaults>
</compile_context>

<pallas_src>
import numpy as np
import jax
import jax.numpy as jnp
from jax import lax
from jax.experimental import pallas as pl
from jax.experimental.pallas import tpu as pltpu


def _gp_train_kernel(K_ref, yt_ref, meant_ref, var_ref,
                     L_ref, alphat_ref, nlml_ref, info_ref,
                     Lt_ref, rd_ref):
    TB, n, _ = K_ref.shape
    d = yt_ref.shape[1]
    f32 = jnp.float32

    lane_n = lax.broadcasted_iota(jnp.int32, (1, 1, n), 2)   # lane (column) index

    # Partial unroll gives the LLO scheduler cross-iteration visibility.
    if n <= 64:
        unroll = True
    else:
        unroll = next(u for u in (8, 4, 2, 1) if n % u == 0)

    var = var_ref[...]                       # (TB, 1, n) observation noise

    # The working symmetric (Schur-complement) matrix lives in the L output
    # block; A = K + diag(var) is never materialized (var enters pivots only).
    L_ref[...] = K_ref[...]

    # ---------------- Cholesky  A = L L^T  (right-looking, batched) ----------
    def chol_body(j, info):
        row_j = L_ref[:, pl.ds(j, 1), :]                              # (TB,1,n)
        pivot = jnp.sum(jnp.where(lane_n == j, row_j + var, 0.0),
                        axis=-1, keepdims=True)                       # (TB,1,1)
        info = jnp.where((pivot <= 0.0) & (info == 0), j + 1, info)
        pivot_safe = jnp.where(pivot > 0.0, pivot, 1.0)               # keep finite
        inv_sqrt = lax.rsqrt(pivot_safe)                              # EUP
        diag_val = pivot_safe * inv_sqrt                              # sqrt(pivot)
        # column j of L laid out along lanes (zeros above the diagonal)
        l_row = jnp.where(lane_n == j, diag_val,
                          jnp.where(lane_n > j, row_j * inv_sqrt, 0.0))
        Lt_ref[:, pl.ds(j, 1), :] = l_row                             # row j of L^T
        rd_ref[:, pl.ds(j, 1), :] = inv_sqrt                          # 1 / L[j,j]
        # lane -> sublane relayout of the same column (XLU transpose, O(n))
        l_col = jnp.swapaxes(l_row, 1, 2)                             # (TB,n,1)
        # trailing Schur-complement rank-1 update (rows/cols < j untouched)
        # TODO(synk): blocked panel + MXU rank-k update for large n.
        L_ref[...] = L_ref[...] - l_col * l_row
        return info

    info = lax.fori_loop(0, n, chol_body,
                         jnp.zeros((TB, 1, 1), jnp.int32), unroll=unroll)
    info_ref[...] = info

    # Row-major L output: one batched minor-dim transpose of L^T.
    L_ref[...] = jnp.swapaxes(Lt_ref[...], 1, 2)

    # complexity term: sum_j log L[j,j] = -sum_j log(1 / L[j,j])
    logdet = -jnp.sum(jnp.log(rd_ref[...]), axis=1, keepdims=True)    # (TB,1,1)

    y_c_t = yt_ref[...] - meant_ref[...]      # (TB, d, n) centered, transposed

    # ---------------- forward solve  L z = y_c  (right-looking) --------------
    def fwd_body(i, Rt):
        lt_row = Lt_ref[:, pl.ds(i, 1), :]                            # (TB,1,n) = L[:,i]
        rd_i = rd_ref[:, pl.ds(i, 1), :]                              # (TB,1,1)
        z_i = jnp.sum(jnp.where(lane_n == i, Rt, 0.0),
                      axis=-1, keepdims=True) * rd_i                  # (TB,d,1)
        Rt = Rt - z_i * jnp.where(lane_n > i, lt_row, 0.0)
        return jnp.where(lane_n == i, z_i, Rt)

    Zt = lax.fori_loop(0, n, fwd_body, y_c_t, unroll=unroll)

    # ---------------- backward solve  L^T alpha = z  (left-looking) ----------
    def bwd_body(t, At):
        i = n - 1 - t
        lt_row = Lt_ref[:, pl.ds(i, 1), :]                            # (TB,1,n)
        rd_i = rd_ref[:, pl.ds(i, 1), :]                              # (TB,1,1)
        acc = jnp.sum(jnp.where(lane_n > i, lt_row, 0.0) * At,
                      axis=-1, keepdims=True)                         # (TB,d,1)
        z_i = jnp.sum(jnp.where(lane_n == i, Zt, 0.0),
                      axis=-1, keepdims=True)
        a_i = (z_i - acc) * rd_i
        return jnp.where(lane_n == i, a_i, At)

    At = lax.fori_loop(0, n, bwd_body, jnp.zeros((TB, d, n), f32),
                       unroll=unroll)
    alphat_ref[...] = At

    # ---------------- negative log marginal likelihood -----------------------
    data_term = 0.5 * jnp.sum(y_c_t * At, axis=(1, 2), keepdims=True)  # (TB,1,1)
    constant_term = jnp.float32(0.5 * n * np.log(2.0 * np.pi))
    nlml_ref[...] = data_term + logdet + constant_term


def gp_train_module(K_train_train, y_train, mean, var):
    """Pallas implementation of GpTrainModule.forward.

    Args:
      K_train_train: (B, n, n) f32
      y_train:       (B, n, d) f32
      mean:          (B, 1, d) f32
      var:           (B, n)    f32
    Returns:
      (L (B,n,n), alpha (B,n,d), neg_log_marg_likelihood (B,), info (B,) int32)
    """
    B, n, _ = K_train_train.shape
    d = y_train.shape[-1]

    K = K_train_train.astype(jnp.float32)
    y_t = jnp.swapaxes(y_train.astype(jnp.float32), 1, 2)        # (B, d, n)
    mean_t = jnp.swapaxes(mean.astype(jnp.float32), 1, 2)        # (B, d, 1)
    var3 = var.astype(jnp.float32).reshape(B, 1, n)              # (B, 1, n)

    # ---- batch-tile sizing from real per-batch byte counts ------------------
    try:
        vmem_cap = getattr(pltpu.get_tpu_info(), "vmem_capacity_bytes", None)
    except Exception:
        vmem_cap = None
    if not vmem_cap:
        vmem_cap = 64 << 20            # conservative default (v7x per-TC)
    vmem_budget = (vmem_cap * 3) // 4  # headroom for compiler-internal scratch

    bytes_per_b = 4 * (
        2 * (n * n + d * n + d + n)    # inputs  (double-buffered)
        + 2 * (n * n + d * n + 2)      # outputs (double-buffered)
        + (n * n + n)                  # L^T + reciprocal-diagonal scratch
    )
    TB = int(max(1, min(vmem_budget // bytes_per_b, 512)))
    # Keep >= 2 grid steps so dimension_semantics=("parallel",) can shard the
    # batch across both TensorCores on v7x (harmless on v5e/v6e).
    TB = min(TB, max(1, -(-B // 2)))

    # Pad the batch up to a multiple of TB (identity kernel / unit noise on
    # the padding) instead of shrinking TB for awkward batch sizes.
    B_pad = -(-B // TB) * TB
    if B_pad != B:
        pad = B_pad - B
        K = jnp.concatenate(
            [K, jnp.broadcast_to(jnp.eye(n, dtype=jnp.float32), (pad, n, n))], 0)
        y_t = jnp.concatenate([y_t, jnp.zeros((pad, d, n), jnp.float32)], 0)
        mean_t = jnp.concatenate([mean_t, jnp.zeros((pad, d, 1), jnp.float32)], 0)
        var3 = jnp.concatenate([var3, jnp.ones((pad, 1, n), jnp.float32)], 0)

    vmem_limit = int(min(max(vmem_budget, 32 << 20), vmem_cap))

    out_shape = (
        jax.ShapeDtypeStruct((B_pad, n, n), jnp.float32),
        jax.ShapeDtypeStruct((B_pad, d, n), jnp.float32),
        jax.ShapeDtypeStruct((B_pad, 1, 1), jnp.float32),
        jax.ShapeDtypeStruct((B_pad, 1, 1), jnp.int32),
    )

    L, alpha_t, nlml, info = pl.pallas_call(
        _gp_train_kernel,
        out_shape=out_shape,
        grid=(B_pad // TB,),
        in_specs=[
            pl.BlockSpec((TB, n, n), lambda b: (b, 0, 0)),
            pl.BlockSpec((TB, d, n), lambda b: (b, 0, 0)),
            pl.BlockSpec((TB, d, 1), lambda b: (b, 0, 0)),
            pl.BlockSpec((TB, 1, n), lambda b: (b, 0, 0)),
        ],
        out_specs=(
            pl.BlockSpec((TB, n, n), lambda b: (b, 0, 0)),
            pl.BlockSpec((TB, d, n), lambda b: (b, 0, 0)),
            pl.BlockSpec((TB, 1, 1), lambda b: (b, 0, 0)),
            pl.BlockSpec((TB, 1, 1), lambda b: (b, 0, 0)),
        ),
        scratch_shapes=[
            pltpu.VMEM((TB, n, n), jnp.float32),   # L^T (rows = columns of L)
            pltpu.VMEM((TB, n, 1), jnp.float32),   # 1 / diag(L)
        ],
        compiler_params=pltpu.CompilerParams(
            dimension_semantics=("parallel",),     # independent batch blocks
            vmem_limit_bytes=vmem_limit),
    )(K, y_t, mean_t, var3)

    alpha = jnp.swapaxes(alpha_t[:B], 1, 2)        # back to (B, n, d)
    return L[:B], alpha, nlml.reshape(B_pad)[:B], info.reshape(B_pad)[:B]


def _reference(K, y, mean, var):
    y_c = y - mean
    A = K + jax.vmap(jnp.diag)(var)
    L = jnp.linalg.cholesky(A)
    alpha = jnp.linalg.solve(A, y_c)
    n = K.shape[-1]
    data_term = 0.5 * jnp.sum(y_c * alpha, axis=(1, 2))
    diag = jnp.diagonal(L, axis1=-2, axis2=-1)
    complexity = jnp.sum(jnp.log(diag), axis=1)
    nlml = data_term + complexity + 0.5 * n * np.log(2.0 * np.pi)
    return L, alpha, nlml


if __name__ == "__main__":
    B, n, d = 2, 16, 2
    key = jax.random.PRNGKey(0)
    k1, k2, k3, k4 = jax.random.split(key, 4)

    Wm = jax.random.normal(k1, (B, n, n), dtype=jnp.float32)
    K_train_train = jnp.einsum("bij,bkj->bik", Wm, Wm) / n  # SPD-ish kernel matrix
    y_train = jax.random.normal(k2, (B, n, d), dtype=jnp.float32)
    mean = jax.random.normal(k3, (B, 1, d), dtype=jnp.float32)
    var = 0.5 + jax.random.uniform(k4, (B, n), dtype=jnp.float32)  # positive noise

    L, alpha, nlml, info = gp_train_module(K_train_train, y_train, mean, var)
    jax.block_until_ready((L, alpha, nlml, info))

    # sanity check against plain-JAX reference
    L_ref, alpha_ref, nlml_ref = _reference(K_train_train, y_train, mean, var)
    np.testing.assert_allclose(np.asarray(L), np.asarray(L_ref),
                               rtol=2e-3, atol=2e-3)
    np.testing.assert_allclose(np.asarray(alpha), np.asarray(alpha_ref),
                               rtol=2e-3, atol=2e-3)
    np.testing.assert_allclose(np.asarray(nlml), np.asarray(nlml_ref),
                               rtol=2e-3, atol=2e-3)
    assert np.all(np.asarray(info) == 0)

    print("KERNEL_OK")
</pallas_src>

<mosaic_0001>
module attributes {stable_mosaic.version = 11 : i64} {
  func.func @_gp_train_kernel(%arg0: i32, %arg1: memref<1x16x16xf32, #tpu.memory_space<vmem>>, %arg2: memref<1x2x16xf32, #tpu.memory_space<vmem>>, %arg3: memref<1x2x1xf32, #tpu.memory_space<vmem>>, %arg4: memref<1x1x16xf32, #tpu.memory_space<vmem>>, %arg5: memref<1x16x16xf32, #tpu.memory_space<vmem>>, %arg6: memref<1x2x16xf32, #tpu.memory_space<vmem>>, %arg7: memref<1x1x1xf32, #tpu.memory_space<vmem>>, %arg8: memref<1x1x1xi32, #tpu.memory_space<vmem>>, %arg9: memref<1x16x16xf32, #tpu.memory_space<vmem>>, %arg10: memref<1x16x1xf32, #tpu.memory_space<vmem>>) attributes {dimension_semantics = [#tpu.dimension_semantics<parallel>], iteration_bounds = array<i64: 2>, scalar_prefetch = 0 : i64, scratch_operands = 2 : i64, tpu.core_type = #tpu.core_type<tc>, window_params = [{transform_indices = @transform_0, window_bounds = array<i64: 1, 16, 16>}, {transform_indices = @transform_1, window_bounds = array<i64: 1, 2, 16>}, {transform_indices = @transform_2, window_bounds = array<i64: 1, 2, 1>}, {transform_indices = @transform_3, window_bounds = array<i64: 1, 1, 16>}, {transform_indices = @transform_4, window_bounds = array<i64: 1, 16, 16>}, {transform_indices = @transform_5, window_bounds = array<i64: 1, 2, 16>}, {transform_indices = @transform_6, window_bounds = array<i64: 1, 1, 1>}, {transform_indices = @transform_7, window_bounds = array<i64: 1, 1, 1>}]} {
    %0 = tpu.iota {dimensions = array<i32: 2>} : vector<1x1x16xi32>
    %c0 = arith.constant 0 : index
    %c0_0 = arith.constant 0 : index
    %c0_1 = arith.constant 0 : index
    %1 = vector.load %arg4[%c0, %c0_0, %c0_1] : memref<1x1x16xf32, #tpu.memory_space<vmem>>, vector<1x1x16xf32>
    %c0_2 = arith.constant 0 : index
    %c0_3 = arith.constant 0 : index
    %c0_4 = arith.constant 0 : index
    %2 = vector.load %arg1[%c0_2, %c0_3, %c0_4] : memref<1x16x16xf32, #tpu.memory_space<vmem>>, vector<1x16x16xf32>
    %c0_5 = arith.constant 0 : index
    %c0_6 = arith.constant 0 : index
    %c0_7 = arith.constant 0 : index
    %3 = vector.load %arg5[%c0_5, %c0_6, %c0_7] : memref<1x16x16xf32, #tpu.memory_space<vmem>>, vector<1x16x16xf32>
    tpu.vector_store %arg5[%c0_5, %c0_6, %c0_7], %2 {strides = array<i32>} : memref<1x16x16xf32, #tpu.memory_space<vmem>>, vector<1x16x16xf32>,
    %c0_i32 = arith.constant 0 : i32
    %4 = vector.broadcast %c0_i32 : i32 to vector<1x1x1xi32>
    %c0_i32_8 = arith.constant 0 : i32
    %c0_9 = arith.constant 0 : index
    %5 = arith.index_cast %c0_i32_8 : i32 to index
    %c0_10 = arith.constant 0 : index
    %6 = vector.load %arg5[%c0_9, %5, %c0_10] : memref<1x16x16xf32, #tpu.memory_space<vmem>>, vector<1x1x16xf32>
    %7 = vector.broadcast %c0_i32_8 : i32 to vector<1x1x16xi32>
    %8 = arith.cmpi eq, %0, %7 : vector<1x1x16xi32>
    %9 = arith.addf %6, %1 : vector<1x1x16xf32>
    %cst = arith.constant 0.000000e+00 : f32
    %10 = vector.broadcast %cst : f32 to vector<1x1x16xf32>
    %11 = arith.select %8, %9, %10 : vector<1x1x16xi1>, vector<1x1x16xf32>
    %cst_11 = arith.constant dense<0.000000e+00> : vector<1x1xf32>
    %12 = vector.multi_reduction <add>, %11, %cst_11 [2] : vector<1x1x16xf32> to vector<1x1xf32>
    %13 = vector.shape_cast %12 : vector<1x1xf32> to vector<1x1x1xf32>
    %cst_12 = arith.constant 0.000000e+00 : f32
    %14 = vector.broadcast %cst_12 : f32 to vector<1x1x1xf32>
    %15 = arith.cmpf ole, %13, %14 : vector<1x1x1xf32>
    %c0_i32_13 = arith.constant 0 : i32
    %16 = vector.broadcast %c0_i32_13 : i32 to vector<1x1x1xi32>
    %17 = arith.cmpi eq, %4, %16 : vector<1x1x1xi32>
    %18 = arith.andi %15, %17 : vector<1x1x1xi1>
    %c1_i32 = arith.constant 1 : i32
    %19 = arith.addi %c0_i32_8, %c1_i32 : i32
    %20 = vector.broadcast %19 : i32 to vector<1x1x1xi32>
    %21 = arith.select %18, %20, %4 : vector<1x1x1xi1>, vector<1x1x1xi32>
    %cst_14 = arith.constant 0.000000e+00 : f32
    %22 = vector.broadcast %cst_14 : f32 to vector<1x1x1xf32>
    %23 = arith.cmpf ogt, %13, %22 : vector<1x1x1xf32>
    %cst_15 = arith.constant 1.000000e+00 : f32
    %24 = vector.broadcast %cst_15 : f32 to vector<1x1x1xf32>
    %25 = arith.select %23, %13, %24 : vector<1x1x1xi1>, vector<1x1x1xf32>
    %26 = math.rsqrt %25 : vector<1x1x1xf32>
    %27 = arith.mulf %25, %26 : vector<1x1x1xf32>
    %28 = vector.broadcast %c0_i32_8 : i32 to vector<1x1x16xi32>
    %29 = arith.cmpi eq, %0, %28 : vector<1x1x16xi32>
    %30 = vector.broadcast %c0_i32_8 : i32 to vector<1x1x16xi32>
    %31 = arith.cmpi sgt, %0, %30 : vector<1x1x16xi32>
    %32 = vector.broadcast %26 : vector<1x1x1xf32> to vector<1x1x16xf32>
    %33 = arith.mulf %6, %32 : vector<1x1x16xf32>
    %cst_16 = arith.constant 0.000000e+00 : f32
    %34 = vector.broadcast %cst_16 : f32 to vector<1x1x16xf32>
    %35 = arith.select %31, %33, %34 : vector<1x1x16xi1>, vector<1x1x16xf32>
    %36 = vector.shape_cast %27 : vector<1x1x1xf32> to vector<1x1x1xf32>
    %37 = vector.broadcast %36 : vector<1x1x1xf32> to vector<1x1x16xf32>
    %38 = arith.select %29, %37, %35 : vector<1x1x16xi1>, vector<1x1x16xf32>
    %c0_17 = arith.constant 0 : index
    %39 = arith.index_cast %c0_i32_8 : i32 to index
    %c0_18 = arith.constant 0 : index
    %40 = vector.load %arg9[%c0_17, %39, %c0_18] : memref<1x16x16xf32, #tpu.memory_space<vmem>>, vector<1x1x16xf32>
    tpu.vector_store %arg9[%c0_17, %39, %c0_18], %38 {strides = array<i32>} : memref<1x16x16xf32, #tpu.memory_space<vmem>>, vector<1x1x16xf32>,
    %c0_19 = arith.constant 0 : index
    %41 = arith.index_cast %c0_i32_8 : i32 to index
    %c0_20 = arith.constant 0 : index
    %42 = vector.load %arg10[%c0_19, %41, %c0_20] : memref<1x16x1xf32, #tpu.memory_space<vmem>>, vector<1x1x1xf32>
    tpu.vector_store %arg10[%c0_19, %41, %c0_20], %26 {strides = array<i32>} : memref<1x16x1xf32, #tpu.memory_space<vmem>>, vector<1x1x1xf32>,
    %43 = tpu.transpose %38, [0, 2, 1] : vector<1x1x16xf32> -> vector<1x16x1xf32>
    %c0_21 = arith.constant 0 : index
    %c0_22 = arith.constant 0 : index
    %c0_23 = arith.constant 0 : index
    %44 = vector.load %arg5[%c0_21, %c0_22, %c0_23] : memref<1x16x16xf32, #tpu.memory_space<vmem>>, vector<1x16x16xf32>
    %45 = vector.broadcast %43 : vector<1x16x1xf32> to vector<1x16x16xf32>
    %46 = vector.broadcast %38 : vector<1x1x16xf32> to vector<1x16x16xf32>
    %47 = arith.mulf %45, %46 : vector<1x16x16xf32>
    %48 = arith.subf %44, %47 : vector<1x16x16xf32>
    %c0_24 = arith.constant 0 : index
    %c0_25 = arith.constant 0 : index
    %c0_26 = arith.constant 0 : index
    %49 = vector.load %arg5[%c0_24, %c0_25, %c0_26] : memref<1x16x16xf32, #tpu.memory_space<vmem>>, vector<1x16x16xf32>
    tpu.vector_store %arg5[%c0_24, %c0_25, %c0_26], %48 {strides = array<i32>} : memref<1x16x16xf32, #tpu.memory_space<vmem>>, vector<1x16x16xf32>,
    %c1_i32_27 = arith.constant 1 : i32
    %c0_28 = arith.constant 0 : index
    %50 = arith.index_cast %c1_i32_27 : i32 to index
    %c0_29 = arith.constant 0 : index
    %51 = vector.load %arg5[%c0_28, %50, %c0_29] : memref<1x16x16xf32, #tpu.memory_space<vmem>>, vector<1x1x16xf32>
    %52 = vector.broadcast %c1_i32_27 : i32 to vector<1x1x16xi32>
    %53 = arith.cmpi eq, %0, %52 : vector<1x1x16xi32>
    %54 = arith.addf %51, %1 : vector<1x1x16xf32>
    %cst_30 = arith.constant 0.000000e+00 : f32
    %55 = vector.broadcast %cst_30 : f32 to vector<1x1x16xf32>
    %56 = arith.select %53, %54, %55 : vector<1x1x16xi1>, vector<1x1x16xf32>
    %cst_31 = arith.constant dense<0.000000e+00> : vector<1x1xf32>
    %57 = vector.multi_reduction <add>, %56, %cst_31 [2] : vector<1x1x16xf32> to vector<1x1xf32>
    %58 = vector.shape_cast %57 : vector<1x1xf32> to vector<1x1x1xf32>
    %cst_32 = arith.constant 0.000000e+00 : f32
    %59 = vector.broadcast %cst_32 : f32 to vector<1x1x1xf32>
    %60 = arith.cmpf ole, %58, %59 : vector<1x1x1xf32>
    %c0_i32_33 = arith.constant 0 : i32
    %61 = vector.broadcast %c0_i32_33 : i32 to vector<1x1x1xi32>
    %62 = arith.cmpi eq, %21, %61 : vector<1x1x1xi32>
    %63 = arith.andi %60, %62 : vector<1x1x1xi1>
    %c1_i32_34 = arith.constant 1 : i32
    %64 = arith.addi %c1_i32_27, %c1_i32_34 : i32
    %65 = vector.broadcast %64 : i32 to vector<1x1x1xi32>
    %66 = arith.select %63, %65, %21 : vector<1x1x1xi1>, vector<1x1x1xi32>
    %cst_35 = arith.constant 0.000000e+00 : f32
    %67 = vector.broadcast %cst_35 : f32 to vector<1x1x1xf32>
    %68 = arith.cmpf ogt, %58, %67 : vector<1x1x1xf32>
    %cst_36 = arith.constant 1.000000e+00 : f32
    %69 = vector.broadcast %cst_36 : f32 to vector<1x1x1xf32>
    %70 = arith.select %68, %58, %69 : vector<1x1x1xi1>, vector<1x1x1xf32>
    %71 = math.rsqrt %70 : vector<1x1x1xf32>
    %72 = arith.mulf %70, %71 : vector<1x1x1xf32>
    %73 = vector.broadcast %c1_i32_27 : i32 to vector<1x1x16xi32>
    %74 = arith.cmpi eq, %0, %73 : vector<1x1x16xi32>
    %75 = vector.broadcast %c1_i32_27 : i32 to vector<1x1x16xi32>
    %76 = arith.cmpi sgt, %0, %75 : vector<1x1x16xi32>
    %77 = vector.broadcast %71 : vector<1x1x1xf32> to vector<1x1x16xf32>
    %78 = arith.mulf %51, %77 : vector<1x1x16xf32>
    %cst_37 = arith.constant 0.000000e+00 : f32
    %79 = vector.broadcast %cst_37 : f32 to vector<1x1x16xf32>
    %80 = arith.select %76, %78, %79 : vector<1x1x16xi1>, vector<1x1x16xf32>
    %81 = vector.shape_cast %72 : vector<1x1x1xf32> to vector<1x1x1xf32>
    %82 = vector.broadcast %81 : vector<1x1x1xf32> to vector<1x1x16xf32>
    %83 = arith.select %74, %82, %80 : vector<1x1x16xi1>, vector<1x1x16xf32>
    %c0_38 = arith.constant 0 : index
    %84 = arith.index_cast %c1_i32_27 : i32 to index
    %c0_39 = arith.constant 0 : index
    %85 = vector.load %arg9[%c0_38, %84, %c0_39] : memref<1x16x16xf32, #tpu.memory_space<vmem>>, vector<1x1x16xf32>
    tpu.vector_store %arg9[%c0_38, %84, %c0_39], %83 {strides = array<i32>} : memref<1x16x16xf32, #tpu.memory_space<vmem>>, vector<1x1x16xf32>,
    %c0_40 = arith.constant 0 : index
    %86 = arith.index_cast %c1_i32_27 : i32 to index
    %c0_41 = arith.constant 0 : index
    %87 = vector.load %arg10[%c0_40, %86, %c0_41] : memref<1x16x1xf32, #tpu.memory_space<vmem>>, vector<1x1x1xf32>
    tpu.vector_store %arg10[%c0_40, %86, %c0_41], %71 {strides = array<i32>} : memref<1x16x1xf32, #tpu.memory_space<vmem>>, vector<1x1x1xf32>,
    %88 = tpu.transpose %83, [0, 2, 1] : vector<1x1x16xf32> -> vector<1x16x1xf32>
    %c0_42 = arith.constant 0 : index
    %c0_43 = arith.constant 0 : index
    %c0_44 = arith.constant 0 : index
    %89 = vector.load %arg5[%c0_42, %c0_43, %c0_44] : memref<1x16x16xf32, #tpu.memory_space<vmem>>, vector<1x16x16xf32>
    %90 = vector.broadcast %88 : vector<1x16x1xf32> to vector<1x16x16xf32>
    %91 = vector.broadcast %83 : vector<1x1x16xf32> to vector<1x16x16xf32>
    %92 = arith.mulf %90, %91 : vector<1x16x16xf32>
    %93 = arith.subf %89, %92 : vector<1x16x16xf32>
    %c0_45 = arith.constant 0 : index
    %c0_46 = arith.constant 0 : index
    %c0_47 = arith.constant 0 : index
    %94 = vector.load %arg5[%c0_45, %c0_46, %c0_47] : memref<1x16x16xf32, #tpu.memory_space<vmem>>, vector<1x16x16xf32>
    tpu.vector_store %arg5[%c0_45, %c0_46, %c0_47], %93 {strides = array<i32>} : memref<1x16x16xf32, #tpu.memory_space<vmem>>, vector<1x16x16xf32>,
    %c2_i32 = arith.constant 2 : i32
    %c0_48 = arith.constant 0 : index
    %95 = arith.index_cast %c2_i32 : i32 to index
    %c0_49 = arith.constant 0 : index
    %96 = vector.load %arg5[%c0_48, %95, %c0_49] : memref<1x16x16xf32, #tpu.memory_space<vmem>>, vector<1x1x16xf32>
    %97 = vector.broadcast %c2_i32 : i32 to vector<1x1x16xi32>
    %98 = arith.cmpi eq, %0, %97 : vector<1x1x16xi32>
    %99 = arith.addf %96, %1 : vector<1x1x16xf32>
    %cst_50 = arith.constant 0.000000e+00 : f32
    %100 = vector.broadcast %cst_50 : f32 to vector<1x1x16xf32>
    %101 = arith.select %98, %99, %100 : vector<1x1x16xi1>, vector<1x1x16xf32>
    %cst_51 = arith.constant dense<0.000000e+00> : vector<1x1xf32>
    %102 = vector.multi_reduction <add>, %101, %cst_51 [2] : vector<1x1x16xf32> to vector<1x1xf32>
    %103 = vector.shape_cast %102 : vector<1x1xf32> to vector<1x1x1xf32>
    %cst_52 = arith.constant 0.000000e+00 : f32
    %104 = vector.broadcast %cst_52 : f32 to vector<1x1x1xf32>
    %105 = arith.cmpf ole, %103, %104 : vector<1x1x1xf32>
    %c0_i32_53 = arith.constant 0 : i32
    %106 = vector.broadcast %c0_i32_53 : i32 to vector<1x1x1xi32>
    %107 = arith.cmpi eq, %66, %106 : vector<1x1x1xi32>
    %108 = arith.andi %105, %107 : vector<1x1x1xi1>
    %c1_i32_54 = arith.constant 1 : i32
    %109 = arith.addi %c2_i32, %c1_i32_54 : i32
    %110 = vector.broadcast %109 : i32 to vector<1x1x1xi32>
    %111 = arith.select %108, %110, %66 : vector<1x1x1xi1>, vector<1x1x1xi32>
    %cst_55 = arith.constant 0.000000e+00 : f32
    %112 = vector.broadcast %cst_55 : f32 to vector<1x1x1xf32>
    %113 = arith.cmpf ogt, %103, %112 : vector<1x1x1xf32>
    %cst_56 = arith.constant 1.000000e+00 : f32
    %114 = vector.broadcast %cst_56 : f32 to vector<1x1x1xf32>
    %115 = arith.select %113, %103, %114 : vector<1x1x1xi1>, vector<1x1x1xf32>
    %116 = math.rsqrt %115 : vector<1x1x1xf32>
    %117 = arith.mulf %115, %116 : vector<1x1x1xf32>
    %118 = vector.broadcast %c2_i32 : i32 to vector<1x1x16xi32>
    %119 = arith.cmpi eq, %0, %118 : vector<1x1x16xi32>
    %120 = vector.broadcast %c2_i32 : i32 to vector<1x1x16xi32>
    %121 = arith.cmpi sgt, %0, %120 : vector<1x1x16xi32>
    %122 = vector.broadcast %116 : vector<1x1x1xf32> to vector<1x1x16xf32>
    %123 = arith.mulf %96, %122 : vector<1x1x16xf32>
    %cst_57 = arith.constant 0.000000e+00 : f32
    %124 = vector.broadcast %cst_57 : f32 to vector<1x1x16xf32>
    %125 = arith.select %121, %123, %124 : vector<1x1x16xi1>, vector<1x1x16xf32>
    %126 = vector.shape_cast %117 : vector<1x1x1xf32> to vector<1x1x1xf32>
    %127 = vector.broadcast %126 : vector<1x1x1xf32> to vector<1x1x16xf32>
    %128 = arith.select %119, %127, %125 : vector<1x1x16xi1>, vector<1x1x16xf32>
    %c0_58 = arith.constant 0 : index
    %129 = arith.index_cast %c2_i32 : i32 to index
    %c0_59 = arith.constant 0 : index
    %130 = vector.load %arg9[%c0_58, %129, %c0_59] : memref<1x16x16xf32, #tpu.memory_space<vmem>>, vector<1x1x16xf32>
    tpu.vector_store %arg9[%c0_58, %129, %c0_59], %128 {strides = array<i32>} : memref<1x16x16xf32, #tpu.memory_space<vmem>>, vector<1x1x16xf32>,
    %c0_60 = arith.constant 0 : index
    %131 = arith.index_cast %c2_i32 : i32 to index
    %c0_61 = arith.constant 0 : index
    %132 = vector.load %arg10[%c0_60, %131, %c0_61] : memref<1x16x1xf32, #tpu.memory_space<vmem>>, vector<1x1x1xf32>
    tpu.vector_store %arg10[%c0_60, %131, %c0_61], %116 {strides = array<i32>} : memref<1x16x1xf32, #tpu.memory_space<vmem>>, vector<1x1x1xf32>,
    %133 = tpu.transpose %128, [0, 2, 1] : vector<1x1x16xf32> -> vector<1x16x1xf32>
    %c0_62 = arith.constant 0 : index
    %c0_63 = arith.constant 0 : index
    %c0_64 = arith.constant 0 : index
    %134 = vector.load %arg5[%c0_62, %c0_63, %c0_64] : memref<1x16x16xf32, #tpu.memory_space<vmem>>, vector<1x16x16xf32>
    %135 = vector.broadcast %133 : vector<1x16x1xf32> to vector<1x16x16xf32>
    %136 = vector.broadcast %128 : vector<1x1x16xf32> to vector<1x16x16xf32>
    %137 = arith.mulf %135, %136 : vector<1x16x16xf32>
    %138 = arith.subf %134, %137 : vector<1x16x16xf32>
    %c0_65 = arith.constant 0 : index
    %c0_66 = arith.constant 0 : index
    %c0_67 = arith.constant 0 : index
    %139 = vector.load %arg5[%c0_65, %c0_66, %c0_67] : memref<1x16x16xf32, #tpu.memory_space<vmem>>, vector<1x16x16xf32>
    tpu.vector_store %arg5[%c0_65, %c0_66, %c0_67], %138 {strides = array<i32>} : memref<1x16x16xf32, #tpu.memory_space<vmem>>, vector<1x16x16xf32>,
    %c3_i32 = arith.constant 3 : i32
    %c0_68 = arith.constant 0 : index
    %140 = arith.index_cast %c3_i32 : i32 to index
    %c0_69 = arith.constant 0 : index
    %141 = vector.load %arg5[%c0_68, %140, %c0_69] : memref<1x16x16xf32, #tpu.memory_space<vmem>>, vector<1x1x16xf32>
    %142 = vector.broadcast %c3_i32 : i32 to vector<1x1x16xi32>
    %143 = arith.cmpi eq, %0, %142 : vector<1x1x16xi32>
    %144 = arith.addf %141, %1 : vector<1x1x16xf32>
    %cst_70 = arith.constant 0.000000e+00 : f32
    %145 = vector.broadcast %cst_70 : f32 to vector<1x1x16xf32>
    %146 = arith.select %143, %144, %145 : vector<1x1x16xi1>, vector<1x1x16xf32>
    %cst_71 = arith.constant dense<0.000000e+00> : vector<1x1xf32>
    %147 = vector.multi_reduction <add>, %146, %cst_71 [2] : vector<1x1x16xf32> to vector<1x1xf32>
    %148 = vector.shape_cast %147 : vector<1x1xf32> to vector<1x1x1xf32>
    %cst_72 = arith.constant 0.000000e+00 : f32
    %149 = vector.broadcast %cst_72 : f32 to vector<1x1x1xf32>
    %150 = arith.cmpf ole, %148, %149 : vector<1x1x1xf32>
    %c0_i32_73 = arith.constant 0 : i32
    %151 = vector.broadcast %c0_i32_73 : i32 to vector<1x1x1xi32>
    %152 = arith.cmpi eq, %111, %151 : vector<1x1x1xi32>
    %153 = arith.andi %150, %152 : vector<1x1x1xi1>
    %c1_i32_74 = arith.constant 1 : i32
    %154 = arith.addi %c3_i32, %c1_i32_74 : i32
    %155 = vector.broadcast %154 : i32 to vector<1x1x1xi32>
    %156 = arith.select %153, %155, %111 : vector<1x1x1xi1>, vector<1x1x1xi32>
    %cst_75 = arith.constant 0.000000e+00 : f32
    %157 = vector.broadcast %cst_75 : f32 to vector<1x1x1xf32>
    %158 = arith.cmpf ogt, %148, %157 : vector<1x1x1xf32>
    %cst_76 = arith.constant 1.000000e+00 : f32
    %159 = vector.broadcast %cst_76 : f32 to vector<1x1x1xf32>
    %160 = arith.select %158, %148, %159 : vector<1x1x1xi1>, vector<1x1x1xf32>
    %161 = math.rsqrt %160 : vector<1x1x1xf32>
    %162 = arith.mulf %160, %161 : vector<1x1x1xf32>
    %163 = vector.broadcast %c3_i32 : i32 to vector<1x1x16xi32>
    %164 = arith.cmpi eq, %0, %163 : vector<1x1x16xi32>
    %165 = vector.broadcast %c3_i32 : i32 to vector<1x1x16xi32>
    %166 = arith.cmpi sgt, %0, %165 : vector<1x1x16xi32>
    %167 = vector.broadcast %161 : vector<1x1x1xf32> to vector<1x1x16xf32>
    %168 = arith.mulf %141, %167 : vector<1x1x16xf32>
    %cst_77 = arith.constant 0.000000e+00 : f32
    %169 = vector.broadcast %cst_77 : f32 to vector<1x1x16xf32>
    %170 = arith.select %166, %168, %169 : vector<1x1x16xi1>, vector<1x1x16xf32>
    %171 = vector.shape_cast %162 : vector<1x1x1xf32> to vector<1x1x1xf32>
    %172 = vector.broadcast %171 : vector<1x1x1xf32> to vector<1x1x16xf32>
    %173 = arith.select %164, %172, %170 : vector<1x1x16xi1>, vector<1x1x16xf32>
    %c0_78 = arith.constant 0 : index
    %174 = arith.index_cast %c3_i32 : i32 to index
    %c0_79 = arith.constant 0 : index
    %175 = vector.load %arg9[%c0_78, %174, %c0_79] : memref<1x16x16xf32, #tpu.memory_space<vmem>>, vector<1x1x16xf32>
    tpu.vector_store %arg9[%c0_78, %174, %c0_79], %173 {strides = array<i32>} : memref<1x16x16xf32, #tpu.memory_space<vmem>>, vector<1x1x16xf32>,
    %c0_80 = arith.constant 0 : index
    %176 = arith.index_cast %c3_i32 : i32 to index
    %c0_81 = arith.constant 0 : index
    %177 = vector.load %arg10[%c0_80, %176, %c0_81] : memref<1x16x1xf32, #tpu.memory_space<vmem>>, vector<1x1x1xf32>
    tpu.vector_store %arg10[%c0_80, %176, %c0_81], %161 {strides = array<i32>} : memref<1x16x1xf32, #tpu.memory_space<vmem>>, vector<1x1x1xf32>,
    %178 = tpu.transpose %173, [0, 2, 1] : vector<1x1x16xf32> -> vector<1x16x1xf32>
    %c0_82 = arith.constant 0 : index
    %c0_83 = arith.constant 0 : index
    %c0_84 = arith.constant 0 : index
    %179 = vector.load %arg5[%c0_82, %c0_83, %c0_84] : memref<1x16x16xf32, #tpu.memory_space<vmem>>, vector<1x16x16xf32>
    %180 = vector.broadcast %178 : vector<1x16x1xf32> to vector<1x16x16xf32>
    %181 = vector.broadcast %173 : vector<1x1x16xf32> to vector<1x16x16xf32>
    %182 = arith.mulf %180, %181 : vector<1x16x16xf32>
    %183 = arith.subf %179, %182 : vector<1x16x16xf32>
    %c0_85 = arith.constant 0 : index
    %c0_86 = arith.constant 0 : index
    %c0_87 = arith.constant 0 : index
    %184 = vector.load %arg5[%c0_85, %c0_86, %c0_87] : memref<1x16x16xf32, #tpu.memory_space<vmem>>, vector<1x16x16xf32>
    tpu.vector_store %arg5[%c0_85, %c0_86, %c0_87], %183 {strides = array<i32>} : memref<1x16x16xf32, #tpu.memory_space<vmem>>, vector<1x16x16xf32>,
    %c4_i32 = arith.constant 4 : i32
    %c0_88 = arith.constant 0 : index
    %185 = arith.index_cast %c4_i32 : i32 to index
    %c0_89 = arith.constant 0 : index
    %186 = vector.load %arg5[%c0_88, %185, %c0_89] : memref<1x16x16xf32, #tpu.memory_space<vmem>>, vector<1x1x16xf32>
    %187 = vector.broadcast %c4_i32 : i32 to vector<1x1x16xi32>
    %188 = arith.cmpi eq, %0, %187 : vector<1x1x16xi32>
    %189 = arith.addf %186, %1 : vector<1x1x16xf32>
    %cst_90 = arith.constant 0.000000e+00 : f32
    %190 = vector.broadcast %cst_90 : f32 to vector<1x1x16xf32>
    %191 = arith.select %188, %189, %190 : vector<1x1x16xi1>, vector<1x1x16xf32>
    %cst_91 = arith.constant dense<0.000000e+00> : vector<1x1xf32>
    %192 = vector.multi_reduction <add>, %191, %cst_91 [2] : vector<1x1x16xf32> to vector<1x1xf32>
    %193 = vector.shape_cast %192 : vector<1x1xf32> to vector<1x1x1xf32>
    %cst_92 = arith.constant 0.000000e+00 : f32
    %194 = vector.broadcast %cst_92 : f32 to vector<1x1x1xf32>
    %195 = arith.cmpf ole, %193, %194 : vector<1x1x1xf32>
    %c0_i32_93 = arith.constant 0 : i32
    %196 = vector.broadcast %c0_i32_93 : i32 to vector<1x1x1xi32>
    %197 = arith.cmpi eq, %156, %196 : vector<1x1x1xi32>
    %198 = arith.andi %195, %197 : vector<1x1x1xi1>
    %c1_i32_94 = arith.constant 1 : i32
    %199 = arith.addi %c4_i32, %c1_i32_94 : i32
    %200 = vector.broadcast %199 : i32 to vector<1x1x1xi32>
    %201 = arith.select %198, %200, %156 : vector<1x1x1xi1>, vector<1x1x1xi32>
    %cst_95 = arith.constant 0.000000e+00 : f32
    %202 = vector.broadcast %cst_95 : f32 to vector<1x1x1xf32>
    %203 = arith.cmpf ogt, %193, %202 : vector<1x1x1xf32>
    %cst_96 = arith.constant 1.000000e+00 : f32
    %204 = vector.broadcast %cst_96 : f32 to vector<1x1x1xf32>
    %205 = arith.select %203, %193, %204 : vector<1x1x1xi1>, vector<1x1x1xf32>
    %206 = math.rsqrt %205 : vector<1x1x1xf32>
    %207 = arith.mulf %205, %206 : vector<1x1x1xf32>
    %208 = vector.broadcast %c4_i32 : i32 to vector<1x1x16xi32>
    %209 = arith.cmpi eq, %0, %208 : vector<1x1x16xi32>
    %210 = vector.broadcast %c4_i32 : i32 to vector<1x1x16xi32>
    %211 = arith.cmpi sgt, %0, %210 : vector<1x1x16xi32>
    %212 = vector.broadcast %206 : vector<1x1x1xf32> to vector<1x1x16xf32>
    %213 = arith.mulf %186, %212 : vector<1x1x16xf32>
    %cst_97 = arith.constant 0.000000e+00 : f32
    %214 = vector.broadcast %cst_97 : f32 to vector<1x1x16xf32>
    %215 = arith.select %211, %213, %214 : vector<1x1x16xi1>, vector<1x1x16xf32>
    %216 = vector.shape_cast %207 : vector<1x1x1xf32> to vector<1x1x1xf32>
    %217 = vector.broadcast %216 : vector<1x1x1xf32> to vector<1x1x16xf32>
    %218 = arith.select %209, %217, %215 : vector<1x1x16xi1>, vector<1x1x16xf32>
    %c0_98 = arith.constant 0 : index
    %219 = arith.index_cast %c4_i32 : i32 to index
    %c0_99 = arith.constant 0 : index
    %220 = vector.load %arg9[%c0_98, %219, %c0_99] : memref<1x16x16xf32, #tpu.memory_space<vmem>>, vector<1x1x16xf32>
    tpu.vector_store %arg9[%c0_98, %219, %c0_99], %218 {strides = array<i32>} : memref<1x16x16xf32, #tpu.memory_space<vmem>>, vector<1x1x16xf32>,
    %c0_100 = arith.constant 0 : index
    %221 = arith.index_cast %c4_i32 : i32 to index
    %c0_101 = arith.constant 0 : index
    %222 = vector.load %arg10[%c0_100, %221, %c0_101] : memref<1x16x1xf32, #tpu.memory_space<vmem>>, vector<1x1x1xf32>
    tpu.vector_store %arg10[%c0_100, %221, %c0_101], %206 {strides = array<i32>} : memref<1x16x1xf32, #tpu.memory_space<vmem>>, vector<1x1x1xf32>,
    %223 = tpu.transpose %218, [0, 2, 1] : vector<1x1x16xf32> -> vector<1x16x1xf32>
    %c0_102 = arith.constant 0 : index
    %c0_103 = arith.constant 0 : index
    %c0_104 = arith.constant 0 : index
    %224 = vector.load %arg5[%c0_102, %c0_103, %c0_104] : memref<1x16x16xf32, #tpu.memory_space<vmem>>, vector<1x16x16xf32>
    %225 = vector.broadcast %223 : vector<1x16x1xf32> to vector<1x16x16xf32>
    %226 = vector.broadcast %218 : vector<1x1x16xf32> to vector<1x16x16xf32>
    %227 = arith.mulf %225, %226 : vector<1x16x16xf32>
    %228 = arith.subf %224, %227 : vector<1x16x16xf32>
    %c0_105 = arith.constant 0 : index
    %c0_106 = arith.constant 0 : index
    %c0_107 = arith.constant 0 : index
    %229 = vector.load %arg5[%c0_105, %c0_106, %c0_107] : memref<1x16x16xf32, #tpu.memory_space<vmem>>, vector<1x16x16xf32>
    tpu.vector_store %arg5[%c0_105, %c0_106, %c0_107], %228 {strides = array<i32>} : memref<1x16x16xf32, #tpu.memory_space<vmem>>, vector<1x16x16xf32>,
    %c5_i32 = arith.constant 5 : i32
    %c0_108 = arith.constant 0 : index
    %230 = arith.index_cast %c5_i32 : i32 to index
    %c0_109 = arith.constant 0 : index
    %231 = vector.load %arg5[%c0_108, %230, %c0_109] : memref<1x16x16xf32, #tpu.memory_space<vmem>>, vector<1x1x16xf32>
    %232 = vector.broadcast %c5_i32 : i32 to vector<1x1x16xi32>
    %233 = arith.cmpi eq, %0, %232 : vector<1x1x16xi32>
    %234 = arith.addf %231, %1 : vector<1x1x16xf32>
    %cst_110 = arith.constant 0.000000e+00 : f32
    %235 = vector.broadcast %cst_110 : f32 to vector<1x1x16xf32>
    %236 = arith.select %233, %234, %235 : vector<1x1x16xi1>, vector<1x1x16xf32>
    %cst_111 = arith.constant dense<0.000000e+00> : vector<1x1xf32>
    %237 = vector.multi_reduction <add>, %236, %cst_111 [2] : vector<1x1x16xf32> to vector<1x1xf32>
    %238 = vector.shape_cast %237 : vector<1x1xf32> to vector<1x1x1xf32>
    %cst_112 = arith.constant 0.000000e+00 : f32
    %239 = vector.broadcast %cst_112 : f32 to vector<1x1x1xf32>
    %240 = arith.cmpf ole, %238, %239 : vector<1x1x1xf32>
    %c0_i32_113 = arith.constant 0 : i32
    %241 = vector.broadcast %c0_i32_113 : i32 to vector<1x1x1xi32>
    %242 = arith.cmpi eq, %201, %241 : vector<1x1x1xi32>
    %243 = arith.andi %240, %242 : vector<1x1x1xi1>
    %c1_i32_114 = arith.constant 1 : i32
    %244 = arith.addi %c5_i32, %c1_i32_114 : i32
    %245 = vector.broadcast %244 : i32 to vector<1x1x1xi32>
    %246 = arith.select %243, %245, %201 : vector<1x1x1xi1>, vector<1x1x1xi32>
    %cst_115 = arith.constant 0.000000e+00 : f32
    %247 = vector.broadcast %cst_115 : f32 to vector<1x1x1xf32>
    %248 = arith.cmpf ogt, %238, %247 : vector<1x1x1xf32>
    %cst_116 = arith.constant 1.000000e+00 : f32
    %249 = vector.broadcast %cst_116 : f32 to vector<1x1x1xf32>
    %250 = arith.select %248, %238, %249 : vector<1x1x1xi1>, vector<1x1x1xf32>
    %251 = math.rsqrt %250 : vector<1x1x1xf32>
    %252 = arith.mulf %250, %251 : vector<1x1x1xf32>
    %253 = vector.broadcast %c5_i32 : i32 to vector<1x1x16xi32>
    %254 = arith.cmpi eq, %0, %253 : vector<1x1x16xi32>
    %255 = vector.broadcast %c5_i32 : i32 to vector<1x1x16xi32>
    %256 = arith.cmpi sgt, %0, %255 : vector<1x1x16xi32>
    %257 = vector.broadcast %251 : vector<1x1x1xf32> to vector<1x1x16xf32>
    %258 = arith.mulf %231, %257 : vector<1x1x16xf32>
    %cst_117 = arith.constant 0.000000e+00 : f32
    %259 = vector.broadcast %cst_117 : f32 to vector<1x1x16xf32>
    %260 = arith.select %256, %258, %259 : vector<1x1x16xi1>, vector<1x1x16xf32>
    %261 = vector.shape_cast %252 : vector<1x1x1xf32> to vector<1x1x1xf32>
    %262 = vector.broadcast %261 : vector<1x1x1xf32> to vector<1x1x16xf32>
    %263 = arith.select %254, %262, %260 : vector<1x1x16xi1>, vector<1x1x16xf32>
    %c0_118 = arith.constant 0 : index
    %264 = arith.index_cast %c5_i32 : i32 to index
    %c0_119 = arith.constant 0 : index
    %265 = vector.load %arg9[%c0_118, %264, %c0_119] : memref<1x16x16xf32, #tpu.memory_space<vmem>>, vector<1x1x16xf32>
    tpu.vector_store %arg9[%c0_118, %264, %c0_119], %263 {strides = array<i32>} : memref<1x16x16xf32, #tpu.memory_space<vmem>>, vector<1x1x16xf32>,
    %c0_120 = arith.constant 0 : index
    %266 = arith.index_cast %c5_i32 : i32 to index
    %c0_121 = arith.constant 0 : index
    %267 = vector.load %arg10[%c0_120, %266, %c0_121] : memref<1x16x1xf32, #tpu.memory_space<vmem>>, vector<1x1x1xf32>
    tpu.vector_store %arg10[%c0_120, %266, %c0_121], %251 {strides = array<i32>} : memref<1x16x1xf32, #tpu.memory_space<vmem>>, vector<1x1x1xf32>,
    %268 = tpu.transpose %263, [0, 2, 1] : vector<1x1x16xf32> -> vector<1x16x1xf32>
    %c0_122 = arith.constant 0 : index
    %c0_123 = arith.constant 0 : index
    %c0_124 = arith.constant 0 : index
    %269 = vector.load %arg5[%c0_122, %c0_123, %c0_124] : memref<1x16x16xf32, #tpu.memory_space<vmem>>, vector<1x16x16xf32>
    %270 = vector.broadcast %268 : vector<1x16x1xf32> to vector<1x16x16xf32>
    %271 = vector.broadcast %263 : vector<1x1x16xf32> to vector<1x16x16xf32>
    %272 = arith.mulf %270, %271 : vector<1x16x16xf32>
    %273 = arith.subf %269, %272 : vector<1x16x16xf32>
    %c0_125 = arith.constant 0 : index
    %c0_126 = arith.constant 0 : index
    %c0_127 = arith.constant 0 : index
    %274 = vector.load %arg5[%c0_125, %c0_126, %c0_127] : memref<1x16x16xf32, #tpu.memory_space<vmem>>, vector<1x16x16xf32>
    tpu.vector_store %arg5[%c0_125, %c0_126, %c0_127], %273 {strides = array<i32>} : memref<1x16x16xf32, #tpu.memory_space<vmem>>, vector<1x16x16xf32>,
    %c6_i32 = arith.constant 6 : i32
    %c0_128 = arith.constant 0 : index
    %275 = arith.index_cast %c6_i32 : i32 to index
    %c0_129 = arith.constant 0 : index
    %276 = vector.load %arg5[%c0_128, %275, %c0_129] : memref<1x16x16xf32, #tpu.memory_space<vmem>>, vector<1x1x16xf32>
    %277 = vector.broadcast %c6_i32 : i32 to vector<1x1x16xi32>
    %278 = arith.cmpi eq, %0, %277 : vector<1x1x16xi32>
    %279 = arith.addf %276, %1 : vector<1x1x16xf32>
    %cst_130 = arith.constant 0.000000e+00 : f32
    %280 = vector.broadcast %cst_130 : f32 to vector<1x1x16xf32>
    %281 = arith.select %278, %279, %280 : vector<1x1x16xi1>, vector<1x1x16xf32>
    %cst_131 = arith.constant dense<0.000000e+00> : vector<1x1xf32>
    %282 = vector.multi_reduction <add>, %281, %cst_131 [2] : vector<1x1x16xf32> to vector<1x1xf32>
    %283 = vector.shape_cast %282 : vector<1x1xf32> to vector<1x1x1xf32>
    %cst_132 = arith.constant 0.000000e+00 : f32
    %284 = vector.broadcast %cst_132 : f32 to vector<1x1x1xf32>
    %285 = arith.cmpf ole, %283, %284 : vector<1x1x1xf32>
    %c0_i32_133 = arith.constant 0 : i32
    %286 = vector.broadcast %c0_i32_133 : i32 to vector<1x1x1xi32>
    %287 = arith.cmpi eq, %246, %286 : vector<1x1x1xi32>
    %288 = arith.andi %285, %287 : vector<1x1x1xi1>
    %c1_i32_134 = arith.constant 1 : i32
    %289 = arith.addi %c6_i32, %c1_i32_134 : i32
    %290 = vector.broadcast %289 : i32 to vector<1x1x1xi32>
    %291 = arith.select %288, %290, %246 : vector<1x1x1xi1>, vector<1x1x1xi32>
    %cst_135 = arith.constant 0.000000e+00 : f32
    %292 = vector.broadcast %cst_135 : f32 to vector<1x1x1xf32>
    %293 = arith.cmpf ogt, %283, %292 : vector<1x1x1xf32>
    %cst_136 = arith.constant 1.000000e+00 : f32
    %294 = vector.broadcast %cst_136 : f32 to vector<1x1x1xf32>
    %295 = arith.select %293, %283, %294 : vector<1x1x1xi1>, vector<1x1x1xf32>
    %296 = math.rsqrt %295 : vector<1x1x1xf32>
    %297 = arith.mulf %295, %296 : vector<1x1x1xf32>
    %298 = vector.broadcast %c6_i32 : i32 to vector<1x1x16xi32>
    %299 = arith.cmpi eq, %0, %298 : vector<1x1x16xi32>
    %300 = vector.broadcast %c6_i32 : i32 to vector<1x1x16xi32>
    %301 = arith.cmpi sgt, %0, %300 : vector<1x1x16xi32>
    %302 = vector.broadcast %296 : vector<1x1x1xf32> to vector<1x1x16xf32>
    %303 = arith.mulf %276, %302 : vector<1x1x16xf32>
    %cst_137 = arith.constant 0.000000e+00 : f32
    %304 = vector.broadcast %cst_137 : f32 to vector<1x1x16xf32>
    %305 = arith.select %301, %303, %304 : vector<1x1x16xi1>, vector<1x1x16xf32>
    %306 = vector.shape_cast %297 : vector<1x1x1xf32> to vector<1x1x1xf32>
    %307 = vector.broadcast %306 : vector<1x1x1xf32> to vector<1x1x16xf32>
    %308 = arith.select %299, %307, %305 : vector<1x1x16xi1>, vector<1x1x16xf32>
    %c0_138 = arith.constant 0 : index
    %309 = arith.index_cast %c6_i32 : i32 to index
    %c0_139 = arith.constant 0 : index
    %310 = vector.load %arg9[%c0_138, %309, %c0_139] : memref<1x16x16xf32, #tpu.memory_space<vmem>>, vector<1x1x16xf32>
    tpu.vector_store %arg9[%c0_138, %309, %c0_139], %308 {strides = array<i32>} : memref<1x16x16xf32, #tpu.memory_space<vmem>>, vector<1x1x16xf32>,
    %c0_140 = arith.constant 0 : index
    %311 = arith.index_cast %c6_i32 : i32 to index
    %c0_141 = arith.constant 0 : index
    %312 = vector.load %arg10[%c0_140, %311, %c0_141] : memref<1x16x1xf32, #tpu.memory_space<vmem>>, vector<1x1x1xf32>
    tpu.vector_store %arg10[%c0_140, %311, %c0_141], %296 {strides = array<i32>} : memref<1x16x1xf32, #tpu.memory_space<vmem>>, vector<1x1x1xf32>,
    %313 = tpu.transpose %308, [0, 2, 1] : vector<1x1x16xf32> -> vector<1x16x1xf32>
    %c0_142 = arith.constant 0 : index
    %c0_143 = arith.constant 0 : index
    %c0_144 = arith.constant 0 : index
    %314 = vector.load %arg5[%c0_142, %c0_143, %c0_144] : memref<1x16x16xf32, #tpu.memory_space<vmem>>, vector<1x16x16xf32>
    %315 = vector.broadcast %313 : vector<1x16x1xf32> to vector<1x16x16xf32>
    %316 = vector.broadcast %308 : vector<1x1x16xf32> to vector<1x16x16xf32>
    %317 = arith.mulf %315, %316 : vector<1x16x16xf32>
    %318 = arith.subf %314, %317 : vector<1x16x16xf32>
    %c0_145 = arith.constant 0 : index
    %c0_146 = arith.constant 0 : index
    %c0_147 = arith.constant 0 : index
    %319 = vector.load %arg5[%c0_145, %c0_146, %c0_147] : memref<1x16x16xf32, #tpu.memory_space<vmem>>, vector<1x16x16xf32>
    tpu.vector_store %arg5[%c0_145, %c0_146, %c0_147], %318 {strides = array<i32>} : memref<1x16x16xf32, #tpu.memory_space<vmem>>, vector<1x16x16xf32>,
    %c7_i32 = arith.constant 7 : i32
    %c0_148 = arith.constant 0 : index
    %320 = arith.index_cast %c7_i32 : i32 to index
    %c0_149 = arith.constant 0 : index
    %321 = vector.load %arg5[%c0_148, %320, %c0_149] : memref<1x16x16xf32, #tpu.memory_space<vmem>>, vector<1x1x16xf32>
    %322 = vector.broadcast %c7_i32 : i32 to vector<1x1x16xi32>
    %323 = arith.cmpi eq, %0, %322 : vector<1x1x16xi32>
    %324 = arith.addf %321, %1 : vector<1x1x16xf32>
    %cst_150 = arith.constant 0.000000e+00 : f32
    %325 = vector.broadcast %cst_150 : f32 to vector<1x1x16xf32>
    %326 = arith.select %323, %324, %325 : vector<1x1x16xi1>, vector<1x1x16xf32>
    %cst_151 = arith.constant dense<0.000000e+00> : vector<1x1xf32>
    %327 = vector.multi_reduction <add>, %326, %cst_151 [2] : vector<1x1x16xf32> to vector<1x1xf32>
    %328 = vector.shape_cast %327 : vector<1x1xf32> to vector<1x1x1xf32>
    %cst_152 = arith.constant 0.000000e+00 : f32
    %329 = vector.broadcast %cst_152 : f32 to vector<1x1x1xf32>
    %330 = arith.cmpf ole, %328, %329 : vector<1x1x1xf32>
    %c0_i32_153 = arith.constant 0 : i32
    %331 = vector.broadcast %c0_i32_153 : i32 to vector<1x1x1xi32>
    %332 = arith.cmpi eq, %291, %331 : vector<1x1x1xi32>
    %333 = arith.andi %330, %332 : vector<1x1x1xi1>
    %c1_i32_154 = arith.constant 1 : i32
    %334 = arith.addi %c7_i32, %c1_i32_154 : i32
    %335 = vector.broadcast %334 : i32 to vector<1x1x1xi32>
    %336 = arith.select %333, %335, %291 : vector<1x1x1xi1>, vector<1x1x1xi32>
    %cst_155 = arith.constant 0.000000e+00 : f32
    %337 = vector.broadcast %cst_155 : f32 to vector<1x1x1xf32>
    %338 = arith.cmpf ogt, %328, %337 : vector<1x1x1xf32>
    %cst_156 = arith.constant 1.000000e+00 : f32
    %339 = vector.broadcast %cst_156 : f32 to vector<1x1x1xf32>
    %340 = arith.select %338, %328, %339 : vector<1x1x1xi1>, vector<1x1x1xf32>
    %341 = math.rsqrt %340 : vector<1x1x1xf32>
    %342 = arith.mulf %340, %341 : vector<1x1x1xf32>
    %343 = vector.broadcast %c7_i32 : i32 to vector<1x1x16xi32>
    %344 = arith.cmpi eq, %0, %343 : vector<1x1x16xi32>
    %345 = vector.broadcast %c7_i32 : i32 to vector<1x1x16xi32>
    %346 = arith.cmpi sgt, %0, %345 : vector<1x1x16xi32>
    %347 = vector.broadcast %341 : vector<1x1x1xf32> to vector<1x1x16xf32>
    %348 = arith.mulf %321, %347 : vector<1x1x16xf32>
    %cst_157 = arith.constant 0.000000e+00 : f32
    %349 = vector.broadcast %cst_157 : f32 to vector<1x1x16xf32>
    %350 = arith.select %346, %348, %349 : vector<1x1x16xi1>, vector<1x1x16xf32>
    %351 = vector.shape_cast %342 : vector<1x1x1xf32> to vector<1x1x1xf32>
    %352 = vector.broadcast %351 : vector<1x1x1xf32> to vector<1x1x16xf32>
    %353 = arith.select %344, %352, %350 : vector<1x1x16xi1>, vector<1x1x16xf32>
    %c0_158 = arith.constant 0 : index
    %354 = arith.index_cast %c7_i32 : i32 to index
    %c0_159 = arith.constant 0 : index
    %355 = vector.load %arg9[%c0_158, %354, %c0_159] : memref<1x16x16xf32, #tpu.memory_space<vmem>>, vector<1x1x16xf32>
    tpu.vector_store %arg9[%c0_158, %354, %c0_159], %353 {strides = array<i32>} : memref<1x16x16xf32, #tpu.memory_space<vmem>>, vector<1x1x16xf32>,
    %c0_160 = arith.constant 0 : index
    %356 = arith.index_cast %c7_i32 : i32 to index
    %c0_161 = arith.constant 0 : index
    %357 = vector.load %arg10[%c0_160, %356, %c0_161] : memref<1x16x1xf32, #tpu.memory_space<vmem>>, vector<1x1x1xf32>
    tpu.vector_store %arg10[%c0_160, %356, %c0_161], %341 {strides = array<i32>} : memref<1x16x1xf32, #tpu.memory_space<vmem>>, vector<1x1x1xf32>,
    %358 = tpu.transpose %353, [0, 2, 1] : vector<1x1x16xf32> -> vector<1x16x1xf32>
    %c0_162 = arith.constant 0 : index
    %c0_163 = arith.constant 0 : index
    %c0_164 = arith.constant 0 : index
    %359 = vector.load %arg5[%c0_162, %c0_163, %c0_164] : memref<1x16x16xf32, #tpu.memory_space<vmem>>, vector<1x16x16xf32>
    %360 = vector.broadcast %358 : vector<1x16x1xf32> to vector<1x16x16xf32>
    %361 = vector.broadcast %353 : vector<1x1x16xf32> to vector<1x16x16xf32>
    %362 = arith.mulf %360, %361 : vector<1x16x16xf32>
    %363 = arith.subf %359, %362 : vector<1x16x16xf32>
    %c0_165 = arith.constant 0 : index
    %c0_166 = arith.constant 0 : index
    %c0_167 = arith.constant 0 : index
    %364 = vector.load %arg5[%c0_165, %c0_166, %c0_167] : memref<1x16x16xf32, #tpu.memory_space<vmem>>, vector<1x16x16xf32>
    tpu.vector_store %arg5[%c0_165, %c0_166, %c0_167], %363 {strides = array<i32>} : memref<1x16x16xf32, #tpu.memory_space<vmem>>, vector<1x16x16xf32>,
    %c8_i32 = arith.constant 8 : i32
    %c0_168 = arith.constant 0 : index
    %365 = arith.index_cast %c8_i32 : i32 to index
    %c0_169 = arith.constant 0 : index
    %366 = vector.load %arg5[%c0_168, %365, %c0_169] : memref<1x16x16xf32, #tpu.memory_space<vmem>>, vector<1x1x16xf32>
    %367 = vector.broadcast %c8_i32 : i32 to vector<1x1x16xi32>
    %368 = arith.cmpi eq, %0, %367 : vector<1x1x16xi32>
    %369 = arith.addf %366, %1 : vector<1x1x16xf32>
    %cst_170 = arith.constant 0.000000e+00 : f32
    %370 = vector.broadcast %cst_170 : f32 to vector<1x1x16xf32>
    %371 = arith.select %368, %369, %370 : vector<1x1x16xi1>, vector<1x1x16xf32>
    %cst_171 = arith.constant dense<0.000000e+00> : vector<1x1xf32>
    %372 = vector.multi_reduction <add>, %371, %cst_171 [2] : vector<1x1x16xf32> to vector<1x1xf32>
    %373 = vector.shape_cast %372 : vector<1x1xf32> to vector<1x1x1xf32>
    %cst_172 = arith.constant 0.000000e+00 : f32
    %374 = vector.broadcast %cst_172 : f32 to vector<1x1x1xf32>
    %375 = arith.cmpf ole, %373, %374 : vector<1x1x1xf32>
    %c0_i32_173 = arith.constant 0 : i32
    %376 = vector.broadcast %c0_i32_173 : i32 to vector<1x1x1xi32>
    %377 = arith.cmpi eq, %336, %376 : vector<1x1x1xi32>
    %378 = arith.andi %375, %377 : vector<1x1x1xi1>
    %c1_i32_174 = arith.constant 1 : i32
    %379 = arith.addi %c8_i32, %c1_i32_174 : i32
    %380 = vector.broadcast %379 : i32 to vector<1x1x1xi32>
    %381 = arith.select %378, %380, %336 : vector<1x1x1xi1>, vector<1x1x1xi32>
    %cst_175 = arith.constant 0.000000e+00 : f32
    %382 = vector.broadcast %cst_175 : f32 to vector<1x1x1xf32>
    %383 = arith.cmpf ogt, %373, %382 : vector<1x1x1xf32>
    %cst_176 = arith.constant 1.000000e+00 : f32
    %384 = vector.broadcast %cst_176 : f32 to vector<1x1x1xf32>
    %385 = arith.select %383, %373, %384 : vector<1x1x1xi1>, vector<1x1x1xf32>
    %386 = math.rsqrt %385 : vector<1x1x1xf32>
    %387 = arith.mulf %385, %386 : vector<1x1x1xf32>
    %388 = vector.broadcast %c8_i32 : i32 to vector<1x1x16xi32>
    %389 = arith.cmpi eq, %0, %388 : vector<1x1x16xi32>
    %390 = vector.broadcast %c8_i32 : i32 to vector<1x1x16xi32>
    %391 = arith.cmpi sgt, %0, %390 : vector<1x1x16xi32>
    %392 = vector.broadcast %386 : vector<1x1x1xf32> to vector<1x1x16xf32>
    %393 = arith.mulf %366, %392 : vector<1x1x16xf32>
    %cst_177 = arith.constant 0.000000e+00 : f32
    %394 = vector.broadcast %cst_177 : f32 to vector<1x1x16xf32>
    %395 = arith.select %391, %393, %394 : vector<1x1x16xi1>, vector<1x1x16xf32>
    %396 = vector.shape_cast %387 : vector<1x1x1xf32> to vector<1x1x1xf32>
    %397 = vector.broadcast %396 : vector<1x1x1xf32> to vector<1x1x16xf32>
    %398 = arith.select %389, %397, %395 : vector<1x1x16xi1>, vector<1x1x16xf32>
    %c0_178 = arith.constant 0 : index
    %399 = arith.index_cast %c8_i32 : i32 to index
    %c0_179 = arith.constant 0 : index
    %400 = vector.load %arg9[%c0_178, %399, %c0_179] : memref<1x16x16xf32, #tpu.memory_space<vmem>>, vector<1x1x16xf32>
    tpu.vector_store %arg9[%c0_178, %399, %c0_179], %398 {strides = array<i32>} : memref<1x16x16xf32, #tpu.memory_space<vmem>>, vector<1x1x16xf32>,
    %c0_180 = arith.constant 0 : index
    %401 = arith.index_cast %c8_i32 : i32 to index
    %c0_181 = arith.constant 0 : index
    %402 = vector.load %arg10[%c0_180, %401, %c0_181] : memref<1x16x1xf32, #tpu.memory_space<vmem>>, vector<1x1x1xf32>
    tpu.vector_store %arg10[%c0_180, %401, %c0_181], %386 {strides = array<i32>} : memref<1x16x1xf32, #tpu.memory_space<vmem>>, vector<1x1x1xf32>,
    %403 = tpu.transpose %398, [0, 2, 1] : vector<1x1x16xf32> -> vector<1x16x1xf32>
    %c0_182 = arith.constant 0 : index
    %c0_183 = arith.constant 0 : index
    %c0_184 = arith.constant 0 : index
    %404 = vector.load %arg5[%c0_182, %c0_183, %c0_184] : memref<1x16x16xf32, #tpu.memory_space<vmem>>, vector<1x16x16xf32>
    %405 = vector.broadcast %403 : vector<1x16x1xf32> to vector<1x16x16xf32>
    %406 = vector.broadcast %398 : vector<1x1x16xf32> to vector<1x16x16xf32>
    %407 = arith.mulf %405, %406 : vector<1x16x16xf32>
    %408 = arith.subf %404, %407 : vector<1x16x16xf32>
    %c0_185 = arith.constant 0 : index
    %c0_186 = arith.constant 0 : index
    %c0_187 = arith.constant 0 : index
    %409 = vector.load %arg5[%c0_185, %c0_186, %c0_187] : memref<1x16x16xf32, #tpu.memory_space<vmem>>, vector<1x16x16xf32>
    tpu.vector_store %arg5[%c0_185, %c0_186, %c0_187], %408 {strides = array<i32>} : memref<1x16x16xf32, #tpu.memory_space<vmem>>, vector<1x16x16xf32>,
    %c9_i32 = arith.constant 9 : i32
    %c0_188 = arith.constant 0 : index
    %410 = arith.index_cast %c9_i32 : i32 to index
    %c0_189 = arith.constant 0 : index
    %411 = vector.load %arg5[%c0_188, %410, %c0_189] : memref<1x16x16xf32, #tpu.memory_space<vmem>>, vector<1x1x16xf32>
    %412 = vector.broadcast %c9_i32 : i32 to vector<1x1x16xi32>
    %413 = arith.cmpi eq, %0, %412 : vector<1x1x16xi32>
    %414 = arith.addf %411, %1 : vector<1x1x16xf32>
    %cst_190 = arith.constant 0.000000e+00 : f32
    %415 = vector.broadcast %cst_190 : f32 to vector<1x1x16xf32>
    %416 = arith.select %413, %414, %415 : vector<1x1x16xi1>, vector<1x1x16xf32>
    %cst_191 = arith.constant dense<0.000000e+00> : vector<1x1xf32>
    %417 = vector.multi_reduction <add>, %416, %cst_191 [2] : vector<1x1x16xf32> to vector<1x1xf32>
    %418 = vector.shape_cast %417 : vector<1x1xf32> to vector<1x1x1xf32>
    %cst_192 = arith.constant 0.000000e+00 : f32
    %419 = vector.broadcast %cst_192 : f32 to vector<1x1x1xf32>
    %420 = arith.cmpf ole, %418, %419 : vector<1x1x1xf32>
    %c0_i32_193 = arith.constant 0 : i32
    %421 = vector.broadcast %c0_i32_193 : i32 to vector<1x1x1xi32>
    %422 = arith.cmpi eq, %381, %421 : vector<1x1x1xi32>
    %423 = arith.andi %420, %422 : vector<1x1x1xi1>
    %c1_i32_194 = arith.constant 1 : i32
    %424 = arith.addi %c9_i32, %c1_i32_194 : i32
    %425 = vector.broadcast %424 : i32 to vector<1x1x1xi32>
    %426 = arith.select %423, %425, %381 : vector<1x1x1xi1>, vector<1x1x1xi32>
    %cst_195 = arith.constant 0.000000e+00 : f32
    %427 = vector.broadcast %cst_195 : f32 to vector<1x1x1xf32>
    %428 = arith.cmpf ogt, %418, %427 : vector<1x1x1xf32>
    %cst_196 = arith.constant 1.000000e+00 : f32
    %429 = vector.broadcast %cst_196 : f32 to vector<1x1x1xf32>
    %430 = arith.select %428, %418, %429 : vector<1x1x1xi1>, vector<1x1x1xf32>
    %431 = math.rsqrt %430 : vector<1x1x1xf32>
    %432 = arith.mulf %430, %431 : vector<1x1x1xf32>
    %433 = vector.broadcast %c9_i32 : i32 to vector<1x1x16xi32>
    %434 = arith.cmpi eq, %0, %433 : vector<1x1x16xi32>
    %435 = vector.broadcast %c9_i32 : i32 to vector<1x1x16xi32>
    %436 = arith.cmpi sgt, %0, %435 : vector<1x1x16xi32>
    %437 = vector.broadcast %431 : vector<1x1x1xf32> to vector<1x1x16xf32>
    %438 = arith.mulf %411, %437 : vector<1x1x16xf32>
    %cst_197 = arith.constant 0.000000e+00 : f32
    %439 = vector.broadcast %cst_197 : f32 to vector<1x1x16xf32>
    %440 = arith.select %436, %438, %439 : vector<1x1x16xi1>, vector<1x1x16xf32>
    %441 = vector.shape_cast %432 : vector<1x1x1xf32> to vector<1x1x1xf32>
    %442 = vector.broadcast %441 : vector<1x1x1xf32> to vector<1x1x16xf32>
    %443 = arith.select %434, %442, %440 : vector<1x1x16xi1>, vector<1x1x16xf32>
    %c0_198 = arith.constant 0 : index
    %444 = arith.index_cast %c9_i32 : i32 to index
    %c0_199 = arith.constant 0 : index
    %445 = vector.load %arg9[%c0_198, %444, %c0_199] : memref<1x16x16xf32, #tpu.memory_space<vmem>>, vector<1x1x16xf32>
    tpu.vector_store %arg9[%c0_198, %444, %c0_199], %443 {strides = array<i32>} : memref<1x16x16xf32, #tpu.memory_space<vmem>>, vector<1x1x16xf32>,
    %c0_200 = arith.constant 0 : index
    %446 = arith.index_cast %c9_i32 : i32 to index
    %c0_201 = arith.constant 0 : index
    %447 = vector.load %arg10[%c0_200, %446, %c0_201] : memref<1x16x1xf32, #tpu.memory_space<vmem>>, vector<1x1x1xf32>
    tpu.vector_store %arg10[%c0_200, %446, %c0_201], %431 {strides = array<i32>} : memref<1x16x1xf32, #tpu.memory_space<vmem>>, vector<1x1x1xf32>,
    %448 = tpu.transpose %443, [0, 2, 1] : vector<1x1x16xf32> -> vector<1x16x1xf32>
    %c0_202 = arith.constant 0 : index
    %c0_203 = arith.constant 0 : index
    %c0_204 = arith.constant 0 : index
    %449 = vector.load %arg5[%c0_202, %c0_203, %c0_204] : memref<1x16x16xf32, #tpu.memory_space<vmem>>, vector<1x16x16xf32>
    %450 = vector.broadcast %448 : vector<1x16x1xf32> to vector<1x16x16xf32>
    %451 = vector.broadcast %443 : vector<1x1x16xf32> to vector<1x16x16xf32>
    %452 = arith.mulf %450, %451 : vector<1x16x16xf32>
    %453 = arith.subf %449, %452 : vector<1x16x16xf32>
    %c0_205 = arith.constant 0 : index
    %c0_206 = arith.constant 0 : index
    %c0_207 = arith.constant 0 : index
    %454 = vector.load %arg5[%c0_205, %c0_206, %c0_207] : memref<1x16x16xf32, #tpu.memory_space<vmem>>, vector<1x16x16xf32>
    tpu.vector_store %arg5[%c0_205, %c0_206, %c0_207], %453 {strides = array<i32>} : memref<1x16x16xf32, #tpu.memory_space<vmem>>, vector<1x16x16xf32>,
    %c10_i32 = arith.constant 10 : i32
    %c0_208 = arith.constant 0 : index
    %455 = arith.index_cast %c10_i32 : i32 to index
    %c0_209 = arith.constant 0 : index
    %456 = vector.load %arg5[%c0_208, %455, %c0_209] : memref<1x16x16xf32, #tpu.memory_space<vmem>>, vector<1x1x16xf32>
    %457 = vector.broadcast %c10_i32 : i32 to vector<1x1x16xi32>
    %458 = arith.cmpi eq, %0, %457 : vector<1x1x16xi32>
    %459 = arith.addf %456, %1 : vector<1x1x16xf32>
    %cst_210 = arith.constant 0.000000e+00 : f32
    %460 = vector.broadcast %cst_210 : f32 to vector<1x1x16xf32>
    %461 = arith.select %458, %459, %460 : vector<1x1x16xi1>, vector<1x1x16xf32>
    %cst_211 = arith.constant dense<0.000000e+00> : vector<1x1xf32>
    %462 = vector.multi_reduction <add>, %461, %cst_211 [2] : vector<1x1x16xf32> to vector<1x1xf32>
    %463 = vector.shape_cast %462 : vector<1x1xf32> to vector<1x1x1xf32>
    %cst_212 = arith.constant 0.000000e+00 : f32
    %464 = vector.broadcast %cst_212 : f32 to vector<1x1x1xf32>
    %465 = arith.cmpf ole, %463, %464 : vector<1x1x1xf32>
    %c0_i32_213 = arith.constant 0 : i32
    %466 = vector.broadcast %c0_i32_213 : i32 to vector<1x1x1xi32>
    %467 = arith.cmpi eq, %426, %466 : vector<1x1x1xi32>
    %468 = arith.andi %465, %467 : vector<1x1x1xi1>
    %c1_i32_214 = arith.constant 1 : i32
    %469 = arith.addi %c10_i32, %c1_i32_214 : i32
    %470 = vector.broadcast %469 : i32 to vector<1x1x1xi32>
    %471 = arith.select %468, %470, %426 : vector<1x1x1xi1>, vector<1x1x1xi32>
    %cst_215 = arith.constant 0.000000e+00 : f32
    %472 = vector.broadcast %cst_215 : f32 to vector<1x1x1xf32>
    %473 = arith.cmpf ogt, %463, %472 : vector<1x1x1xf32>
    %cst_216 = arith.constant 1.000000e+00 : f32
    %474 = vector.broadcast %cst_216 : f32 to vector<1x1x1xf32>
    %475 = arith.select %473, %463, %474 : vector<1x1x1xi1>, vector<1x1x1xf32>
    %476 = math.rsqrt %475 : vector<1x1x1xf32>
    %477 = arith.mulf %475, %476 : vector<1x1x1xf32>
    %478 = vector.broadcast %c10_i32 : i32 to vector<1x1x16xi32>
    %479 = arith.cmpi eq, %0, %478 : vector<1x1x16xi32>
    %480 = vector.broadcast %c10_i32 : i32 to vector<1x1x16xi32>
    %481 = arith.cmpi sgt, %0, %480 : vector<1x1x16xi32>
    %482 = vector.broadcast %476 : vector<1x1x1xf32> to vector<1x1x16xf32>
    %483 = arith.mulf %456, %482 : vector<1x1x16xf32>
    %cst_217 = arith.constant 0.000000e+00 : f32
    %484 = vector.broadcast %cst_217 : f32 to vector<1x1x16xf32>
    %485 = arith.select %481, %483, %484 : vector<1x1x16xi1>, vector<1x1x16xf32>
    %486 = vector.shape_cast %477 : vector<1x1x1xf32> to vector<1x1x1xf32>
    %487 = vector.broadcast %486 : vector<1x1x1xf32> to vector<1x1x16xf32>
    %488 = arith.select %479, %487, %485 : vector<1x1x16xi1>, vector<1x1x16xf32>
    %c0_218 = arith.constant 0 : index
    %489 = arith.index_cast %c10_i32 : i32 to index
    %c0_219 = arith.constant 0 : index
    %490 = vector.load %arg9[%c0_218, %489, %c0_219] : memref<1x16x16xf32, #tpu.memory_space<vmem>>, vector<1x1x16xf32>
    tpu.vector_store %arg9[%c0_218, %489, %c0_219], %488 {strides = array<i32>} : memref<1x16x16xf32, #tpu.memory_space<vmem>>, vector<1x1x16xf32>,
    %c0_220 = arith.constant 0 : index
    %491 = arith.index_cast %c10_i32 : i32 to index
    %c0_221 = arith.constant 0 : index
    %492 = vector.load %arg10[%c0_220, %491, %c0_221] : memref<1x16x1xf32, #tpu.memory_space<vmem>>, vector<1x1x1xf32>
    tpu.vector_store %arg10[%c0_220, %491, %c0_221], %476 {strides = array<i32>} : memref<1x16x1xf32, #tpu.memory_space<vmem>>, vector<1x1x1xf32>,
    %493 = tpu.transpose %488, [0, 2, 1] : vector<1x1x16xf32> -> vector<1x16x1xf32>
    %c0_222 = arith.constant 0 : index
    %c0_223 = arith.constant 0 : index
    %c0_224 = arith.constant 0 : index
    %494 = vector.load %arg5[%c0_222, %c0_223, %c0_224] : memref<1x16x16xf32, #tpu.memory_space<vmem>>, vector<1x16x16xf32>
    %495 = vector.broadcast %493 : vector<1x16x1xf32> to vector<1x16x16xf32>
    %496 = vector.broadcast %488 : vector<1x1x16xf32> to vector<1x16x16xf32>
    %497 = arith.mulf %495, %496 : vector<1x16x16xf32>
    %498 = arith.subf %494, %497 : vector<1x16x16xf32>
    %c0_225 = arith.constant 0 : index
    %c0_226 = arith.constant 0 : index
    %c0_227 = arith.constant 0 : index
    %499 = vector.load %arg5[%c0_225, %c0_226, %c0_227] : memref<1x16x16xf32, #tpu.memory_space<vmem>>, vector<1x16x16xf32>
    tpu.vector_store %arg5[%c0_225, %c0_226, %c0_227], %498 {strides = array<i32>} : memref<1x16x16xf32, #tpu.memory_space<vmem>>, vector<1x16x16xf32>,
    %c11_i32 = arith.constant 11 : i32
    %c0_228 = arith.constant 0 : index
    %500 = arith.index_cast %c11_i32 : i32 to index
    %c0_229 = arith.constant 0 : index
    %501 = vector.load %arg5[%c0_228, %500, %c0_229] : memref<1x16x16xf32, #tpu.memory_space<vmem>>, vector<1x1x16xf32>
    %502 = vector.broadcast %c11_i32 : i32 to vector<1x1x16xi32>
    %503 = arith.cmpi eq, %0, %502 : vector<1x1x16xi32>
    %504 = arith.addf %501, %1 : vector<1x1x16xf32>
    %cst_230 = arith.constant 0.000000e+00 : f32
    %505 = vector.broadcast %cst_230 : f32 to vector<1x1x16xf32>
    %506 = arith.select %503, %504, %505 : vector<1x1x16xi1>, vector<1x1x16xf32>
    %cst_231 = arith.constant dense<0.000000e+00> : vector<1x1xf32>
    %507 = vector.multi_reduction <add>, %506, %cst_231 [2] : vector<1x1x16xf32> to vector<1x1xf32>
    %508 = vector.shape_cast %507 : vector<1x1xf32> to vector<1x1x1xf32>
    %cst_232 = arith.constant 0.000000e+00 : f32
    %509 = vector.broadcast %cst_232 : f32 to vector<1x1x1xf32>
    %510 = arith.cmpf ole, %508, %509 : vector<1x1x1xf32>
    %c0_i32_233 = arith.constant 0 : i32
    %511 = vector.broadcast %c0_i32_233 : i32 to vector<1x1x1xi32>
    %512 = arith.cmpi eq, %471, %511 : vector<1x1x1xi32>
    %513 = arith.andi %510, %512 : vector<1x1x1xi1>
    %c1_i32_234 = arith.constant 1 : i32
    %514 = arith.addi %c11_i32, %c1_i32_234 : i32
    %515 = vector.broadcast %514 : i32 to vector<1x1x1xi32>
    %516 = arith.select %513, %515, %471 : vector<1x1x1xi1>, vector<1x1x1xi32>
    %cst_235 = arith.constant 0.000000e+00 : f32
    %517 = vector.broadcast %cst_235 : f32 to vector<1x1x1xf32>
    %518 = arith.cmpf ogt, %508, %517 : vector<1x1x1xf32>
    %cst_236 = arith.constant 1.000000e+00 : f32
    %519 = vector.broadcast %cst_236 : f32 to vector<1x1x1xf32>
    %520 = arith.select %518, %508, %519 : vector<1x1x1xi1>, vector<1x1x1xf32>
    %521 = math.rsqrt %520 : vector<1x1x1xf32>
    %522 = arith.mulf %520, %521 : vector<1x1x1xf32>
    %523 = vector.broadcast %c11_i32 : i32 to vector<1x1x16xi32>
    %524 = arith.cmpi eq, %0, %523 : vector<1x1x16xi32>
    %525 = vector.broadcast %c11_i32 : i32 to vector<1x1x16xi32>
    %526 = arith.cmpi sgt, %0, %525 : vector<1x1x16xi32>
    %527 = vector.broadcast %521 : vector<1x1x1xf32> to vector<1x1x16xf32>
    %528 = arith.mulf %501, %527 : vector<1x1x16xf32>
    %cst_237 = arith.constant 0.000000e+00 : f32
    %529 = vector.broadcast %cst_237 : f32 to vector<1x1x16xf32>
    %530 = arith.select %526, %528, %529 : vector<1x1x16xi1>, vector<1x1x16xf32>
    %531 = vector.shape_cast %522 : vector<1x1x1xf32> to vector<1x1x1xf32>
    %532 = vector.broadcast %531 : vector<1x1x1xf32> to vector<1x1x16xf32>
    %533 = arith.select %524, %532, %530 : vector<1x1x16xi1>, vector<1x1x16xf32>
    %c0_238 = arith.constant 0 : index
    %534 = arith.index_cast %c11_i32 : i32 to index
    %c0_239 = arith.constant 0 : index
    %535 = vector.load %arg9[%c0_238, %534, %c0_239] : memref<1x16x16xf32, #tpu.memory_space<vmem>>, vector<1x1x16xf32>
    tpu.vector_store %arg9[%c0_238, %534, %c0_239], %533 {strides = array<i32>} : memref<1x16x16xf32, #tpu.memory_space<vmem>>, vector<1x1x16xf32>,
    %c0_240 = arith.constant 0 : index
    %536 = arith.index_cast %c11_i32 : i32 to index
    %c0_241 = arith.constant 0 : index
    %537 = vector.load %arg10[%c0_240, %536, %c0_241] : memref<1x16x1xf32, #tpu.memory_space<vmem>>, vector<1x1x1xf32>
    tpu.vector_store %arg10[%c0_240, %536, %c0_241], %521 {strides = array<i32>} : memref<1x16x1xf32, #tpu.memory_space<vmem>>, vector<1x1x1xf32>,
    %538 = tpu.transpose %533, [0, 2, 1] : vector<1x1x16xf32> -> vector<1x16x1xf32>
    %c0_242 = arith.constant 0 : index
    %c0_243 = arith.constant 0 : index
    %c0_244 = arith.constant 0 : index
    %539 = vector.load %arg5[%c0_242, %c0_243, %c0_244] : memref<1x16x16xf32, #tpu.memory_space<vmem>>, vector<1x16x16xf32>
    %540 = vector.broadcast %538 : vector<1x16x1xf32> to vector<1x16x16xf32>
    %541 = vector.broadcast %533 : vector<1x1x16xf32> to vector<1x16x16xf32>
    %542 = arith.mulf %540, %541 : vector<1x16x16xf32>
    %543 = arith.subf %539, %542 : vector<1x16x16xf32>
    %c0_245 = arith.constant 0 : index
    %c0_246 = arith.constant 0 : index
    %c0_247 = arith.constant 0 : index
    %544 = vector.load %arg5[%c0_245, %c0_246, %c0_247] : memref<1x16x16xf32, #tpu.memory_space<vmem>>, vector<1x16x16xf32>
    tpu.vector_store %arg5[%c0_245, %c0_246, %c0_247], %543 {strides = array<i32>} : memref<1x16x16xf32, #tpu.memory_space<vmem>>, vector<1x16x16xf32>,
    %c12_i32 = arith.constant 12 : i32
    %c0_248 = arith.constant 0 : index
    %545 = arith.index_cast %c12_i32 : i32 to index
    %c0_249 = arith.constant 0 : index
    %546 = vector.load %arg5[%c0_248, %545, %c0_249] : memref<1x16x16xf32, #tpu.memory_space<vmem>>, vector<1x1x16xf32>
    %547 = vector.broadcast %c12_i32 : i32 to vector<1x1x16xi32>
    %548 = arith.cmpi eq, %0, %547 : vector<1x1x16xi32>
    %549 = arith.addf %546, %1 : vector<1x1x16xf32>
    %cst_250 = arith.constant 0.000000e+00 : f32
    %550 = vector.broadcast %cst_250 : f32 to vector<1x1x16xf32>
    %551 = arith.select %548, %549, %550 : vector<1x1x16xi1>, vector<1x1x16xf32>
    %cst_251 = arith.constant dense<0.000000e+00> : vector<1x1xf32>
    %552 = vector.multi_reduction <add>, %551, %cst_251 [2] : vector<1x1x16xf32> to vector<1x1xf32>
    %553 = vector.shape_cast %552 : vector<1x1xf32> to vector<1x1x1xf32>
    %cst_252 = arith.constant 0.000000e+00 : f32
    %554 = vector.broadcast %cst_252 : f32 to vector<1x1x1xf32>
    %555 = arith.cmpf ole, %553, %554 : vector<1x1x1xf32>
    %c0_i32_253 = arith.constant 0 : i32
    %556 = vector.broadcast %c0_i32_253 : i32 to vector<1x1x1xi32>
    %557 = arith.cmpi eq, %516, %556 : vector<1x1x1xi32>
    %558 = arith.andi %555, %557 : vector<1x1x1xi1>
    %c1_i32_254 = arith.constant 1 : i32
    %559 = arith.addi %c12_i32, %c1_i32_254 : i32
    %560 = vector.broadcast %559 : i32 to vector<1x1x1xi32>
    %561 = arith.select %558, %560, %516 : vector<1x1x1xi1>, vector<1x1x1xi32>
    %cst_255 = arith.constant 0.000000e+00 : f32
    %562 = vector.broadcast %cst_255 : f32 to vector<1x1x1xf32>
    %563 = arith.cmpf ogt, %553, %562 : vector<1x1x1xf32>
    %cst_256 = arith.constant 1.000000e+00 : f32
    %564 = vector.broadcast %cst_256 : f32 to vector<1x1x1xf32>
    %565 = arith.select %563, %553, %564 : vector<1x1x1xi1>, vector<1x1x1xf32>
    %566 = math.rsqrt %565 : vector<1x1x1xf32>
    %567 = arith.mulf %565, %566 : vector<1x1x1xf32>
    %568 = vector.broadcast %c12_i32 : i32 to vector<1x1x16xi32>
    %569 = arith.cmpi eq, %0, %568 : vector<1x1x16xi32>
    %570 = vector.broadcast %c12_i32 : i32 to vector<1x1x16xi32>
    %571 = arith.cmpi sgt, %0, %570 : vector<1x1x16xi32>
    %572 = vector.broadcast %566 : vector<1x1x1xf32> to vector<1x1x16xf32>
    %573 = arith.mulf %546, %572 : vector<1x1x16xf32>
    %cst_257 = arith.constant 0.000000e+00 : f32
    %574 = vector.broadcast %cst_257 : f32 to vector<1x1x16xf32>
    %575 = arith.select %571, %573, %574 : vector<1x1x16xi1>, vector<1x1x16xf32>
    %576 = vector.shape_cast %567 : vector<1x1x1xf32> to vector<1x1x1xf32>
    %577 = vector.broadcast %576 : vector<1x1x1xf32> to vector<1x1x16xf32>
    %578 = arith.select %569, %577, %575 : vector<1x1x16xi1>, vector<1x1x16xf32>
    %c0_258 = arith.constant 0 : index
    %579 = arith.index_cast %c12_i32 : i32 to index
    %c0_259 = arith.constant 0 : index
    %580 = vector.load %arg9[%c0_258, %579, %c0_259] : memref<1x16x16xf32, #tpu.memory_space<vmem>>, vector<1x1x16xf32>
    tpu.vector_store %arg9[%c0_258, %579, %c0_259], %578 {strides = array<i32>} : memref<1x16x16xf32, #tpu.memory_space<vmem>>, vector<1x1x16xf32>,
    %c0_260 = arith.constant 0 : index
    %581 = arith.index_cast %c12_i32 : i32 to index
    %c0_261 = arith.constant 0 : index
    %582 = vector.load %arg10[%c0_260, %581, %c0_261] : memref<1x16x1xf32, #tpu.memory_space<vmem>>, vector<1x1x1xf32>
    tpu.vector_store %arg10[%c0_260, %581, %c0_261], %566 {strides = array<i32>} : memref<1x16x1xf32, #tpu.memory_space<vmem>>, vector<1x1x1xf32>,
    %583 = tpu.transpose %578, [0, 2, 1] : vector<1x1x16xf32> -> vector<1x16x1xf32>
    %c0_262 = arith.constant 0 : index
    %c0_263 = arith.constant 0 : index
    %c0_264 = arith.constant 0 : index
    %584 = vector.load %arg5[%c0_262, %c0_263, %c0_264] : memref<1x16x16xf32, #tpu.memory_space<vmem>>, vector<1x16x16xf32>
    %585 = vector.broadcast %583 : vector<1x16x1xf32> to vector<1x16x16xf32>
    %586 = vector.broadcast %578 : vector<1x1x16xf32> to vector<1x16x16xf32>
    %587 = arith.mulf %585, %586 : vector<1x16x16xf32>
    %588 = arith.subf %584, %587 : vector<1x16x16xf32>
    %c0_265 = arith.constant 0 : index
    %c0_266 = arith.constant 0 : index
    %c0_267 = arith.constant 0 : index
    %589 = vector.load %arg5[%c0_265, %c0_266, %c0_267] : memref<1x16x16xf32, #tpu.memory_space<vmem>>, vector<1x16x16xf32>
    tpu.vector_store %arg5[%c0_265, %c0_266, %c0_267], %588 {strides = array<i32>} : memref<1x16x16xf32, #tpu.memory_space<vmem>>, vector<1x16x16xf32>,
    %c13_i32 = arith.constant 13 : i32
    %c0_268 = arith.constant 0 : index
    %590 = arith.index_cast %c13_i32 : i32 to index
    %c0_269 = arith.constant 0 : index
    %591 = vector.load %arg5[%c0_268, %590, %c0_269] : memref<1x16x16xf32, #tpu.memory_space<vmem>>, vector<1x1x16xf32>
    %592 = vector.broadcast %c13_i32 : i32 to vector<1x1x16xi32>
    %593 = arith.cmpi eq, %0, %592 : vector<1x1x16xi32>
    %594 = arith.addf %591, %1 : vector<1x1x16xf32>
    %cst_270 = arith.constant 0.000000e+00 : f32
    %595 = vector.broadcast %cst_270 : f32 to vector<1x1x16xf32>
    %596 = arith.select %593, %594, %595 : vector<1x1x16xi1>, vector<1x1x16xf32>
    %cst_271 = arith.constant dense<0.000000e+00> : vector<1x1xf32>
    %597 = vector.multi_reduction <add>, %596, %cst_271 [2] : vector<1x1x16xf32> to vector<1x1xf32>
    %598 = vector.shape_cast %597 : vector<1x1xf32> to vector<1x1x1xf32>
    %cst_272 = arith.constant 0.000000e+00 : f32
    %599 = vector.broadcast %cst_272 : f32 to vector<1x1x1xf32>
    %600 = arith.cmpf ole, %598, %599 : vector<1x1x1xf32>
    %c0_i32_273 = arith.constant 0 : i32
    %601 = vector.broadcast %c0_i32_273 : i32 to vector<1x1x1xi32>
    %602 = arith.cmpi eq, %561, %601 : vector<1x1x1xi32>
    %603 = arith.andi %600, %602 : vector<1x1x1xi1>
    %c1_i32_274 = arith.constant 1 : i32
    %604 = arith.addi %c13_i32, %c1_i32_274 : i32
    %605 = vector.broadcast %604 : i32 to vector<1x1x1xi32>
    %606 = arith.select %603, %605, %561 : vector<1x1x1xi1>, vector<1x1x1xi32>
    %cst_275 = arith.constant 0.000000e+00 : f32
    %607 = vector.broadcast %cst_275 : f32 to vector<1x1x1xf32>
    %608 = arith.cmpf ogt, %598, %607 : vector<1x1x1xf32>
    %cst_276 = arith.constant 1.000000e+00 : f32
    %609 = vector.broadcast %cst_276 : f32 to vector<1x1x1xf32>
    %610 = arith.select %608, %598, %609 : vector<1x1x1xi1>, vector<1x1x1xf32>
    %611 = math.rsqrt %610 : vector<1x1x1xf32>
    %612 = arith.mulf %610, %611 : vector<1x1x1xf32>
    %613 = vector.broadcast %c13_i32 : i32 to vector<1x1x16xi32>
    %614 = arith.cmpi eq, %0, %613 : vector<1x1x16xi32>
    %615 = vector.broadcast %c13_i32 : i32 to vector<1x1x16xi32>
    %616 = arith.cmpi sgt, %0, %615 : vector<1x1x16xi32>
    %617 = vector.broadcast %611 : vector<1x1x1xf32> to vector<1x1x16xf32>
    %618 = arith.mulf %591, %617 : vector<1x1x16xf32>
    %cst_277 = arith.constant 0.000000e+00 : f32
    %619 = vector.broadcast %cst_277 : f32 to vector<1x1x16xf32>
    %620 = arith.select %616, %618, %619 : vector<1x1x16xi1>, vector<1x1x16xf32>
    %621 = vector.shape_cast %612 : vector<1x1x1xf32> to vector<1x1x1xf32>
    %622 = vector.broadcast %621 : vector<1x1x1xf32> to vector<1x1x16xf32>
    %623 = arith.select %614, %622, %620 : vector<1x1x16xi1>, vector<1x1x16xf32>
    %c0_278 = arith.constant 0 : index
    %624 = arith.index_cast %c13_i32 : i32 to index
    %c0_279 = arith.constant 0 : index
    %625 = vector.load %arg9[%c0_278, %624, %c0_279] : memref<1x16x16xf32, #tpu.memory_space<vmem>>, vector<1x1x16xf32>
    tpu.vector_store %arg9[%c0_278, %624, %c0_279], %623 {strides = array<i32>} : memref<1x16x16xf32, #tpu.memory_space<vmem>>, vector<1x1x16xf32>,
    %c0_280 = arith.constant 0 : index
    %626 = arith.index_cast %c13_i32 : i32 to index
    %c0_281 = arith.constant 0 : index
    %627 = vector.load %arg10[%c0_280, %626, %c0_281] : memref<1x16x1xf32, #tpu.memory_space<vmem>>, vector<1x1x1xf32>
    tpu.vector_store %arg10[%c0_280, %626, %c0_281], %611 {strides = array<i32>} : memref<1x16x1xf32, #tpu.memory_space<vmem>>, vector<1x1x1xf32>,
    %628 = tpu.transpose %623, [0, 2, 1] : vector<1x1x16xf32> -> vector<1x16x1xf32>
    %c0_282 = arith.constant 0 : index
    %c0_283 = arith.constant 0 : index
    %c0_284 = arith.constant 0 : index
    %629 = vector.load %arg5[%c0_282, %c0_283, %c0_284] : memref<1x16x16xf32, #tpu.memory_space<vmem>>, vector<1x16x16xf32>
    %630 = vector.broadcast %628 : vector<1x16x1xf32> to vector<1x16x16xf32>
    %631 = vector.broadcast %623 : vector<1x1x16xf32> to vector<1x16x16xf32>
    %632 = arith.mulf %630, %631 : vector<1x16x16xf32>
    %633 = arith.subf %629, %632 : vector<1x16x16xf32>
    %c0_285 = arith.constant 0 : index
    %c0_286 = arith.constant 0 : index
    %c0_287 = arith.constant 0 : index
    %634 = vector.load %arg5[%c0_285, %c0_286, %c0_287] : memref<1x16x16xf32, #tpu.memory_space<vmem>>, vector<1x16x16xf32>
    tpu.vector_store %arg5[%c0_285, %c0_286, %c0_287], %633 {strides = array<i32>} : memref<1x16x16xf32, #tpu.memory_space<vmem>>, vector<1x16x16xf32>,
    %c14_i32 = arith.constant 14 : i32
    %c0_288 = arith.constant 0 : index
    %635 = arith.index_cast %c14_i32 : i32 to index
    %c0_289 = arith.constant 0 : index
    %636 = vector.load %arg5[%c0_288, %635, %c0_289] : memref<1x16x16xf32, #tpu.memory_space<vmem>>, vector<1x1x16xf32>
    %637 = vector.broadcast %c14_i32 : i32 to vector<1x1x16xi32>
    %638 = arith.cmpi eq, %0, %637 : vector<1x1x16xi32>
    %639 = arith.addf %636, %1 : vector<1x1x16xf32>
    %cst_290 = arith.constant 0.000000e+00 : f32
    %640 = vector.broadcast %cst_290 : f32 to vector<1x1x16xf32>
    %641 = arith.select %638, %639, %640 : vector<1x1x16xi1>, vector<1x1x16xf32>
    %cst_291 = arith.constant dense<0.000000e+00> : vector<1x1xf32>
    %642 = vector.multi_reduction <add>, %641, %cst_291 [2] : vector<1x1x16xf32> to vector<1x1xf32>
    %643 = vector.shape_cast %642 : vector<1x1xf32> to vector<1x1x1xf32>
    %cst_292 = arith.constant 0.000000e+00 : f32
    %644 = vector.broadcast %cst_292 : f32 to vector<1x1x1xf32>
    %645 = arith.cmpf ole, %643, %644 : vector<1x1x1xf32>
    %c0_i32_293 = arith.constant 0 : i32
    %646 = vector.broadcast %c0_i32_293 : i32 to vector<1x1x1xi32>
    %647 = arith.cmpi eq, %606, %646 : vector<1x1x1xi32>
    %648 = arith.andi %645, %647 : vector<1x1x1xi1>
    %c1_i32_294 = arith.constant 1 : i32
    %649 = arith.addi %c14_i32, %c1_i32_294 : i32
    %650 = vector.broadcast %649 : i32 to vector<1x1x1xi32>
    %651 = arith.select %648, %650, %606 : vector<1x1x1xi1>, vector<1x1x1xi32>
    %cst_295 = arith.constant 0.000000e+00 : f32
    %652 = vector.broadcast %cst_295 : f32 to vector<1x1x1xf32>
    %653 = arith.cmpf ogt, %643, %652 : vector<1x1x1xf32>
    %cst_296 = arith.constant 1.000000e+00 : f32
    %654 = vector.broadcast %cst_296 : f32 to vector<1x1x1xf32>
    %655 = arith.select %653, %643, %654 : vector<1x1x1xi1>, vector<1x1x1xf32>
    %656 = math.rsqrt %655 : vector<1x1x1xf32>
    %657 = arith.mulf %655, %656 : vector<1x1x1xf32>
    %658 = vector.broadcast %c14_i32 : i32 to vector<1x1x16xi32>
    %659 = arith.cmpi eq, %0, %658 : vector<1x1x16xi32>
    %660 = vector.broadcast %c14_i32 : i32 to vector<1x1x16xi32>
    %661 = arith.cmpi sgt, %0, %660 : vector<1x1x16xi32>
    %662 = vector.broadcast %656 : vector<1x1x1xf32> to vector<1x1x16xf32>
    %663 = arith.mulf %636, %662 : vector<1x1x16xf32>
    %cst_297 = arith.constant 0.000000e+00 : f32
    %664 = vector.broadcast %cst_297 : f32 to vector<1x1x16xf32>
    %665 = arith.select %661, %663, %664 : vector<1x1x16xi1>, vector<1x1x16xf32>
    %666 = vector.shape_cast %657 : vector<1x1x1xf32> to vector<1x1x1xf32>
    %667 = vector.broadcast %666 : vector<1x1x1xf32> to vector<1x1x16xf32>
    %668 = arith.select %659, %667, %665 : vector<1x1x16xi1>, vector<1x1x16xf32>
    %c0_298 = arith.constant 0 : index
    %669 = arith.index_cast %c14_i32 : i32 to index
    %c0_299 = arith.constant 0 : index
    %670 = vector.load %arg9[%c0_298, %669, %c0_299] : memref<1x16x16xf32, #tpu.memory_space<vmem>>, vector<1x1x16xf32>
    tpu.vector_store %arg9[%c0_298, %669, %c0_299], %668 {strides = array<i32>} : memref<1x16x16xf32, #tpu.memory_space<vmem>>, vector<1x1x16xf32>,
    %c0_300 = arith.constant 0 : index
    %671 = arith.index_cast %c14_i32 : i32 to index
    %c0_301 = arith.constant 0 : index
    %672 = vector.load %arg10[%c0_300, %671, %c0_301] : memref<1x16x1xf32, #tpu.memory_space<vmem>>, vector<1x1x1xf32>
    tpu.vector_store %arg10[%c0_300, %671, %c0_301], %656 {strides = array<i32>} : memref<1x16x1xf32, #tpu.memory_space<vmem>>, vector<1x1x1xf32>,
    %673 = tpu.transpose %668, [0, 2, 1] : vector<1x1x16xf32> -> vector<1x16x1xf32>
    %c0_302 = arith.constant 0 : index
    %c0_303 = arith.constant 0 : index
    %c0_304 = arith.constant 0 : index
    %674 = vector.load %arg5[%c0_302, %c0_303, %c0_304] : memref<1x16x16xf32, #tpu.memory_space<vmem>>, vector<1x16x16xf32>
    %675 = vector.broadcast %673 : vector<1x16x1xf32> to vector<1x16x16xf32>
    %676 = vector.broadcast %668 : vector<1x1x16xf32> to vector<1x16x16xf32>
    %677 = arith.mulf %675, %676 : vector<1x16x16xf32>
    %678 = arith.subf %674, %677 : vector<1x16x16xf32>
    %c0_305 = arith.constant 0 : index
    %c0_306 = arith.constant 0 : index
    %c0_307 = arith.constant 0 : index
    %679 = vector.load %arg5[%c0_305, %c0_306, %c0_307] : memref<1x16x16xf32, #tpu.memory_space<vmem>>, vector<1x16x16xf32>
    tpu.vector_store %arg5[%c0_305, %c0_306, %c0_307], %678 {strides = array<i32>} : memref<1x16x16xf32, #tpu.memory_space<vmem>>, vector<1x16x16xf32>,
    %c15_i32 = arith.constant 15 : i32
    %c0_308 = arith.constant 0 : index
    %680 = arith.index_cast %c15_i32 : i32 to index
    %c0_309 = arith.constant 0 : index
    %681 = vector.load %arg5[%c0_308, %680, %c0_309] : memref<1x16x16xf32, #tpu.memory_space<vmem>>, vector<1x1x16xf32>
    %682 = vector.broadcast %c15_i32 : i32 to vector<1x1x16xi32>
    %683 = arith.cmpi eq, %0, %682 : vector<1x1x16xi32>
    %684 = arith.addf %681, %1 : vector<1x1x16xf32>
    %cst_310 = arith.constant 0.000000e+00 : f32
    %685 = vector.broadcast %cst_310 : f32 to vector<1x1x16xf32>
    %686 = arith.select %683, %684, %685 : vector<1x1x16xi1>, vector<1x1x16xf32>
    %cst_311 = arith.constant dense<0.000000e+00> : vector<1x1xf32>
    %687 = vector.multi_reduction <add>, %686, %cst_311 [2] : vector<1x1x16xf32> to vector<1x1xf32>
    %688 = vector.shape_cast %687 : vector<1x1xf32> to vector<1x1x1xf32>
    %cst_312 = arith.constant 0.000000e+00 : f32
    %689 = vector.broadcast %cst_312 : f32 to vector<1x1x1xf32>
    %690 = arith.cmpf ole, %688, %689 : vector<1x1x1xf32>
    %c0_i32_313 = arith.constant 0 : i32
    %691 = vector.broadcast %c0_i32_313 : i32 to vector<1x1x1xi32>
    %692 = arith.cmpi eq, %651, %691 : vector<1x1x1xi32>
    %693 = arith.andi %690, %692 : vector<1x1x1xi1>
    %c1_i32_314 = arith.constant 1 : i32
    %694 = arith.addi %c15_i32, %c1_i32_314 : i32
    %695 = vector.broadcast %694 : i32 to vector<1x1x1xi32>
    %696 = arith.select %693, %695, %651 : vector<1x1x1xi1>, vector<1x1x1xi32>
    %cst_315 = arith.constant 0.000000e+00 : f32
    %697 = vector.broadcast %cst_315 : f32 to vector<1x1x1xf32>
    %698 = arith.cmpf ogt, %688, %697 : vector<1x1x1xf32>
    %cst_316 = arith.constant 1.000000e+00 : f32
    %699 = vector.broadcast %cst_316 : f32 to vector<1x1x1xf32>
    %700 = arith.select %698, %688, %699 : vector<1x1x1xi1>, vector<1x1x1xf32>
    %701 = math.rsqrt %700 : vector<1x1x1xf32>
    %702 = arith.mulf %700, %701 : vector<1x1x1xf32>
    %703 = vector.broadcast %c15_i32 : i32 to vector<1x1x16xi32>
    %704 = arith.cmpi eq, %0, %703 : vector<1x1x16xi32>
    %705 = vector.broadcast %c15_i32 : i32 to vector<1x1x16xi32>
    %706 = arith.cmpi sgt, %0, %705 : vector<1x1x16xi32>
    %707 = vector.broadcast %701 : vector<1x1x1xf32> to vector<1x1x16xf32>
    %708 = arith.mulf %681, %707 : vector<1x1x16xf32>
    %cst_317 = arith.constant 0.000000e+00 : f32
    %709 = vector.broadcast %cst_317 : f32 to vector<1x1x16xf32>
    %710 = arith.select %706, %708, %709 : vector<1x1x16xi1>, vector<1x1x16xf32>
    %711 = vector.shape_cast %702 : vector<1x1x1xf32> to vector<1x1x1xf32>
    %712 = vector.broadcast %711 : vector<1x1x1xf32> to vector<1x1x16xf32>
    %713 = arith.select %704, %712, %710 : vector<1x1x16xi1>, vector<1x1x16xf32>
    %c0_318 = arith.constant 0 : index
    %714 = arith.index_cast %c15_i32 : i32 to index
    %c0_319 = arith.constant 0 : index
    %715 = vector.load %arg9[%c0_318, %714, %c0_319] : memref<1x16x16xf32, #tpu.memory_space<vmem>>, vector<1x1x16xf32>
    tpu.vector_store %arg9[%c0_318, %714, %c0_319], %713 {strides = array<i32>} : memref<1x16x16xf32, #tpu.memory_space<vmem>>, vector<1x1x16xf32>,
    %c0_320 = arith.constant 0 : index
    %716 = arith.index_cast %c15_i32 : i32 to index
    %c0_321 = arith.constant 0 : index
    %717 = vector.load %arg10[%c0_320, %716, %c0_321] : memref<1x16x1xf32, #tpu.memory_space<vmem>>, vector<1x1x1xf32>
    tpu.vector_store %arg10[%c0_320, %716, %c0_321], %701 {strides = array<i32>} : memref<1x16x1xf32, #tpu.memory_space<vmem>>, vector<1x1x1xf32>,
    %718 = tpu.transpose %713, [0, 2, 1] : vector<1x1x16xf32> -> vector<1x16x1xf32>
    %c0_322 = arith.constant 0 : index
    %c0_323 = arith.constant 0 : index
    %c0_324 = arith.constant 0 : index
    %719 = vector.load %arg5[%c0_322, %c0_323, %c0_324] : memref<1x16x16xf32, #tpu.memory_space<vmem>>, vector<1x16x16xf32>
    %720 = vector.broadcast %718 : vector<1x16x1xf32> to vector<1x16x16xf32>
    %721 = vector.broadcast %713 : vector<1x1x16xf32> to vector<1x16x16xf32>
    %722 = arith.mulf %720, %721 : vector<1x16x16xf32>
    %723 = arith.subf %719, %722 : vector<1x16x16xf32>
    %c0_325 = arith.constant 0 : index
    %c0_326 = arith.constant 0 : index
    %c0_327 = arith.constant 0 : index
    %724 = vector.load %arg5[%c0_325, %c0_326, %c0_327] : memref<1x16x16xf32, #tpu.memory_space<vmem>>, vector<1x16x16xf32>
    tpu.vector_store %arg5[%c0_325, %c0_326, %c0_327], %723 {strides = array<i32>} : memref<1x16x16xf32, #tpu.memory_space<vmem>>, vector<1x16x16xf32>,
    %c16_i32 = arith.constant 16 : i32
    %c0_328 = arith.constant 0 : index
    %c0_329 = arith.constant 0 : index
    %c0_330 = arith.constant 0 : index
    %725 = vector.load %arg8[%c0_328, %c0_329, %c0_330] : memref<1x1x1xi32, #tpu.memory_space<vmem>>, vector<1x1x1xi32>
    tpu.vector_store %arg8[%c0_328, %c0_329, %c0_330], %696 {strides = array<i32>} : memref<1x1x1xi32, #tpu.memory_space<vmem>>, vector<1x1x1xi32>,
    %c0_331 = arith.constant 0 : index
    %c0_332 = arith.constant 0 : index
    %c0_333 = arith.constant 0 : index
    %726 = vector.load %arg9[%c0_331, %c0_332, %c0_333] : memref<1x16x16xf32, #tpu.memory_space<vmem>>, vector<1x16x16xf32>
    %727 = tpu.transpose %726, [0, 2, 1] : vector<1x16x16xf32> -> vector<1x16x16xf32>
    %c0_334 = arith.constant 0 : index
    %c0_335 = arith.constant 0 : index
    %c0_336 = arith.constant 0 : index
    %728 = vector.load %arg5[%c0_334, %c0_335, %c0_336] : memref<1x16x16xf32, #tpu.memory_space<vmem>>, vector<1x16x16xf32>
    tpu.vector_store %arg5[%c0_334, %c0_335, %c0_336], %727 {strides = array<i32>} : memref<1x16x16xf32, #tpu.memory_space<vmem>>, vector<1x16x16xf32>,
    %c0_337 = arith.constant 0 : index
    %c0_338 = arith.constant 0 : index
    %c0_339 = arith.constant 0 : index
    %729 = vector.load %arg10[%c0_337, %c0_338, %c0_339] : memref<1x16x1xf32, #tpu.memory_space<vmem>>, vector<1x16x1xf32>
    %730 = math.log %729 : vector<1x16x1xf32>
    %cst_340 = arith.constant dense<0.000000e+00> : vector<1x1xf32>
    %731 = vector.multi_reduction <add>, %730, %cst_340 [1] : vector<1x16x1xf32> to vector<1x1xf32>
    %732 = vector.shape_cast %731 : vector<1x1xf32> to vector<1x1x1xf32>
    %cst_341 = arith.constant 0.000000e+00 : f32
    %733 = vector.broadcast %cst_341 : f32 to vector<1x1x1xf32>
    %734 = arith.subf %733, %732 : vector<1x1x1xf32>
    %c0_342 = arith.constant 0 : index
    %c0_343 = arith.constant 0 : index
    %c0_344 = arith.constant 0 : index
    %735 = vector.load %arg2[%c0_342, %c0_343, %c0_344] : memref<1x2x16xf32, #tpu.memory_space<vmem>>, vector<1x2x16xf32>
    %c0_345 = arith.constant 0 : index
    %c0_346 = arith.constant 0 : index
    %c0_347 = arith.constant 0 : index
    %736 = vector.load %arg3[%c0_345, %c0_346, %c0_347] : memref<1x2x1xf32, #tpu.memory_space<vmem>>, vector<1x2x1xf32>
    %737 = vector.broadcast %736 : vector<1x2x1xf32> to vector<1x2x16xf32>
    %738 = arith.subf %735, %737 : vector<1x2x16xf32>
    %c0_i32_348 = arith.constant 0 : i32
    %c0_349 = arith.constant 0 : index
    %739 = arith.index_cast %c0_i32_348 : i32 to index
    %c0_350 = arith.constant 0 : index
    %740 = vector.load %arg9[%c0_349, %739, %c0_350] : memref<1x16x16xf32, #tpu.memory_space<vmem>>, vector<1x1x16xf32>
    %c0_351 = arith.constant 0 : index
    %741 = arith.index_cast %c0_i32_348 : i32 to index
    %c0_352 = arith.constant 0 : index
    %742 = vector.load %arg10[%c0_351, %741, %c0_352] : memref<1x16x1xf32, #tpu.memory_space<vmem>>, vector<1x1x1xf32>
    %743 = vector.broadcast %c0_i32_348 : i32 to vector<1x1x16xi32>
    %744 = arith.cmpi eq, %0, %743 : vector<1x1x16xi32>
    %cst_353 = arith.constant 0.000000e+00 : f32
    %745 = vector.shape_cast %744 : vector<1x1x16xi1> to vector<1x1x16xi1>
    %746 = vector.broadcast %745 : vector<1x1x16xi1> to vector<1x2x16xi1>
    %747 = vector.broadcast %cst_353 : f32 to vector<1x2x16xf32>
    %748 = arith.select %746, %738, %747 : vector<1x2x16xi1>, vector<1x2x16xf32>
    %cst_354 = arith.constant dense<0.000000e+00> : vector<1x2xf32>
    %749 = vector.multi_reduction <add>, %748, %cst_354 [2] : vector<1x2x16xf32> to vector<1x2xf32>
    %750 = vector.shape_cast %749 : vector<1x2xf32> to vector<1x2x1xf32>
    %751 = vector.broadcast %742 : vector<1x1x1xf32> to vector<1x2x1xf32>
    %752 = arith.mulf %750, %751 : vector<1x2x1xf32>
    %753 = vector.broadcast %c0_i32_348 : i32 to vector<1x1x16xi32>
    %754 = arith.cmpi sgt, %0, %753 : vector<1x1x16xi32>
    %cst_355 = arith.constant 0.000000e+00 : f32
    %755 = vector.broadcast %cst_355 : f32 to vector<1x1x16xf32>
    %756 = arith.select %754, %740, %755 : vector<1x1x16xi1>, vector<1x1x16xf32>
    %757 = vector.broadcast %752 : vector<1x2x1xf32> to vector<1x2x16xf32>
    %758 = vector.broadcast %756 : vector<1x1x16xf32> to vector<1x2x16xf32>
    %759 = arith.mulf %757, %758 : vector<1x2x16xf32>
    %760 = arith.subf %738, %759 : vector<1x2x16xf32>
    %761 = vector.broadcast %c0_i32_348 : i32 to vector<1x1x16xi32>
    %762 = arith.cmpi eq, %0, %761 : vector<1x1x16xi32>
    %763 = vector.shape_cast %762 : vector<1x1x16xi1> to vector<1x1x16xi1>
    %764 = vector.broadcast %763 : vector<1x1x16xi1> to vector<1x2x16xi1>
    %765 = vector.shape_cast %752 : vector<1x2x1xf32> to vector<1x2x1xf32>
    %766 = vector.broadcast %765 : vector<1x2x1xf32> to vector<1x2x16xf32>
    %767 = arith.select %764, %766, %760 : vector<1x2x16xi1>, vector<1x2x16xf32>
    %c1_i32_356 = arith.constant 1 : i32
    %c0_357 = arith.constant 0 : index
    %768 = arith.index_cast %c1_i32_356 : i32 to index
    %c0_358 = arith.constant 0 : index
    %769 = vector.load %arg9[%c0_357, %768, %c0_358] : memref<1x16x16xf32, #tpu.memory_space<vmem>>, vector<1x1x16xf32>
    %c0_359 = arith.constant 0 : index
    %770 = arith.index_cast %c1_i32_356 : i32 to index
    %c0_360 = arith.constant 0 : index
    %771 = vector.load %arg10[%c0_359, %770, %c0_360] : memref<1x16x1xf32, #tpu.memory_space<vmem>>, vector<1x1x1xf32>
    %772 = vector.broadcast %c1_i32_356 : i32 to vector<1x1x16xi32>
    %773 = arith.cmpi eq, %0, %772 : vector<1x1x16xi32>
    %cst_361 = arith.constant 0.000000e+00 : f32
    %774 = vector.shape_cast %773 : vector<1x1x16xi1> to vector<1x1x16xi1>
    %775 = vector.broadcast %774 : vector<1x1x16xi1> to vector<1x2x16xi1>
    %776 = vector.broadcast %cst_361 : f32 to vector<1x2x16xf32>
    %777 = arith.select %775, %767, %776 : vector<1x2x16xi1>, vector<1x2x16xf32>
    %cst_362 = arith.constant dense<0.000000e+00> : vector<1x2xf32>
    %778 = vector.multi_reduction <add>, %777, %cst_362 [2] : vector<1x2x16xf32> to vector<1x2xf32>
    %779 = vector.shape_cast %778 : vector<1x2xf32> to vector<1x2x1xf32>
    %780 = vector.broadcast %771 : vector<1x1x1xf32> to vector<1x2x1xf32>
    %781 = arith.mulf %779, %780 : vector<1x2x1xf32>
    %782 = vector.broadcast %c1_i32_356 : i32 to vector<1x1x16xi32>
    %783 = arith.cmpi sgt, %0, %782 : vector<1x1x16xi32>
    %cst_363 = arith.constant 0.000000e+00 : f32
    %784 = vector.broadcast %cst_363 : f32 to vector<1x1x16xf32>
    %785 = arith.select %783, %769, %784 : vector<1x1x16xi1>, vector<1x1x16xf32>
    %786 = vector.broadcast %781 : vector<1x2x1xf32> to vector<1x2x16xf32>
    %787 = vector.broadcast %785 : vector<1x1x16xf32> to vector<1x2x16xf32>
    %788 = arith.mulf %786, %787 : vector<1x2x16xf32>
    %789 = arith.subf %767, %788 : vector<1x2x16xf32>
    %790 = vector.broadcast %c1_i32_356 : i32 to vector<1x1x16xi32>
    %791 = arith.cmpi eq, %0, %790 : vector<1x1x16xi32>
    %792 = vector.shape_cast %791 : vector<1x1x16xi1> to vector<1x1x16xi1>
    %793 = vector.broadcast %792 : vector<1x1x16xi1> to vector<1x2x16xi1>
    %794 = vector.shape_cast %781 : vector<1x2x1xf32> to vector<1x2x1xf32>
    %795 = vector.broadcast %794 : vector<1x2x1xf32> to vector<1x2x16xf32>
    %796 = arith.select %793, %795, %789 : vector<1x2x16xi1>, vector<1x2x16xf32>
    %c2_i32_364 = arith.constant 2 : i32
    %c0_365 = arith.constant 0 : index
    %797 = arith.index_cast %c2_i32_364 : i32 to index
    %c0_366 = arith.constant 0 : index
    %798 = vector.load %arg9[%c0_365, %797, %c0_366] : memref<1x16x16xf32, #tpu.memory_space<vmem>>, vector<1x1x16xf32>
    %c0_367 = arith.constant 0 : index
    %799 = arith.index_cast %c2_i32_364 : i32 to index
    %c0_368 = arith.constant 0 : index
    %800 = vector.load %arg10[%c0_367, %799, %c0_368] : memref<1x16x1xf32, #tpu.memory_space<vmem>>, vector<1x1x1xf32>
    %801 = vector.broadcast %c2_i32_364 : i32 to vector<1x1x16xi32>
    %802 = arith.cmpi eq, %0, %801 : vector<1x1x16xi32>
    %cst_369 = arith.constant 0.000000e+00 : f32
    %803 = vector.shape_cast %802 : vector<1x1x16xi1> to vector<1x1x16xi1>
    %804 = vector.broadcast %803 : vector<1x1x16xi1> to vector<1x2x16xi1>
    %805 = vector.broadcast %cst_369 : f32 to vector<1x2x16xf32>
    %806 = arith.select %804, %796, %805 : vector<1x2x16xi1>, vector<1x2x16xf32>
    %cst_370 = arith.constant dense<0.000000e+00> : vector<1x2xf32>
    %807 = vector.multi_reduction <add>, %806, %cst_370 [2] : vector<1x2x16xf32> to vector<1x2xf32>
    %808 = vector.shape_cast %807 : vector<1x2xf32> to vector<1x2x1xf32>
    %809 = vector.broadcast %800 : vector<1x1x1xf32> to vector<1x2x1xf32>
    %810 = arith.mulf %808, %809 : vector<1x2x1xf32>
    %811 = vector.broadcast %c2_i32_364 : i32 to vector<1x1x16xi32>
    %812 = arith.cmpi sgt, %0, %811 : vector<1x1x16xi32>
    %cst_371 = arith.constant 0.000000e+00 : f32
    %813 = vector.broadcast %cst_371 : f32 to vector<1x1x16xf32>
    %814 = arith.select %812, %798, %813 : vector<1x1x16xi1>, vector<1x1x16xf32>
    %815 = vector.broadcast %810 : vector<1x2x1xf32> to vector<1x2x16xf32>
    %816 = vector.broadcast %814 : vector<1x1x16xf32> to vector<1x2x16xf32>
    %817 = arith.mulf %815, %816 : vector<1x2x16xf32>
    %818 = arith.subf %796, %817 : vector<1x2x16xf32>
    %819 = vector.broadcast %c2_i32_364 : i32 to vector<1x1x16xi32>
    %820 = arith.cmpi eq, %0, %819 : vector<1x1x16xi32>
    %821 = vector.shape_cast %820 : vector<1x1x16xi1> to vector<1x1x16xi1>
    %822 = vector.broadcast %821 : vector<1x1x16xi1> to vector<1x2x16xi1>
    %823 = vector.shape_cast %810 : vector<1x2x1xf32> to vector<1x2x1xf32>
    %824 = vector.broadcast %823 : vector<1x2x1xf32> to vector<1x2x16xf32>
    %825 = arith.select %822, %824, %818 : vector<1x2x16xi1>, vector<1x2x16xf32>
    %c3_i32_372 = arith.constant 3 : i32
    %c0_373 = arith.constant 0 : index
    %826 = arith.index_cast %c3_i32_372 : i32 to index
    %c0_374 = arith.constant 0 : index
    %827 = vector.load %arg9[%c0_373, %826, %c0_374] : memref<1x16x16xf32, #tpu.memory_space<vmem>>, vector<1x1x16xf32>
    %c0_375 = arith.constant 0 : index
    %828 = arith.index_cast %c3_i32_372 : i32 to index
    %c0_376 = arith.constant 0 : index
    %829 = vector.load %arg10[%c0_375, %828, %c0_376] : memref<1x16x1xf32, #tpu.memory_space<vmem>>, vector<1x1x1xf32>
    %830 = vector.broadcast %c3_i32_372 : i32 to vector<1x1x16xi32>
    %831 = arith.cmpi eq, %0, %830 : vector<1x1x16xi32>
    %cst_377 = arith.constant 0.000000e+00 : f32
    %832 = vector.shape_cast %831 : vector<1x1x16xi1> to vector<1x1x16xi1>
    %833 = vector.broadcast %832 : vector<1x1x16xi1> to vector<1x2x16xi1>
    %834 = vector.broadcast %cst_377 : f32 to vector<1x2x16xf32>
    %835 = arith.select %833, %825, %834 : vector<1x2x16xi1>, vector<1x2x16xf32>
    %cst_378 = arith.constant dense<0.000000e+00> : vector<1x2xf32>
    %836 = vector.multi_reduction <add>, %835, %cst_378 [2] : vector<1x2x16xf32> to vector<1x2xf32>
    %837 = vector.shape_cast %836 : vector<1x2xf32> to vector<1x2x1xf32>
    %838 = vector.broadcast %829 : vector<1x1x1xf32> to vector<1x2x1xf32>
    %839 = arith.mulf %837, %838 : vector<1x2x1xf32>
    %840 = vector.broadcast %c3_i32_372 : i32 to vector<1x1x16xi32>
    %841 = arith.cmpi sgt, %0, %840 : vector<1x1x16xi32>
    %cst_379 = arith.constant 0.000000e+00 : f32
    %842 = vector.broadcast %cst_379 : f32 to vector<1x1x16xf32>
    %843 = arith.select %841, %827, %842 : vector<1x1x16xi1>, vector<1x1x16xf32>
    %844 = vector.broadcast %839 : vector<1x2x1xf32> to vector<1x2x16xf32>
    %845 = vector.broadcast %843 : vector<1x1x16xf32> to vector<1x2x16xf32>
    %846 = arith.mulf %844, %845 : vector<1x2x16xf32>
    %847 = arith.subf %825, %846 : vector<1x2x16xf32>
    %848 = vector.broadcast %c3_i32_372 : i32 to vector<1x1x16xi32>
    %849 = arith.cmpi eq, %0, %848 : vector<1x1x16xi32>
    %850 = vector.shape_cast %849 : vector<1x1x16xi1> to vector<1x1x16xi1>
    %851 = vector.broadcast %850 : vector<1x1x16xi1> to vector<1x2x16xi1>
    %852 = vector.shape_cast %839 : vector<1x2x1xf32> to vector<1x2x1xf32>
    %853 = vector.broadcast %852 : vector<1x2x1xf32> to vector<1x2x16xf32>
    %854 = arith.select %851, %853, %847 : vector<1x2x16xi1>, vector<1x2x16xf32>
    %c4_i32_380 = arith.constant 4 : i32
    %c0_381 = arith.constant 0 : index
    %855 = arith.index_cast %c4_i32_380 : i32 to index
    %c0_382 = arith.constant 0 : index
    %856 = vector.load %arg9[%c0_381, %855, %c0_382] : memref<1x16x16xf32, #tpu.memory_space<vmem>>, vector<1x1x16xf32>
    %c0_383 = arith.constant 0 : index
    %857 = arith.index_cast %c4_i32_380 : i32 to index
    %c0_384 = arith.constant 0 : index
    %858 = vector.load %arg10[%c0_383, %857, %c0_384] : memref<1x16x1xf32, #tpu.memory_space<vmem>>, vector<1x1x1xf32>
    %859 = vector.broadcast %c4_i32_380 : i32 to vector<1x1x16xi32>
    %860 = arith.cmpi eq, %0, %859 : vector<1x1x16xi32>
    %cst_385 = arith.constant 0.000000e+00 : f32
    %861 = vector.shape_cast %860 : vector<1x1x16xi1> to vector<1x1x16xi1>
    %862 = vector.broadcast %861 : vector<1x1x16xi1> to vector<1x2x16xi1>
    %863 = vector.broadcast %cst_385 : f32 to vector<1x2x16xf32>
    %864 = arith.select %862, %854, %863 : vector<1x2x16xi1>, vector<1x2x16xf32>
    %cst_386 = arith.constant dense<0.000000e+00> : vector<1x2xf32>
    %865 = vector.multi_reduction <add>, %864, %cst_386 [2] : vector<1x2x16xf32> to vector<1x2xf32>
    %866 = vector.shape_cast %865 : vector<1x2xf32> to vector<1x2x1xf32>
    %867 = vector.broadcast %858 : vector<1x1x1xf32> to vector<1x2x1xf32>
    %868 = arith.mulf %866, %867 : vector<1x2x1xf32>
    %869 = vector.broadcast %c4_i32_380 : i32 to vector<1x1x16xi32>
    %870 = arith.cmpi sgt, %0, %869 : vector<1x1x16xi32>
    %cst_387 = arith.constant 0.000000e+00 : f32
    %871 = vector.broadcast %cst_387 : f32 to vector<1x1x16xf32>
    %872 = arith.select %870, %856, %871 : vector<1x1x16xi1>, vector<1x1x16xf32>
    %873 = vector.broadcast %868 : vector<1x2x1xf32> to vector<1x2x16xf32>
    %874 = vector.broadcast %872 : vector<1x1x16xf32> to vector<1x2x16xf32>
    %875 = arith.mulf %873, %874 : vector<1x2x16xf32>
    %876 = arith.subf %854, %875 : vector<1x2x16xf32>
    %877 = vector.broadcast %c4_i32_380 : i32 to vector<1x1x16xi32>
    %878 = arith.cmpi eq, %0, %877 : vector<1x1x16xi32>
    %879 = vector.shape_cast %878 : vector<1x1x16xi1> to vector<1x1x16xi1>
    %880 = vector.broadcast %879 : vector<1x1x16xi1> to vector<1x2x16xi1>
    %881 = vector.shape_cast %868 : vector<1x2x1xf32> to vector<1x2x1xf32>
    %882 = vector.broadcast %881 : vector<1x2x1xf32> to vector<1x2x16xf32>
    %883 = arith.select %880, %882, %876 : vector<1x2x16xi1>, vector<1x2x16xf32>
    %c5_i32_388 = arith.constant 5 : i32
    %c0_389 = arith.constant 0 : index
    %884 = arith.index_cast %c5_i32_388 : i32 to index
    %c0_390 = arith.constant 0 : index
    %885 = vector.load %arg9[%c0_389, %884, %c0_390] : memref<1x16x16xf32, #tpu.memory_space<vmem>>, vector<1x1x16xf32>
    %c0_391 = arith.constant 0 : index
    %886 = arith.index_cast %c5_i32_388 : i32 to index
    %c0_392 = arith.constant 0 : index
    %887 = vector.load %arg10[%c0_391, %886, %c0_392] : memref<1x16x1xf32, #tpu.memory_space<vmem>>, vector<1x1x1xf32>
    %888 = vector.broadcast %c5_i32_388 : i32 to vector<1x1x16xi32>
    %889 = arith.cmpi eq, %0, %888 : vector<1x1x16xi32>
    %cst_393 = arith.constant 0.000000e+00 : f32
    %890 = vector.shape_cast %889 : vector<1x1x16xi1> to vector<1x1x16xi1>
    %891 = vector.broadcast %890 : vector<1x1x16xi1> to vector<1x2x16xi1>
    %892 = vector.broadcast %cst_393 : f32 to vector<1x2x16xf32>
    %893 = arith.select %891, %883, %892 : vector<1x2x16xi1>, vector<1x2x16xf32>
    %cst_394 = arith.constant dense<0.000000e+00> : vector<1x2xf32>
    %894 = vector.multi_reduction <add>, %893, %cst_394 [2] : vector<1x2x16xf32> to vector<1x2xf32>
    %895 = vector.shape_cast %894 : vector<1x2xf32> to vector<1x2x1xf32>
    %896 = vector.broadcast %887 : vector<1x1x1xf32> to vector<1x2x1xf32>
    %897 = arith.mulf %895, %896 : vector<1x2x1xf32>
    %898 = vector.broadcast %c5_i32_388 : i32 to vector<1x1x16xi32>
    %899 = arith.cmpi sgt, %0, %898 : vector<1x1x16xi32>
    %cst_395 = arith.constant 0.000000e+00 : f32
    %900 = vector.broadcast %cst_395 : f32 to vector<1x1x16xf32>
    %901 = arith.select %899, %885, %900 : vector<1x1x16xi1>, vector<1x1x16xf32>
    %902 = vector.broadcast %897 : vector<1x2x1xf32> to vector<1x2x16xf32>
    %903 = vector.broadcast %901 : vector<1x1x16xf32> to vector<1x2x16xf32>
    %904 = arith.mulf %902, %903 : vector<1x2x16xf32>
    %905 = arith.subf %883, %904 : vector<1x2x16xf32>
    %906 = vector.broadcast %c5_i32_388 : i32 to vector<1x1x16xi32>
    %907 = arith.cmpi eq, %0, %906 : vector<1x1x16xi32>
    %908 = vector.shape_cast %907 : vector<1x1x16xi1> to vector<1x1x16xi1>
    %909 = vector.broadcast %908 : vector<1x1x16xi1> to vector<1x2x16xi1>
    %910 = vector.shape_cast %897 : vector<1x2x1xf32> to vector<1x2x1xf32>
    %911 = vector.broadcast %910 : vector<1x2x1xf32> to vector<1x2x16xf32>
    %912 = arith.select %909, %911, %905 : vector<1x2x16xi1>, vector<1x2x16xf32>
    %c6_i32_396 = arith.constant 6 : i32
    %c0_397 = arith.constant 0 : index
    %913 = arith.index_cast %c6_i32_396 : i32 to index
    %c0_398 = arith.constant 0 : index
    %914 = vector.load %arg9[%c0_397, %913, %c0_398] : memref<1x16x16xf32, #tpu.memory_space<vmem>>, vector<1x1x16xf32>
    %c0_399 = arith.constant 0 : index
    %915 = arith.index_cast %c6_i32_396 : i32 to index
    %c0_400 = arith.constant 0 : index
    %916 = vector.load %arg10[%c0_399, %915, %c0_400] : memref<1x16x1xf32, #tpu.memory_space<vmem>>, vector<1x1x1xf32>
    %917 = vector.broadcast %c6_i32_396 : i32 to vector<1x1x16xi32>
    %918 = arith.cmpi eq, %0, %917 : vector<1x1x16xi32>
    %cst_401 = arith.constant 0.000000e+00 : f32
    %919 = vector.shape_cast %918 : vector<1x1x16xi1> to vector<1x1x16xi1>
    %920 = vector.broadcast %919 : vector<1x1x16xi1> to vector<1x2x16xi1>
    %921 = vector.broadcast %cst_401 : f32 to vector<1x2x16xf32>
    %922 = arith.select %920, %912, %921 : vector<1x2x16xi1>, vector<1x2x16xf32>
    %cst_402 = arith.constant dense<0.000000e+00> : vector<1x2xf32>
    %923 = vector.multi_reduction <add>, %922, %cst_402 [2] : vector<1x2x16xf32> to vector<1x2xf32>
    %924 = vector.shape_cast %923 : vector<1x2xf32> to vector<1x2x1xf32>
    %925 = vector.broadcast %916 : vector<1x1x1xf32> to vector<1x2x1xf32>
    %926 = arith.mulf %924, %925 : vector<1x2x1xf32>
    %927 = vector.broadcast %c6_i32_396 : i32 to vector<1x1x16xi32>
    %928 = arith.cmpi sgt, %0, %927 : vector<1x1x16xi32>
    %cst_403 = arith.constant 0.000000e+00 : f32
    %929 = vector.broadcast %cst_403 : f32 to vector<1x1x16xf32>
    %930 = arith.select %928, %914, %929 : vector<1x1x16xi1>, vector<1x1x16xf32>
    %931 = vector.broadcast %926 : vector<1x2x1xf32> to vector<1x2x16xf32>
    %932 = vector.broadcast %930 : vector<1x1x16xf32> to vector<1x2x16xf32>
    %933 = arith.mulf %931, %932 : vector<1x2x16xf32>
    %934 = arith.subf %912, %933 : vector<1x2x16xf32>
    %935 = vector.broadcast %c6_i32_396 : i32 to vector<1x1x16xi32>
    %936 = arith.cmpi eq, %0, %935 : vector<1x1x16xi32>
    %937 = vector.shape_cast %936 : vector<1x1x16xi1> to vector<1x1x16xi1>
    %938 = vector.broadcast %937 : vector<1x1x16xi1> to vector<1x2x16xi1>
    %939 = vector.shape_cast %926 : vector<1x2x1xf32> to vector<1x2x1xf32>
    %940 = vector.broadcast %939 : vector<1x2x1xf32> to vector<1x2x16xf32>
    %941 = arith.select %938, %940, %934 : vector<1x2x16xi1>, vector<1x2x16xf32>
    %c7_i32_404 = arith.constant 7 : i32
    %c0_405 = arith.constant 0 : index
    %942 = arith.index_cast %c7_i32_404 : i32 to index
    %c0_406 = arith.constant 0 : index
    %943 = vector.load %arg9[%c0_405, %942, %c0_406] : memref<1x16x16xf32, #tpu.memory_space<vmem>>, vector<1x1x16xf32>
    %c0_407 = arith.constant 0 : index
    %944 = arith.index_cast %c7_i32_404 : i32 to index
    %c0_408 = arith.constant 0 : index
    %945 = vector.load %arg10[%c0_407, %944, %c0_408] : memref<1x16x1xf32, #tpu.memory_space<vmem>>, vector<1x1x1xf32>
    %946 = vector.broadcast %c7_i32_404 : i32 to vector<1x1x16xi32>
    %947 = arith.cmpi eq, %0, %946 : vector<1x1x16xi32>
    %cst_409 = arith.constant 0.000000e+00 : f32
    %948 = vector.shape_cast %947 : vector<1x1x16xi1> to vector<1x1x16xi1>
    %949 = vector.broadcast %948 : vector<1x1x16xi1> to vector<1x2x16xi1>
    %950 = vector.broadcast %cst_409 : f32 to vector<1x2x16xf32>
    %951 = arith.select %949, %941, %950 : vector<1x2x16xi1>, vector<1x2x16xf32>
    %cst_410 = arith.constant dense<0.000000e+00> : vector<1x2xf32>
    %952 = vector.multi_reduction <add>, %951, %cst_410 [2] : vector<1x2x16xf32> to vector<1x2xf32>
    %953 = vector.shape_cast %952 : vector<1x2xf32> to vector<1x2x1xf32>
    %954 = vector.broadcast %945 : vector<1x1x1xf32> to vector<1x2x1xf32>
    %955 = arith.mulf %953, %954 : vector<1x2x1xf32>
    %956 = vector.broadcast %c7_i32_404 : i32 to vector<1x1x16xi32>
    %957 = arith.cmpi sgt, %0, %956 : vector<1x1x16xi32>
    %cst_411 = arith.constant 0.000000e+00 : f32
    %958 = vector.broadcast %cst_411 : f32 to vector<1x1x16xf32>
    %959 = arith.select %957, %943, %958 : vector<1x1x16xi1>, vector<1x1x16xf32>
    %960 = vector.broadcast %955 : vector<1x2x1xf32> to vector<1x2x16xf32>
    %961 = vector.broadcast %959 : vector<1x1x16xf32> to vector<1x2x16xf32>
    %962 = arith.mulf %960, %961 : vector<1x2x16xf32>
    %963 = arith.subf %941, %962 : vector<1x2x16xf32>
    %964 = vector.broadcast %c7_i32_404 : i32 to vector<1x1x16xi32>
    %965 = arith.cmpi eq, %0, %964 : vector<1x1x16xi32>
    %966 = vector.shape_cast %965 : vector<1x1x16xi1> to vector<1x1x16xi1>
    %967 = vector.broadcast %966 : vector<1x1x16xi1> to vector<1x2x16xi1>
    %968 = vector.shape_cast %955 : vector<1x2x1xf32> to vector<1x2x1xf32>
    %969 = vector.broadcast %968 : vector<1x2x1xf32> to vector<1x2x16xf32>
    %970 = arith.select %967, %969, %963 : vector<1x2x16xi1>, vector<1x2x16xf32>
    %c8_i32_412 = arith.constant 8 : i32
    %c0_413 = arith.constant 0 : index
    %971 = arith.index_cast %c8_i32_412 : i32 to index
    %c0_414 = arith.constant 0 : index
    %972 = vector.load %arg9[%c0_413, %971, %c0_414] : memref<1x16x16xf32, #tpu.memory_space<vmem>>, vector<1x1x16xf32>
    %c0_415 = arith.constant 0 : index
    %973 = arith.index_cast %c8_i32_412 : i32 to index
    %c0_416 = arith.constant 0 : index
    %974 = vector.load %arg10[%c0_415, %973, %c0_416] : memref<1x16x1xf32, #tpu.memory_space<vmem>>, vector<1x1x1xf32>
    %975 = vector.broadcast %c8_i32_412 : i32 to vector<1x1x16xi32>
    %976 = arith.cmpi eq, %0, %975 : vector<1x1x16xi32>
    %cst_417 = arith.constant 0.000000e+00 : f32
    %977 = vector.shape_cast %976 : vector<1x1x16xi1> to vector<1x1x16xi1>
    %978 = vector.broadcast %977 : vector<1x1x16xi1> to vector<1x2x16xi1>
    %979 = vector.broadcast %cst_417 : f32 to vector<1x2x16xf32>
    %980 = arith.select %978, %970, %979 : vector<1x2x16xi1>, vector<1x2x16xf32>
    %cst_418 = arith.constant dense<0.000000e+00> : vector<1x2xf32>
    %981 = vector.multi_reduction <add>, %980, %cst_418 [2] : vector<1x2x16xf32> to vector<1x2xf32>
    %982 = vector.shape_cast %981 : vector<1x2xf32> to vector<1x2x1xf32>
    %983 = vector.broadcast %974 : vector<1x1x1xf32> to vector<1x2x1xf32>
    %984 = arith.mulf %982, %983 : vector<1x2x1xf32>
    %985 = vector.broadcast %c8_i32_412 : i32 to vector<1x1x16xi32>
    %986 = arith.cmpi sgt, %0, %985 : vector<1x1x16xi32>
    %cst_419 = arith.constant 0.000000e+00 : f32
    %987 = vector.broadcast %cst_419 : f32 to vector<1x1x16xf32>
    %988 = arith.select %986, %972, %987 : vector<1x1x16xi1>, vector<1x1x16xf32>
    %989 = vector.broadcast %984 : vector<1x2x1xf32> to vector<1x2x16xf32>
    %990 = vector.broadcast %988 : vector<1x1x16xf32> to vector<1x2x16xf32>
    %991 = arith.mulf %989, %990 : vector<1x2x16xf32>
    %992 = arith.subf %970, %991 : vector<1x2x16xf32>
    %993 = vector.broadcast %c8_i32_412 : i32 to vector<1x1x16xi32>
    %994 = arith.cmpi eq, %0, %993 : vector<1x1x16xi32>
    %995 = vector.shape_cast %994 : vector<1x1x16xi1> to vector<1x1x16xi1>
    %996 = vector.broadcast %995 : vector<1x1x16xi1> to vector<1x2x16xi1>
    %997 = vector.shape_cast %984 : vector<1x2x1xf32> to vector<1x2x1xf32>
    %998 = vector.broadcast %997 : vector<1x2x1xf32> to vector<1x2x16xf32>
    %999 = arith.select %996, %998, %992 : vector<1x2x16xi1>, vector<1x2x16xf32>
    %c9_i32_420 = arith.constant 9 : i32
    %c0_421 = arith.constant 0 : index
    %1000 = arith.index_cast %c9_i32_420 : i32 to index
    %c0_422 = arith.constant 0 : index
    %1001 = vector.load %arg9[%c0_421, %1000, %c0_422] : memref<1x16x16xf32, #tpu.memory_space<vmem>>, vector<1x1x16xf32>
    %c0_423 = arith.constant 0 : index
    %1002 = arith.index_cast %c9_i32_420 : i32 to index
    %c0_424 = arith.constant 0 : index
    %1003 = vector.load %arg10[%c0_423, %1002, %c0_424] : memref<1x16x1xf32, #tpu.memory_space<vmem>>, vector<1x1x1xf32>
    %1004 = vector.broadcast %c9_i32_420 : i32 to vector<1x1x16xi32>
    %1005 = arith.cmpi eq, %0, %1004 : vector<1x1x16xi32>
    %cst_425 = arith.constant 0.000000e+00 : f32
    %1006 = vector.shape_cast %1005 : vector<1x1x16xi1> to vector<1x1x16xi1>
    %1007 = vector.broadcast %1006 : vector<1x1x16xi1> to vector<1x2x16xi1>
    %1008 = vector.broadcast %cst_425 : f32 to vector<1x2x16xf32>
    %1009 = arith.select %1007, %999, %1008 : vector<1x2x16xi1>, vector<1x2x16xf32>
    %cst_426 = arith.constant dense<0.000000e+00> : vector<1x2xf32>
    %1010 = vector.multi_reduction <add>, %1009, %cst_426 [2] : vector<1x2x16xf32> to vector<1x2xf32>
    %1011 = vector.shape_cast %1010 : vector<1x2xf32> to vector<1x2x1xf32>
    %1012 = vector.broadcast %1003 : vector<1x1x1xf32> to vector<1x2x1xf32>
    %1013 = arith.mulf %1011, %1012 : vector<1x2x1xf32>
    %1014 = vector.broadcast %c9_i32_420 : i32 to vector<1x1x16xi32>
    %1015 = arith.cmpi sgt, %0, %1014 : vector<1x1x16xi32>
    %cst_427 = arith.constant 0.000000e+00 : f32
    %1016 = vector.broadcast %cst_427 : f32 to vector<1x1x16xf32>
    %1017 = arith.select %1015, %1001, %1016 : vector<1x1x16xi1>, vector<1x1x16xf32>
    %1018 = vector.broadcast %1013 : vector<1x2x1xf32> to vector<1x2x16xf32>
    %1019 = vector.broadcast %1017 : vector<1x1x16xf32> to vector<1x2x16xf32>
    %1020 = arith.mulf %1018, %1019 : vector<1x2x16xf32>
    %1021 = arith.subf %999, %1020 : vector<1x2x16xf32>
    %1022 = vector.broadcast %c9_i32_420 : i32 to vector<1x1x16xi32>
    %1023 = arith.cmpi eq, %0, %1022 : vector<1x1x16xi32>
    %1024 = vector.shape_cast %1023 : vector<1x1x16xi1> to vector<1x1x16xi1>
    %1025 = vector.broadcast %1024 : vector<1x1x16xi1> to vector<1x2x16xi1>
    %1026 = vector.shape_cast %1013 : vector<1x2x1xf32> to vector<1x2x1xf32>
    %1027 = vector.broadcast %1026 : vector<1x2x1xf32> to vector<1x2x16xf32>
    %1028 = arith.select %1025, %1027, %1021 : vector<1x2x16xi1>, vector<1x2x16xf32>
    %c10_i32_428 = arith.constant 10 : i32
    %c0_429 = arith.constant 0 : index
    %1029 = arith.index_cast %c10_i32_428 : i32 to index
    %c0_430 = arith.constant 0 : index
    %1030 = vector.load %arg9[%c0_429, %1029, %c0_430] : memref<1x16x16xf32, #tpu.memory_space<vmem>>, vector<1x1x16xf32>
    %c0_431 = arith.constant 0 : index
    %1031 = arith.index_cast %c10_i32_428 : i32 to index
    %c0_432 = arith.constant 0 : index
    %1032 = vector.load %arg10[%c0_431, %1031, %c0_432] : memref<1x16x1xf32, #tpu.memory_space<vmem>>, vector<1x1x1xf32>
    %1033 = vector.broadcast %c10_i32_428 : i32 to vector<1x1x16xi32>
    %1034 = arith.cmpi eq, %0, %1033 : vector<1x1x16xi32>
    %cst_433 = arith.constant 0.000000e+00 : f32
    %1035 = vector.shape_cast %1034 : vector<1x1x16xi1> to vector<1x1x16xi1>
    %1036 = vector.broadcast %1035 : vector<1x1x16xi1> to vector<1x2x16xi1>
    %1037 = vector.broadcast %cst_433 : f32 to vector<1x2x16xf32>
    %1038 = arith.select %1036, %1028, %1037 : vector<1x2x16xi1>, vector<1x2x16xf32>
    %cst_434 = arith.constant dense<0.000000e+00> : vector<1x2xf32>
    %1039 = vector.multi_reduction <add>, %1038, %cst_434 [2] : vector<1x2x16xf32> to vector<1x2xf32>
    %1040 = vector.shape_cast %1039 : vector<1x2xf32> to vector<1x2x1xf32>
    %1041 = vector.broadcast %1032 : vector<1x1x1xf32> to vector<1x2x1xf32>
    %1042 = arith.mulf %1040, %1041 : vector<1x2x1xf32>
    %1043 = vector.broadcast %c10_i32_428 : i32 to vector<1x1x16xi32>
    %1044 = arith.cmpi sgt, %0, %1043 : vector<1x1x16xi32>
    %cst_435 = arith.constant 0.000000e+00 : f32
    %1045 = vector.broadcast %cst_435 : f32 to vector<1x1x16xf32>
    %1046 = arith.select %1044, %1030, %1045 : vector<1x1x16xi1>, vector<1x1x16xf32>
    %1047 = vector.broadcast %1042 : vector<1x2x1xf32> to vector<1x2x16xf32>
    %1048 = vector.broadcast %1046 : vector<1x1x16xf32> to vector<1x2x16xf32>
    %1049 = arith.mulf %1047, %1048 : vector<1x2x16xf32>
    %1050 = arith.subf %1028, %1049 : vector<1x2x16xf32>
    %1051 = vector.broadcast %c10_i32_428 : i32 to vector<1x1x16xi32>
    %1052 = arith.cmpi eq, %0, %1051 : vector<1x1x16xi32>
    %1053 = vector.shape_cast %1052 : vector<1x1x16xi1> to vector<1x1x16xi1>
    %1054 = vector.broadcast %1053 : vector<1x1x16xi1> to vector<1x2x16xi1>
    %1055 = vector.shape_cast %1042 : vector<1x2x1xf32> to vector<1x2x1xf32>
    %1056 = vector.broadcast %1055 : vector<1x2x1xf32> to vector<1x2x16xf32>
    %1057 = arith.select %1054, %1056, %1050 : vector<1x2x16xi1>, vector<1x2x16xf32>
    %c11_i32_436 = arith.constant 11 : i32
    %c0_437 = arith.constant 0 : index
    %1058 = arith.index_cast %c11_i32_436 : i32 to index
    %c0_438 = arith.constant 0 : index
    %1059 = vector.load %arg9[%c0_437, %1058, %c0_438] : memref<1x16x16xf32, #tpu.memory_space<vmem>>, vector<1x1x16xf32>
    %c0_439 = arith.constant 0 : index
    %1060 = arith.index_cast %c11_i32_436 : i32 to index
    %c0_440 = arith.constant 0 : index
    %1061 = vector.load %arg10[%c0_439, %1060, %c0_440] : memref<1x16x1xf32, #tpu.memory_space<vmem>>, vector<1x1x1xf32>
    %1062 = vector.broadcast %c11_i32_436 : i32 to vector<1x1x16xi32>
    %1063 = arith.cmpi eq, %0, %1062 : vector<1x1x16xi32>
    %cst_441 = arith.constant 0.000000e+00 : f32
    %1064 = vector.shape_cast %1063 : vector<1x1x16xi1> to vector<1x1x16xi1>
    %1065 = vector.broadcast %1064 : vector<1x1x16xi1> to vector<1x2x16xi1>
    %1066 = vector.broadcast %cst_441 : f32 to vector<1x2x16xf32>
    %1067 = arith.select %1065, %1057, %1066 : vector<1x2x16xi1>, vector<1x2x16xf32>
    %cst_442 = arith.constant dense<0.000000e+00> : vector<1x2xf32>
    %1068 = vector.multi_reduction <add>, %1067, %cst_442 [2] : vector<1x2x16xf32> to vector<1x2xf32>
    %1069 = vector.shape_cast %1068 : vector<1x2xf32> to vector<1x2x1xf32>
    %1070 = vector.broadcast %1061 : vector<1x1x1xf32> to vector<1x2x1xf32>
    %1071 = arith.mulf %1069, %1070 : vector<1x2x1xf32>
    %1072 = vector.broadcast %c11_i32_436 : i32 to vector<1x1x16xi32>
    %1073 = arith.cmpi sgt, %0, %1072 : vector<1x1x16xi32>
    %cst_443 = arith.constant 0.000000e+00 : f32
    %1074 = vector.broadcast %cst_443 : f32 to vector<1x1x16xf32>
    %1075 = arith.select %1073, %1059, %1074 : vector<1x1x16xi1>, vector<1x1x16xf32>
    %1076 = vector.broadcast %1071 : vector<1x2x1xf32> to vector<1x2x16xf32>
    %1077 = vector.broadcast %1075 : vector<1x1x16xf32> to vector<1x2x16xf32>
    %1078 = arith.mulf %1076, %1077 : vector<1x2x16xf32>
    %1079 = arith.subf %1057, %1078 : vector<1x2x16xf32>
    %1080 = vector.broadcast %c11_i32_436 : i32 to vector<1x1x16xi32>
    %1081 = arith.cmpi eq, %0, %1080 : vector<1x1x16xi32>
    %1082 = vector.shape_cast %1081 : vector<1x1x16xi1> to vector<1x1x16xi1>
    %1083 = vector.broadcast %1082 : vector<1x1x16xi1> to vector<1x2x16xi1>
    %1084 = vector.shape_cast %1071 : vector<1x2x1xf32> to vector<1x2x1xf32>
    %1085 = vector.broadcast %1084 : vector<1x2x1xf32> to vector<1x2x16xf32>
    %1086 = arith.select %1083, %1085, %1079 : vector<1x2x16xi1>, vector<1x2x16xf32>
    %c12_i32_444 = arith.constant 12 : i32
    %c0_445 = arith.constant 0 : index
    %1087 = arith.index_cast %c12_i32_444 : i32 to index
    %c0_446 = arith.constant 0 : index
    %1088 = vector.load %arg9[%c0_445, %1087, %c0_446] : memref<1x16x16xf32, #tpu.memory_space<vmem>>, vector<1x1x16xf32>
    %c0_447 = arith.constant 0 : index
    %1089 = arith.index_cast %c12_i32_444 : i32 to index
    %c0_448 = arith.constant 0 : index
    %1090 = vector.load %arg10[%c0_447, %1089, %c0_448] : memref<1x16x1xf32, #tpu.memory_space<vmem>>, vector<1x1x1xf32>
    %1091 = vector.broadcast %c12_i32_444 : i32 to vector<1x1x16xi32>
    %1092 = arith.cmpi eq, %0, %1091 : vector<1x1x16xi32>
    %cst_449 = arith.constant 0.000000e+00 : f32
    %1093 = vector.shape_cast %1092 : vector<1x1x16xi1> to vector<1x1x16xi1>
    %1094 = vector.broadcast %1093 : vector<1x1x16xi1> to vector<1x2x16xi1>
    %1095 = vector.broadcast %cst_449 : f32 to vector<1x2x16xf32>
    %1096 = arith.select %1094, %1086, %1095 : vector<1x2x16xi1>, vector<1x2x16xf32>
    %cst_450 = arith.constant dense<0.000000e+00> : vector<1x2xf32>
    %1097 = vector.multi_reduction <add>, %1096, %cst_450 [2] : vector<1x2x16xf32> to vector<1x2xf32>
    %1098 = vector.shape_cast %1097 : vector<1x2xf32> to vector<1x2x1xf32>
    %1099 = vector.broadcast %1090 : vector<1x1x1xf32> to vector<1x2x1xf32>
    %1100 = arith.mulf %1098, %1099 : vector<1x2x1xf32>
    %1101 = vector.broadcast %c12_i32_444 : i32 to vector<1x1x16xi32>
    %1102 = arith.cmpi sgt, %0, %1101 : vector<1x1x16xi32>
    %cst_451 = arith.constant 0.000000e+00 : f32
    %1103 = vector.broadcast %cst_451 : f32 to vector<1x1x16xf32>
    %1104 = arith.select %1102, %1088, %1103 : vector<1x1x16xi1>, vector<1x1x16xf32>
    %1105 = vector.broadcast %1100 : vector<1x2x1xf32> to vector<1x2x16xf32>
    %1106 = vector.broadcast %1104 : vector<1x1x16xf32> to vector<1x2x16xf32>
    %1107 = arith.mulf %1105, %1106 : vector<1x2x16xf32>
    %1108 = arith.subf %1086, %1107 : vector<1x2x16xf32>
    %1109 = vector.broadcast %c12_i32_444 : i32 to vector<1x1x16xi32>
    %1110 = arith.cmpi eq, %0, %1109 : vector<1x1x16xi32>
    %1111 = vector.shape_cast %1110 : vector<1x1x16xi1> to vector<1x1x16xi1>
    %1112 = vector.broadcast %1111 : vector<1x1x16xi1> to vector<1x2x16xi1>
    %1113 = vector.shape_cast %1100 : vector<1x2x1xf32> to vector<1x2x1xf32>
    %1114 = vector.broadcast %1113 : vector<1x2x1xf32> to vector<1x2x16xf32>
    %1115 = arith.select %1112, %1114, %1108 : vector<1x2x16xi1>, vector<1x2x16xf32>
    %c13_i32_452 = arith.constant 13 : i32
    %c0_453 = arith.constant 0 : index
    %1116 = arith.index_cast %c13_i32_452 : i32 to index
    %c0_454 = arith.constant 0 : index
    %1117 = vector.load %arg9[%c0_453, %1116, %c0_454] : memref<1x16x16xf32, #tpu.memory_space<vmem>>, vector<1x1x16xf32>
    %c0_455 = arith.constant 0 : index
    %1118 = arith.index_cast %c13_i32_452 : i32 to index
    %c0_456 = arith.constant 0 : index
    %1119 = vector.load %arg10[%c0_455, %1118, %c0_456] : memref<1x16x1xf32, #tpu.memory_space<vmem>>, vector<1x1x1xf32>
    %1120 = vector.broadcast %c13_i32_452 : i32 to vector<1x1x16xi32>
    %1121 = arith.cmpi eq, %0, %1120 : vector<1x1x16xi32>
    %cst_457 = arith.constant 0.000000e+00 : f32
    %1122 = vector.shape_cast %1121 : vector<1x1x16xi1> to vector<1x1x16xi1>
    %1123 = vector.broadcast %1122 : vector<1x1x16xi1> to vector<1x2x16xi1>
    %1124 = vector.broadcast %cst_457 : f32 to vector<1x2x16xf32>
    %1125 = arith.select %1123, %1115, %1124 : vector<1x2x16xi1>, vector<1x2x16xf32>
    %cst_458 = arith.constant dense<0.000000e+00> : vector<1x2xf32>
    %1126 = vector.multi_reduction <add>, %1125, %cst_458 [2] : vector<1x2x16xf32> to vector<1x2xf32>
    %1127 = vector.shape_cast %1126 : vector<1x2xf32> to vector<1x2x1xf32>
    %1128 = vector.broadcast %1119 : vector<1x1x1xf32> to vector<1x2x1xf32>
    %1129 = arith.mulf %1127, %1128 : vector<1x2x1xf32>
    %1130 = vector.broadcast %c13_i32_452 : i32 to vector<1x1x16xi32>
    %1131 = arith.cmpi sgt, %0, %1130 : vector<1x1x16xi32>
    %cst_459 = arith.constant 0.000000e+00 : f32
    %1132 = vector.broadcast %cst_459 : f32 to vector<1x1x16xf32>
    %1133 = arith.select %1131, %1117, %1132 : vector<1x1x16xi1>, vector<1x1x16xf32>
    %1134 = vector.broadcast %1129 : vector<1x2x1xf32> to vector<1x2x16xf32>
    %1135 = vector.broadcast %1133 : vector<1x1x16xf32> to vector<1x2x16xf32>
    %1136 = arith.mulf %1134, %1135 : vector<1x2x16xf32>
    %1137 = arith.subf %1115, %1136 : vector<1x2x16xf32>
    %1138 = vector.broadcast %c13_i32_452 : i32 to vector<1x1x16xi32>
    %1139 = arith.cmpi eq, %0, %1138 : vector<1x1x16xi32>
    %1140 = vector.shape_cast %1139 : vector<1x1x16xi1> to vector<1x1x16xi1>
    %1141 = vector.broadcast %1140 : vector<1x1x16xi1> to vector<1x2x16xi1>
    %1142 = vector.shape_cast %1129 : vector<1x2x1xf32> to vector<1x2x1xf32>
    %1143 = vector.broadcast %1142 : vector<1x2x1xf32> to vector<1x2x16xf32>
    %1144 = arith.select %1141, %1143, %1137 : vector<1x2x16xi1>, vector<1x2x16xf32>
    %c14_i32_460 = arith.constant 14 : i32
    %c0_461 = arith.constant 0 : index
    %1145 = arith.index_cast %c14_i32_460 : i32 to index
    %c0_462 = arith.constant 0 : index
    %1146 = vector.load %arg9[%c0_461, %1145, %c0_462] : memref<1x16x16xf32, #tpu.memory_space<vmem>>, vector<1x1x16xf32>
    %c0_463 = arith.constant 0 : index
    %1147 = arith.index_cast %c14_i32_460 : i32 to index
    %c0_464 = arith.constant 0 : index
    %1148 = vector.load %arg10[%c0_463, %1147, %c0_464] : memref<1x16x1xf32, #tpu.memory_space<vmem>>, vector<1x1x1xf32>
    %1149 = vector.broadcast %c14_i32_460 : i32 to vector<1x1x16xi32>
    %1150 = arith.cmpi eq, %0, %1149 : vector<1x1x16xi32>
    %cst_465 = arith.constant 0.000000e+00 : f32
    %1151 = vector.shape_cast %1150 : vector<1x1x16xi1> to vector<1x1x16xi1>
    %1152 = vector.broadcast %1151 : vector<1x1x16xi1> to vector<1x2x16xi1>
    %1153 = vector.broadcast %cst_465 : f32 to vector<1x2x16xf32>
    %1154 = arith.select %1152, %1144, %1153 : vector<1x2x16xi1>, vector<1x2x16xf32>
    %cst_466 = arith.constant dense<0.000000e+00> : vector<1x2xf32>
    %1155 = vector.multi_reduction <add>, %1154, %cst_466 [2] : vector<1x2x16xf32> to vector<1x2xf32>
    %1156 = vector.shape_cast %1155 : vector<1x2xf32> to vector<1x2x1xf32>
    %1157 = vector.broadcast %1148 : vector<1x1x1xf32> to vector<1x2x1xf32>
    %1158 = arith.mulf %1156, %1157 : vector<1x2x1xf32>
    %1159 = vector.broadcast %c14_i32_460 : i32 to vector<1x1x16xi32>
    %1160 = arith.cmpi sgt, %0, %1159 : vector<1x1x16xi32>
    %cst_467 = arith.constant 0.000000e+00 : f32
    %1161 = vector.broadcast %cst_467 : f32 to vector<1x1x16xf32>
    %1162 = arith.select %1160, %1146, %1161 : vector<1x1x16xi1>, vector<1x1x16xf32>
    %1163 = vector.broadcast %1158 : vector<1x2x1xf32> to vector<1x2x16xf32>
    %1164 = vector.broadcast %1162 : vector<1x1x16xf32> to vector<1x2x16xf32>
    %1165 = arith.mulf %1163, %1164 : vector<1x2x16xf32>
    %1166 = arith.subf %1144, %1165 : vector<1x2x16xf32>
    %1167 = vector.broadcast %c14_i32_460 : i32 to vector<1x1x16xi32>
    %1168 = arith.cmpi eq, %0, %1167 : vector<1x1x16xi32>
    %1169 = vector.shape_cast %1168 : vector<1x1x16xi1> to vector<1x1x16xi1>
    %1170 = vector.broadcast %1169 : vector<1x1x16xi1> to vector<1x2x16xi1>
    %1171 = vector.shape_cast %1158 : vector<1x2x1xf32> to vector<1x2x1xf32>
    %1172 = vector.broadcast %1171 : vector<1x2x1xf32> to vector<1x2x16xf32>
    %1173 = arith.select %1170, %1172, %1166 : vector<1x2x16xi1>, vector<1x2x16xf32>
    %c15_i32_468 = arith.constant 15 : i32
    %c0_469 = arith.constant 0 : index
    %1174 = arith.index_cast %c15_i32_468 : i32 to index
    %c0_470 = arith.constant 0 : index
    %1175 = vector.load %arg9[%c0_469, %1174, %c0_470] : memref<1x16x16xf32, #tpu.memory_space<vmem>>, vector<1x1x16xf32>
    %c0_471 = arith.constant 0 : index
    %1176 = arith.index_cast %c15_i32_468 : i32 to index
    %c0_472 = arith.constant 0 : index
    %1177 = vector.load %arg10[%c0_471, %1176, %c0_472] : memref<1x16x1xf32, #tpu.memory_space<vmem>>, vector<1x1x1xf32>
    %1178 = vector.broadcast %c15_i32_468 : i32 to vector<1x1x16xi32>
    %1179 = arith.cmpi eq, %0, %1178 : vector<1x1x16xi32>
    %cst_473 = arith.constant 0.000000e+00 : f32
    %1180 = vector.shape_cast %1179 : vector<1x1x16xi1> to vector<1x1x16xi1>
    %1181 = vector.broadcast %1180 : vector<1x1x16xi1> to vector<1x2x16xi1>
    %1182 = vector.broadcast %cst_473 : f32 to vector<1x2x16xf32>
    %1183 = arith.select %1181, %1173, %1182 : vector<1x2x16xi1>, vector<1x2x16xf32>
    %cst_474 = arith.constant dense<0.000000e+00> : vector<1x2xf32>
    %1184 = vector.multi_reduction <add>, %1183, %cst_474 [2] : vector<1x2x16xf32> to vector<1x2xf32>
    %1185 = vector.shape_cast %1184 : vector<1x2xf32> to vector<1x2x1xf32>
    %1186 = vector.broadcast %1177 : vector<1x1x1xf32> to vector<1x2x1xf32>
    %1187 = arith.mulf %1185, %1186 : vector<1x2x1xf32>
    %1188 = vector.broadcast %c15_i32_468 : i32 to vector<1x1x16xi32>
    %1189 = arith.cmpi sgt, %0, %1188 : vector<1x1x16xi32>
    %cst_475 = arith.constant 0.000000e+00 : f32
    %1190 = vector.broadcast %cst_475 : f32 to vector<1x1x16xf32>
    %1191 = arith.select %1189, %1175, %1190 : vector<1x1x16xi1>, vector<1x1x16xf32>
    %1192 = vector.broadcast %1187 : vector<1x2x1xf32> to vector<1x2x16xf32>
    %1193 = vector.broadcast %1191 : vector<1x1x16xf32> to vector<1x2x16xf32>
    %1194 = arith.mulf %1192, %1193 : vector<1x2x16xf32>
    %1195 = arith.subf %1173, %1194 : vector<1x2x16xf32>
    %1196 = vector.broadcast %c15_i32_468 : i32 to vector<1x1x16xi32>
    %1197 = arith.cmpi eq, %0, %1196 : vector<1x1x16xi32>
    %1198 = vector.shape_cast %1197 : vector<1x1x16xi1> to vector<1x1x16xi1>
    %1199 = vector.broadcast %1198 : vector<1x1x16xi1> to vector<1x2x16xi1>
    %1200 = vector.shape_cast %1187 : vector<1x2x1xf32> to vector<1x2x1xf32>
    %1201 = vector.broadcast %1200 : vector<1x2x1xf32> to vector<1x2x16xf32>
    %1202 = arith.select %1199, %1201, %1195 : vector<1x2x16xi1>, vector<1x2x16xf32>
    %c16_i32_476 = arith.constant 16 : i32
    %cst_477 = arith.constant 0.000000e+00 : f32
    %1203 = vector.broadcast %cst_477 : f32 to vector<1x2x16xf32>
    %c0_i32_478 = arith.constant 0 : i32
    %c15_i32_479 = arith.constant 15 : i32
    %1204 = arith.subi %c15_i32_479, %c0_i32_478 : i32
    %c0_480 = arith.constant 0 : index
    %1205 = arith.index_cast %1204 : i32 to index
    %c0_481 = arith.constant 0 : index
    %1206 = vector.load %arg9[%c0_480, %1205, %c0_481] : memref<1x16x16xf32, #tpu.memory_space<vmem>>, vector<1x1x16xf32>
    %c0_482 = arith.constant 0 : index
    %1207 = arith.index_cast %1204 : i32 to index
    %c0_483 = arith.constant 0 : index
    %1208 = vector.load %arg10[%c0_482, %1207, %c0_483] : memref<1x16x1xf32, #tpu.memory_space<vmem>>, vector<1x1x1xf32>
    %1209 = vector.broadcast %1204 : i32 to vector<1x1x16xi32>
    %1210 = arith.cmpi sgt, %0, %1209 : vector<1x1x16xi32>
    %cst_484 = arith.constant 0.000000e+00 : f32
    %1211 = vector.broadcast %cst_484 : f32 to vector<1x1x16xf32>
    %1212 = arith.select %1210, %1206, %1211 : vector<1x1x16xi1>, vector<1x1x16xf32>
    %1213 = vector.broadcast %1212 : vector<1x1x16xf32> to vector<1x2x16xf32>
    %1214 = arith.mulf %1213, %1203 : vector<1x2x16xf32>
    %cst_485 = arith.constant dense<0.000000e+00> : vector<1x2xf32>
    %1215 = vector.multi_reduction <add>, %1214, %cst_485 [2] : vector<1x2x16xf32> to vector<1x2xf32>
    %1216 = vector.shape_cast %1215 : vector<1x2xf32> to vector<1x2x1xf32>
    %1217 = vector.broadcast %1204 : i32 to vector<1x1x16xi32>
    %1218 = arith.cmpi eq, %0, %1217 : vector<1x1x16xi32>
    %cst_486 = arith.constant 0.000000e+00 : f32
    %1219 = vector.shape_cast %1218 : vector<1x1x16xi1> to vector<1x1x16xi1>
    %1220 = vector.broadcast %1219 : vector<1x1x16xi1> to vector<1x2x16xi1>
    %1221 = vector.broadcast %cst_486 : f32 to vector<1x2x16xf32>
    %1222 = arith.select %1220, %1202, %1221 : vector<1x2x16xi1>, vector<1x2x16xf32>
    %cst_487 = arith.constant dense<0.000000e+00> : vector<1x2xf32>
    %1223 = vector.multi_reduction <add>, %1222, %cst_487 [2] : vector<1x2x16xf32> to vector<1x2xf32>
    %1224 = vector.shape_cast %1223 : vector<1x2xf32> to vector<1x2x1xf32>
    %1225 = arith.subf %1224, %1216 : vector<1x2x1xf32>
    %1226 = vector.broadcast %1208 : vector<1x1x1xf32> to vector<1x2x1xf32>
    %1227 = arith.mulf %1225, %1226 : vector<1x2x1xf32>
    %1228 = vector.broadcast %1204 : i32 to vector<1x1x16xi32>
    %1229 = arith.cmpi eq, %0, %1228 : vector<1x1x16xi32>
    %1230 = vector.shape_cast %1229 : vector<1x1x16xi1> to vector<1x1x16xi1>
    %1231 = vector.broadcast %1230 : vector<1x1x16xi1> to vector<1x2x16xi1>
    %1232 = vector.shape_cast %1227 : vector<1x2x1xf32> to vector<1x2x1xf32>
    %1233 = vector.broadcast %1232 : vector<1x2x1xf32> to vector<1x2x16xf32>
    %1234 = arith.select %1231, %1233, %1203 : vector<1x2x16xi1>, vector<1x2x16xf32>
    %c1_i32_488 = arith.constant 1 : i32
    %c15_i32_489 = arith.constant 15 : i32
    %1235 = arith.subi %c15_i32_489, %c1_i32_488 : i32
    %c0_490 = arith.constant 0 : index
    %1236 = arith.index_cast %1235 : i32 to index
    %c0_491 = arith.constant 0 : index
    %1237 = vector.load %arg9[%c0_490, %1236, %c0_491] : memref<1x16x16xf32, #tpu.memory_space<vmem>>, vector<1x1x16xf32>
    %c0_492 = arith.constant 0 : index
    %1238 = arith.index_cast %1235 : i32 to index
    %c0_493 = arith.constant 0 : index
    %1239 = vector.load %arg10[%c0_492, %1238, %c0_493] : memref<1x16x1xf32, #tpu.memory_space<vmem>>, vector<1x1x1xf32>
    %1240 = vector.broadcast %1235 : i32 to vector<1x1x16xi32>
    %1241 = arith.cmpi sgt, %0, %1240 : vector<1x1x16xi32>
    %cst_494 = arith.constant 0.000000e+00 : f32
    %1242 = vector.broadcast %cst_494 : f32 to vector<1x1x16xf32>
    %1243 = arith.select %1241, %1237, %1242 : vector<1x1x16xi1>, vector<1x1x16xf32>
    %1244 = vector.broadcast %1243 : vector<1x1x16xf32> to vector<1x2x16xf32>
    %1245 = arith.mulf %1244, %1234 : vector<1x2x16xf32>
    %cst_495 = arith.constant dense<0.000000e+00> : vector<1x2xf32>
    %1246 = vector.multi_reduction <add>, %1245, %cst_495 [2] : vector<1x2x16xf32> to vector<1x2xf32>
    %1247 = vector.shape_cast %1246 : vector<1x2xf32> to vector<1x2x1xf32>
    %1248 = vector.broadcast %1235 : i32 to vector<1x1x16xi32>
    %1249 = arith.cmpi eq, %0, %1248 : vector<1x1x16xi32>
    %cst_496 = arith.constant 0.000000e+00 : f32
    %1250 = vector.shape_cast %1249 : vector<1x1x16xi1> to vector<1x1x16xi1>
    %1251 = vector.broadcast %1250 : vector<1x1x16xi1> to vector<1x2x16xi1>
    %1252 = vector.broadcast %cst_496 : f32 to vector<1x2x16xf32>
    %1253 = arith.select %1251, %1202, %1252 : vector<1x2x16xi1>, vector<1x2x16xf32>
    %cst_497 = arith.constant dense<0.000000e+00> : vector<1x2xf32>
    %1254 = vector.multi_reduction <add>, %1253, %cst_497 [2] : vector<1x2x16xf32> to vector<1x2xf32>
    %1255 = vector.shape_cast %1254 : vector<1x2xf32> to vector<1x2x1xf32>
    %1256 = arith.subf %1255, %1247 : vector<1x2x1xf32>
    %1257 = vector.broadcast %1239 : vector<1x1x1xf32> to vector<1x2x1xf32>
    %1258 = arith.mulf %1256, %1257 : vector<1x2x1xf32>
    %1259 = vector.broadcast %1235 : i32 to vector<1x1x16xi32>
    %1260 = arith.cmpi eq, %0, %1259 : vector<1x1x16xi32>
    %1261 = vector.shape_cast %1260 : vector<1x1x16xi1> to vector<1x1x16xi1>
    %1262 = vector.broadcast %1261 : vector<1x1x16xi1> to vector<1x2x16xi1>
    %1263 = vector.shape_cast %1258 : vector<1x2x1xf32> to vector<1x2x1xf32>
    %1264 = vector.broadcast %1263 : vector<1x2x1xf32> to vector<1x2x16xf32>
    %1265 = arith.select %1262, %1264, %1234 : vector<1x2x16xi1>, vector<1x2x16xf32>
    %c2_i32_498 = arith.constant 2 : i32
    %c15_i32_499 = arith.constant 15 : i32
    %1266 = arith.subi %c15_i32_499, %c2_i32_498 : i32
    %c0_500 = arith.constant 0 : index
    %1267 = arith.index_cast %1266 : i32 to index
    %c0_501 = arith.constant 0 : index
    %1268 = vector.load %arg9[%c0_500, %1267, %c0_501] : memref<1x16x16xf32, #tpu.memory_space<vmem>>, vector<1x1x16xf32>
    %c0_502 = arith.constant 0 : index
    %1269 = arith.index_cast %1266 : i32 to index
    %c0_503 = arith.constant 0 : index
    %1270 = vector.load %arg10[%c0_502, %1269, %c0_503] : memref<1x16x1xf32, #tpu.memory_space<vmem>>, vector<1x1x1xf32>
    %1271 = vector.broadcast %1266 : i32 to vector<1x1x16xi32>
    %1272 = arith.cmpi sgt, %0, %1271 : vector<1x1x16xi32>
    %cst_504 = arith.constant 0.000000e+00 : f32
    %1273 = vector.broadcast %cst_504 : f32 to vector<1x1x16xf32>
    %1274 = arith.select %1272, %1268, %1273 : vector<1x1x16xi1>, vector<1x1x16xf32>
    %1275 = vector.broadcast %1274 : vector<1x1x16xf32> to vector<1x2x16xf32>
    %1276 = arith.mulf %1275, %1265 : vector<1x2x16xf32>
    %cst_505 = arith.constant dense<0.000000e+00> : vector<1x2xf32>
    %1277 = vector.multi_reduction <add>, %1276, %cst_505 [2] : vector<1x2x16xf32> to vector<1x2xf32>
    %1278 = vector.shape_cast %1277 : vector<1x2xf32> to vector<1x2x1xf32>
    %1279 = vector.broadcast %1266 : i32 to vector<1x1x16xi32>
    %1280 = arith.cmpi eq, %0, %1279 : vector<1x1x16xi32>
    %cst_506 = arith.constant 0.000000e+00 : f32
    %1281 = vector.shape_cast %1280 : vector<1x1x16xi1> to vector<1x1x16xi1>
    %1282 = vector.broadcast %1281 : vector<1x1x16xi1> to vector<1x2x16xi1>
    %1283 = vector.broadcast %cst_506 : f32 to vector<1x2x16xf32>
    %1284 = arith.select %1282, %1202, %1283 : vector<1x2x16xi1>, vector<1x2x16xf32>
    %cst_507 = arith.constant dense<0.000000e+00> : vector<1x2xf32>
    %1285 = vector.multi_reduction <add>, %1284, %cst_507 [2] : vector<1x2x16xf32> to vector<1x2xf32>
    %1286 = vector.shape_cast %1285 : vector<1x2xf32> to vector<1x2x1xf32>
    %1287 = arith.subf %1286, %1278 : vector<1x2x1xf32>
    %1288 = vector.broadcast %1270 : vector<1x1x1xf32> to vector<1x2x1xf32>
    %1289 = arith.mulf %1287, %1288 : vector<1x2x1xf32>
    %1290 = vector.broadcast %1266 : i32 to vector<1x1x16xi32>
    %1291 = arith.cmpi eq, %0, %1290 : vector<1x1x16xi32>
    %1292 = vector.shape_cast %1291 : vector<1x1x16xi1> to vector<1x1x16xi1>
    %1293 = vector.broadcast %1292 : vector<1x1x16xi1> to vector<1x2x16xi1>
    %1294 = vector.shape_cast %1289 : vector<1x2x1xf32> to vector<1x2x1xf32>
    %1295 = vector.broadcast %1294 : vector<1x2x1xf32> to vector<1x2x16xf32>
    %1296 = arith.select %1293, %1295, %1265 : vector<1x2x16xi1>, vector<1x2x16xf32>
    %c3_i32_508 = arith.constant 3 : i32
    %c15_i32_509 = arith.constant 15 : i32
    %1297 = arith.subi %c15_i32_509, %c3_i32_508 : i32
    %c0_510 = arith.constant 0 : index
    %1298 = arith.index_cast %1297 : i32 to index
    %c0_511 = arith.constant 0 : index
    %1299 = vector.load %arg9[%c0_510, %1298, %c0_511] : memref<1x16x16xf32, #tpu.memory_space<vmem>>, vector<1x1x16xf32>
    %c0_512 = arith.constant 0 : index
    %1300 = arith.index_cast %1297 : i32 to index
    %c0_513 = arith.constant 0 : index
    %1301 = vector.load %arg10[%c0_512, %1300, %c0_513] : memref<1x16x1xf32, #tpu.memory_space<vmem>>, vector<1x1x1xf32>
    %1302 = vector.broadcast %1297 : i32 to vector<1x1x16xi32>
    %1303 = arith.cmpi sgt, %0, %1302 : vector<1x1x16xi32>
    %cst_514 = arith.constant 0.000000e+00 : f32
    %1304 = vector.broadcast %cst_514 : f32 to vector<1x1x16xf32>
    %1305 = arith.select %1303, %1299, %1304 : vector<1x1x16xi1>, vector<1x1x16xf32>
    %1306 = vector.broadcast %1305 : vector<1x1x16xf32> to vector<1x2x16xf32>
    %1307 = arith.mulf %1306, %1296 : vector<1x2x16xf32>
    %cst_515 = arith.constant dense<0.000000e+00> : vector<1x2xf32>
    %1308 = vector.multi_reduction <add>, %1307, %cst_515 [2] : vector<1x2x16xf32> to vector<1x2xf32>
    %1309 = vector.shape_cast %1308 : vector<1x2xf32> to vector<1x2x1xf32>
    %1310 = vector.broadcast %1297 : i32 to vector<1x1x16xi32>
    %1311 = arith.cmpi eq, %0, %1310 : vector<1x1x16xi32>
    %cst_516 = arith.constant 0.000000e+00 : f32
    %1312 = vector.shape_cast %1311 : vector<1x1x16xi1> to vector<1x1x16xi1>
    %1313 = vector.broadcast %1312 : vector<1x1x16xi1> to vector<1x2x16xi1>
    %1314 = vector.broadcast %cst_516 : f32 to vector<1x2x16xf32>
    %1315 = arith.select %1313, %1202, %1314 : vector<1x2x16xi1>, vector<1x2x16xf32>
    %cst_517 = arith.constant dense<0.000000e+00> : vector<1x2xf32>
    %1316 = vector.multi_reduction <add>, %1315, %cst_517 [2] : vector<1x2x16xf32> to vector<1x2xf32>
    %1317 = vector.shape_cast %1316 : vector<1x2xf32> to vector<1x2x1xf32>
    %1318 = arith.subf %1317, %1309 : vector<1x2x1xf32>
    %1319 = vector.broadcast %1301 : vector<1x1x1xf32> to vector<1x2x1xf32>
    %1320 = arith.mulf %1318, %1319 : vector<1x2x1xf32>
    %1321 = vector.broadcast %1297 : i32 to vector<1x1x16xi32>
    %1322 = arith.cmpi eq, %0, %1321 : vector<1x1x16xi32>
    %1323 = vector.shape_cast %1322 : vector<1x1x16xi1> to vector<1x1x16xi1>
    %1324 = vector.broadcast %1323 : vector<1x1x16xi1> to vector<1x2x16xi1>
    %1325 = vector.shape_cast %1320 : vector<1x2x1xf32> to vector<1x2x1xf32>
    %1326 = vector.broadcast %1325 : vector<1x2x1xf32> to vector<1x2x16xf32>
    %1327 = arith.select %1324, %1326, %1296 : vector<1x2x16xi1>, vector<1x2x16xf32>
    %c4_i32_518 = arith.constant 4 : i32
    %c15_i32_519 = arith.constant 15 : i32
    %1328 = arith.subi %c15_i32_519, %c4_i32_518 : i32
    %c0_520 = arith.constant 0 : index
    %1329 = arith.index_cast %1328 : i32 to index
    %c0_521 = arith.constant 0 : index
    %1330 = vector.load %arg9[%c0_520, %1329, %c0_521] : memref<1x16x16xf32, #tpu.memory_space<vmem>>, vector<1x1x16xf32>
    %c0_522 = arith.constant 0 : index
    %1331 = arith.index_cast %1328 : i32 to index
    %c0_523 = arith.constant 0 : index
    %1332 = vector.load %arg10[%c0_522, %1331, %c0_523] : memref<1x16x1xf32, #tpu.memory_space<vmem>>, vector<1x1x1xf32>
    %1333 = vector.broadcast %1328 : i32 to vector<1x1x16xi32>
    %1334 = arith.cmpi sgt, %0, %1333 : vector<1x1x16xi32>
    %cst_524 = arith.constant 0.000000e+00 : f32
    %1335 = vector.broadcast %cst_524 : f32 to vector<1x1x16xf32>
    %1336 = arith.select %1334, %1330, %1335 : vector<1x1x16xi1>, vector<1x1x16xf32>
    %1337 = vector.broadcast %1336 : vector<1x1x16xf32> to vector<1x2x16xf32>
    %1338 = arith.mulf %1337, %1327 : vector<1x2x16xf32>
    %cst_525 = arith.constant dense<0.000000e+00> : vector<1x2xf32>
    %1339 = vector.multi_reduction <add>, %1338, %cst_525 [2] : vector<1x2x16xf32> to vector<1x2xf32>
    %1340 = vector.shape_cast %1339 : vector<1x2xf32> to vector<1x2x1xf32>
    %1341 = vector.broadcast %1328 : i32 to vector<1x1x16xi32>
    %1342 = arith.cmpi eq, %0, %1341 : vector<1x1x16xi32>
    %cst_526 = arith.constant 0.000000e+00 : f32
    %1343 = vector.shape_cast %1342 : vector<1x1x16xi1> to vector<1x1x16xi1>
    %1344 = vector.broadcast %1343 : vector<1x1x16xi1> to vector<1x2x16xi1>
    %1345 = vector.broadcast %cst_526 : f32 to vector<1x2x16xf32>
    %1346 = arith.select %1344, %1202, %1345 : vector<1x2x16xi1>, vector<1x2x16xf32>
    %cst_527 = arith.constant dense<0.000000e+00> : vector<1x2xf32>
    %1347 = vector.multi_reduction <add>, %1346, %cst_527 [2] : vector<1x2x16xf32> to vector<1x2xf32>
    %1348 = vector.shape_cast %1347 : vector<1x2xf32> to vector<1x2x1xf32>
    %1349 = arith.subf %1348, %1340 : vector<1x2x1xf32>
    %1350 = vector.broadcast %1332 : vector<1x1x1xf32> to vector<1x2x1xf32>
    %1351 = arith.mulf %1349, %1350 : vector<1x2x1xf32>
    %1352 = vector.broadcast %1328 : i32 to vector<1x1x16xi32>
    %1353 = arith.cmpi eq, %0, %1352 : vector<1x1x16xi32>
    %1354 = vector.shape_cast %1353 : vector<1x1x16xi1> to vector<1x1x16xi1>
    %1355 = vector.broadcast %1354 : vector<1x1x16xi1> to vector<1x2x16xi1>
    %1356 = vector.shape_cast %1351 : vector<1x2x1xf32> to vector<1x2x1xf32>
    %1357 = vector.broadcast %1356 : vector<1x2x1xf32> to vector<1x2x16xf32>
    %1358 = arith.select %1355, %1357, %1327 : vector<1x2x16xi1>, vector<1x2x16xf32>
    %c5_i32_528 = arith.constant 5 : i32
    %c15_i32_529 = arith.constant 15 : i32
    %1359 = arith.subi %c15_i32_529, %c5_i32_528 : i32
    %c0_530 = arith.constant 0 : index
    %1360 = arith.index_cast %1359 : i32 to index
    %c0_531 = arith.constant 0 : index
    %1361 = vector.load %arg9[%c0_530, %1360, %c0_531] : memref<1x16x16xf32, #tpu.memory_space<vmem>>, vector<1x1x16xf32>
    %c0_532 = arith.constant 0 : index
    %1362 = arith.index_cast %1359 : i32 to index
    %c0_533 = arith.constant 0 : index
    %1363 = vector.load %arg10[%c0_532, %1362, %c0_533] : memref<1x16x1xf32, #tpu.memory_space<vmem>>, vector<1x1x1xf32>
    %1364 = vector.broadcast %1359 : i32 to vector<1x1x16xi32>
    %1365 = arith.cmpi sgt, %0, %1364 : vector<1x1x16xi32>
    %cst_534 = arith.constant 0.000000e+00 : f32
    %1366 = vector.broadcast %cst_534 : f32 to vector<1x1x16xf32>
    %1367 = arith.select %1365, %1361, %1366 : vector<1x1x16xi1>, vector<1x1x16xf32>
    %1368 = vector.broadcast %1367 : vector<1x1x16xf32> to vector<1x2x16xf32>
    %1369 = arith.mulf %1368, %1358 : vector<1x2x16xf32>
    %cst_535 = arith.constant dense<0.000000e+00> : vector<1x2xf32>
    %1370 = vector.multi_reduction <add>, %1369, %cst_535 [2] : vector<1x2x16xf32> to vector<1x2xf32>
    %1371 = vector.shape_cast %1370 : vector<1x2xf32> to vector<1x2x1xf32>
    %1372 = vector.broadcast %1359 : i32 to vector<1x1x16xi32>
    %1373 = arith.cmpi eq, %0, %1372 : vector<1x1x16xi32>
    %cst_536 = arith.constant 0.000000e+00 : f32
    %1374 = vector.shape_cast %1373 : vector<1x1x16xi1> to vector<1x1x16xi1>
    %1375 = vector.broadcast %1374 : vector<1x1x16xi1> to vector<1x2x16xi1>
    %1376 = vector.broadcast %cst_536 : f32 to vector<1x2x16xf32>
    %1377 = arith.select %1375, %1202, %1376 : vector<1x2x16xi1>, vector<1x2x16xf32>
    %cst_537 = arith.constant dense<0.000000e+00> : vector<1x2xf32>
    %1378 = vector.multi_reduction <add>, %1377, %cst_537 [2] : vector<1x2x16xf32> to vector<1x2xf32>
    %1379 = vector.shape_cast %1378 : vector<1x2xf32> to vector<1x2x1xf32>
    %1380 = arith.subf %1379, %1371 : vector<1x2x1xf32>
    %1381 = vector.broadcast %1363 : vector<1x1x1xf32> to vector<1x2x1xf32>
    %1382 = arith.mulf %1380, %1381 : vector<1x2x1xf32>
    %1383 = vector.broadcast %1359 : i32 to vector<1x1x16xi32>
    %1384 = arith.cmpi eq, %0, %1383 : vector<1x1x16xi32>
    %1385 = vector.shape_cast %1384 : vector<1x1x16xi1> to vector<1x1x16xi1>
    %1386 = vector.broadcast %1385 : vector<1x1x16xi1> to vector<1x2x16xi1>
    %1387 = vector.shape_cast %1382 : vector<1x2x1xf32> to vector<1x2x1xf32>
    %1388 = vector.broadcast %1387 : vector<1x2x1xf32> to vector<1x2x16xf32>
    %1389 = arith.select %1386, %1388, %1358 : vector<1x2x16xi1>, vector<1x2x16xf32>
    %c6_i32_538 = arith.constant 6 : i32
    %c15_i32_539 = arith.constant 15 : i32
    %1390 = arith.subi %c15_i32_539, %c6_i32_538 : i32
    %c0_540 = arith.constant 0 : index
    %1391 = arith.index_cast %1390 : i32 to index
    %c0_541 = arith.constant 0 : index
    %1392 = vector.load %arg9[%c0_540, %1391, %c0_541] : memref<1x16x16xf32, #tpu.memory_space<vmem>>, vector<1x1x16xf32>
    %c0_542 = arith.constant 0 : index
    %1393 = arith.index_cast %1390 : i32 to index
    %c0_543 = arith.constant 0 : index
    %1394 = vector.load %arg10[%c0_542, %1393, %c0_543] : memref<1x16x1xf32, #tpu.memory_space<vmem>>, vector<1x1x1xf32>
    %1395 = vector.broadcast %1390 : i32 to vector<1x1x16xi32>
    %1396 = arith.cmpi sgt, %0, %1395 : vector<1x1x16xi32>
    %cst_544 = arith.constant 0.000000e+00 : f32
    %1397 = vector.broadcast %cst_544 : f32 to vector<1x1x16xf32>
    %1398 = arith.select %1396, %1392, %1397 : vector<1x1x16xi1>, vector<1x1x16xf32>
    %1399 = vector.broadcast %1398 : vector<1x1x16xf32> to vector<1x2x16xf32>
    %1400 = arith.mulf %1399, %1389 : vector<1x2x16xf32>
    %cst_545 = arith.constant dense<0.000000e+00> : vector<1x2xf32>
    %1401 = vector.multi_reduction <add>, %1400, %cst_545 [2] : vector<1x2x16xf32> to vector<1x2xf32>
    %1402 = vector.shape_cast %1401 : vector<1x2xf32> to vector<1x2x1xf32>
    %1403 = vector.broadcast %1390 : i32 to vector<1x1x16xi32>
    %1404 = arith.cmpi eq, %0, %1403 : vector<1x1x16xi32>
    %cst_546 = arith.constant 0.000000e+00 : f32
    %1405 = vector.shape_cast %1404 : vector<1x1x16xi1> to vector<1x1x16xi1>
    %1406 = vector.broadcast %1405 : vector<1x1x16xi1> to vector<1x2x16xi1>
    %1407 = vector.broadcast %cst_546 : f32 to vector<1x2x16xf32>
    %1408 = arith.select %1406, %1202, %1407 : vector<1x2x16xi1>, vector<1x2x16xf32>
    %cst_547 = arith.constant dense<0.000000e+00> : vector<1x2xf32>
    %1409 = vector.multi_reduction <add>, %1408, %cst_547 [2] : vector<1x2x16xf32> to vector<1x2xf32>
    %1410 = vector.shape_cast %1409 : vector<1x2xf32> to vector<1x2x1xf32>
    %1411 = arith.subf %1410, %1402 : vector<1x2x1xf32>
    %1412 = vector.broadcast %1394 : vector<1x1x1xf32> to vector<1x2x1xf32>
    %1413 = arith.mulf %1411, %1412 : vector<1x2x1xf32>
    %1414 = vector.broadcast %1390 : i32 to vector<1x1x16xi32>
    %1415 = arith.cmpi eq, %0, %1414 : vector<1x1x16xi32>
    %1416 = vector.shape_cast %1415 : vector<1x1x16xi1> to vector<1x1x16xi1>
    %1417 = vector.broadcast %1416 : vector<1x1x16xi1> to vector<1x2x16xi1>
    %1418 = vector.shape_cast %1413 : vector<1x2x1xf32> to vector<1x2x1xf32>
    %1419 = vector.broadcast %1418 : vector<1x2x1xf32> to vector<1x2x16xf32>
    %1420 = arith.select %1417, %1419, %1389 : vector<1x2x16xi1>, vector<1x2x16xf32>
    %c7_i32_548 = arith.constant 7 : i32
    %c15_i32_549 = arith.constant 15 : i32
    %1421 = arith.subi %c15_i32_549, %c7_i32_548 : i32
    %c0_550 = arith.constant 0 : index
    %1422 = arith.index_cast %1421 : i32 to index
    %c0_551 = arith.constant 0 : index
    %1423 = vector.load %arg9[%c0_550, %1422, %c0_551] : memref<1x16x16xf32, #tpu.memory_space<vmem>>, vector<1x1x16xf32>
    %c0_552 = arith.constant 0 : index
    %1424 = arith.index_cast %1421 : i32 to index
    %c0_553 = arith.constant 0 : index
    %1425 = vector.load %arg10[%c0_552, %1424, %c0_553] : memref<1x16x1xf32, #tpu.memory_space<vmem>>, vector<1x1x1xf32>
    %1426 = vector.broadcast %1421 : i32 to vector<1x1x16xi32>
    %1427 = arith.cmpi sgt, %0, %1426 : vector<1x1x16xi32>
    %cst_554 = arith.constant 0.000000e+00 : f32
    %1428 = vector.broadcast %cst_554 : f32 to vector<1x1x16xf32>
    %1429 = arith.select %1427, %1423, %1428 : vector<1x1x16xi1>, vector<1x1x16xf32>
    %1430 = vector.broadcast %1429 : vector<1x1x16xf32> to vector<1x2x16xf32>
    %1431 = arith.mulf %1430, %1420 : vector<1x2x16xf32>
    %cst_555 = arith.constant dense<0.000000e+00> : vector<1x2xf32>
    %1432 = vector.multi_reduction <add>, %1431, %cst_555 [2] : vector<1x2x16xf32> to vector<1x2xf32>
    %1433 = vector.shape_cast %1432 : vector<1x2xf32> to vector<1x2x1xf32>
    %1434 = vector.broadcast %1421 : i32 to vector<1x1x16xi32>
    %1435 = arith.cmpi eq, %0, %1434 : vector<1x1x16xi32>
    %cst_556 = arith.constant 0.000000e+00 : f32
    %1436 = vector.shape_cast %1435 : vector<1x1x16xi1> to vector<1x1x16xi1>
    %1437 = vector.broadcast %1436 : vector<1x1x16xi1> to vector<1x2x16xi1>
    %1438 = vector.broadcast %cst_556 : f32 to vector<1x2x16xf32>
    %1439 = arith.select %1437, %1202, %1438 : vector<1x2x16xi1>, vector<1x2x16xf32>
    %cst_557 = arith.constant dense<0.000000e+00> : vector<1x2xf32>
    %1440 = vector.multi_reduction <add>, %1439, %cst_557 [2] : vector<1x2x16xf32> to vector<1x2xf32>
    %1441 = vector.shape_cast %1440 : vector<1x2xf32> to vector<1x2x1xf32>
    %1442 = arith.subf %1441, %1433 : vector<1x2x1xf32>
    %1443 = vector.broadcast %1425 : vector<1x1x1xf32> to vector<1x2x1xf32>
    %1444 = arith.mulf %1442, %1443 : vector<1x2x1xf32>
    %1445 = vector.broadcast %1421 : i32 to vector<1x1x16xi32>
    %1446 = arith.cmpi eq, %0, %1445 : vector<1x1x16xi32>
    %1447 = vector.shape_cast %1446 : vector<1x1x16xi1> to vector<1x1x16xi1>
    %1448 = vector.broadcast %1447 : vector<1x1x16xi1> to vector<1x2x16xi1>
    %1449 = vector.shape_cast %1444 : vector<1x2x1xf32> to vector<1x2x1xf32>
    %1450 = vector.broadcast %1449 : vector<1x2x1xf32> to vector<1x2x16xf32>
    %1451 = arith.select %1448, %1450, %1420 : vector<1x2x16xi1>, vector<1x2x16xf32>
    %c8_i32_558 = arith.constant 8 : i32
    %c15_i32_559 = arith.constant 15 : i32
    %1452 = arith.subi %c15_i32_559, %c8_i32_558 : i32
    %c0_560 = arith.constant 0 : index
    %1453 = arith.index_cast %1452 : i32 to index
    %c0_561 = arith.constant 0 : index
    %1454 = vector.load %arg9[%c0_560, %1453, %c0_561] : memref<1x16x16xf32, #tpu.memory_space<vmem>>, vector<1x1x16xf32>
    %c0_562 = arith.constant 0 : index
    %1455 = arith.index_cast %1452 : i32 to index
    %c0_563 = arith.constant 0 : index
    %1456 = vector.load %arg10[%c0_562, %1455, %c0_563] : memref<1x16x1xf32, #tpu.memory_space<vmem>>, vector<1x1x1xf32>
    %1457 = vector.broadcast %1452 : i32 to vector<1x1x16xi32>
    %1458 = arith.cmpi sgt, %0, %1457 : vector<1x1x16xi32>
    %cst_564 = arith.constant 0.000000e+00 : f32
    %1459 = vector.broadcast %cst_564 : f32 to vector<1x1x16xf32>
    %1460 = arith.select %1458, %1454, %1459 : vector<1x1x16xi1>, vector<1x1x16xf32>
    %1461 = vector.broadcast %1460 : vector<1x1x16xf32> to vector<1x2x16xf32>
    %1462 = arith.mulf %1461, %1451 : vector<1x2x16xf32>
    %cst_565 = arith.constant dense<0.000000e+00> : vector<1x2xf32>
    %1463 = vector.multi_reduction <add>, %1462, %cst_565 [2] : vector<1x2x16xf32> to vector<1x2xf32>
    %1464 = vector.shape_cast %1463 : vector<1x2xf32> to vector<1x2x1xf32>
    %1465 = vector.broadcast %1452 : i32 to vector<1x1x16xi32>
    %1466 = arith.cmpi eq, %0, %1465 : vector<1x1x16xi32>
    %cst_566 = arith.constant 0.000000e+00 : f32
    %1467 = vector.shape_cast %1466 : vector<1x1x16xi1> to vector<1x1x16xi1>
    %1468 = vector.broadcast %1467 : vector<1x1x16xi1> to vector<1x2x16xi1>
    %1469 = vector.broadcast %cst_566 : f32 to vector<1x2x16xf32>
    %1470 = arith.select %1468, %1202, %1469 : vector<1x2x16xi1>, vector<1x2x16xf32>
    %cst_567 = arith.constant dense<0.000000e+00> : vector<1x2xf32>
    %1471 = vector.multi_reduction <add>, %1470, %cst_567 [2] : vector<1x2x16xf32> to vector<1x2xf32>
    %1472 = vector.shape_cast %1471 : vector<1x2xf32> to vector<1x2x1xf32>
    %1473 = arith.subf %1472, %1464 : vector<1x2x1xf32>
    %1474 = vector.broadcast %1456 : vector<1x1x1xf32> to vector<1x2x1xf32>
    %1475 = arith.mulf %1473, %1474 : vector<1x2x1xf32>
    %1476 = vector.broadcast %1452 : i32 to vector<1x1x16xi32>
    %1477 = arith.cmpi eq, %0, %1476 : vector<1x1x16xi32>
    %1478 = vector.shape_cast %1477 : vector<1x1x16xi1> to vector<1x1x16xi1>
    %1479 = vector.broadcast %1478 : vector<1x1x16xi1> to vector<1x2x16xi1>
    %1480 = vector.shape_cast %1475 : vector<1x2x1xf32> to vector<1x2x1xf32>
    %1481 = vector.broadcast %1480 : vector<1x2x1xf32> to vector<1x2x16xf32>
    %1482 = arith.select %1479, %1481, %1451 : vector<1x2x16xi1>, vector<1x2x16xf32>
    %c9_i32_568 = arith.constant 9 : i32
    %c15_i32_569 = arith.constant 15 : i32
    %1483 = arith.subi %c15_i32_569, %c9_i32_568 : i32
    %c0_570 = arith.constant 0 : index
    %1484 = arith.index_cast %1483 : i32 to index
    %c0_571 = arith.constant 0 : index
    %1485 = vector.load %arg9[%c0_570, %1484, %c0_571] : memref<1x16x16xf32, #tpu.memory_space<vmem>>, vector<1x1x16xf32>
    %c0_572 = arith.constant 0 : index
    %1486 = arith.index_cast %1483 : i32 to index
    %c0_573 = arith.constant 0 : index
    %1487 = vector.load %arg10[%c0_572, %1486, %c0_573] : memref<1x16x1xf32, #tpu.memory_space<vmem>>, vector<1x1x1xf32>
    %1488 = vector.broadcast %1483 : i32 to vector<1x1x16xi32>
    %1489 = arith.cmpi sgt, %0, %1488 : vector<1x1x16xi32>
    %cst_574 = arith.constant 0.000000e+00 : f32
    %1490 = vector.broadcast %cst_574 : f32 to vector<1x1x16xf32>
    %1491 = arith.select %1489, %1485, %1490 : vector<1x1x16xi1>, vector<1x1x16xf32>
    %1492 = vector.broadcast %1491 : vector<1x1x16xf32> to vector<1x2x16xf32>
    %1493 = arith.mulf %1492, %1482 : vector<1x2x16xf32>
    %cst_575 = arith.constant dense<0.000000e+00> : vector<1x2xf32>
    %1494 = vector.multi_reduction <add>, %1493, %cst_575 [2] : vector<1x2x16xf32> to vector<1x2xf32>
    %1495 = vector.shape_cast %1494 : vector<1x2xf32> to vector<1x2x1xf32>
    %1496 = vector.broadcast %1483 : i32 to vector<1x1x16xi32>
    %1497 = arith.cmpi eq, %0, %1496 : vector<1x1x16xi32>
    %cst_576 = arith.constant 0.000000e+00 : f32
    %1498 = vector.shape_cast %1497 : vector<1x1x16xi1> to vector<1x1x16xi1>
    %1499 = vector.broadcast %1498 : vector<1x1x16xi1> to vector<1x2x16xi1>
    %1500 = vector.broadcast %cst_576 : f32 to vector<1x2x16xf32>
    %1501 = arith.select %1499, %1202, %1500 : vector<1x2x16xi1>, vector<1x2x16xf32>
    %cst_577 = arith.constant dense<0.000000e+00> : vector<1x2xf32>
    %1502 = vector.multi_reduction <add>, %1501, %cst_577 [2] : vector<1x2x16xf32> to vector<1x2xf32>
    %1503 = vector.shape_cast %1502 : vector<1x2xf32> to vector<1x2x1xf32>
    %1504 = arith.subf %1503, %1495 : vector<1x2x1xf32>
    %1505 = vector.broadcast %1487 : vector<1x1x1xf32> to vector<1x2x1xf32>
    %1506 = arith.mulf %1504, %1505 : vector<1x2x1xf32>
    %1507 = vector.broadcast %1483 : i32 to vector<1x1x16xi32>
    %1508 = arith.cmpi eq, %0, %1507 : vector<1x1x16xi32>
    %1509 = vector.shape_cast %1508 : vector<1x1x16xi1> to vector<1x1x16xi1>
    %1510 = vector.broadcast %1509 : vector<1x1x16xi1> to vector<1x2x16xi1>
    %1511 = vector.shape_cast %1506 : vector<1x2x1xf32> to vector<1x2x1xf32>
    %1512 = vector.broadcast %1511 : vector<1x2x1xf32> to vector<1x2x16xf32>
    %1513 = arith.select %1510, %1512, %1482 : vector<1x2x16xi1>, vector<1x2x16xf32>
    %c10_i32_578 = arith.constant 10 : i32
    %c15_i32_579 = arith.constant 15 : i32
    %1514 = arith.subi %c15_i32_579, %c10_i32_578 : i32
    %c0_580 = arith.constant 0 : index
    %1515 = arith.index_cast %1514 : i32 to index
    %c0_581 = arith.constant 0 : index
    %1516 = vector.load %arg9[%c0_580, %1515, %c0_581] : memref<1x16x16xf32, #tpu.memory_space<vmem>>, vector<1x1x16xf32>
    %c0_582 = arith.constant 0 : index
    %1517 = arith.index_cast %1514 : i32 to index
    %c0_583 = arith.constant 0 : index
    %1518 = vector.load %arg10[%c0_582, %1517, %c0_583] : memref<1x16x1xf32, #tpu.memory_space<vmem>>, vector<1x1x1xf32>
    %1519 = vector.broadcast %1514 : i32 to vector<1x1x16xi32>
    %1520 = arith.cmpi sgt, %0, %1519 : vector<1x1x16xi32>
    %cst_584 = arith.constant 0.000000e+00 : f32
    %1521 = vector.broadcast %cst_584 : f32 to vector<1x1x16xf32>
    %1522 = arith.select %1520, %1516, %1521 : vector<1x1x16xi1>, vector<1x1x16xf32>
    %1523 = vector.broadcast %1522 : vector<1x1x16xf32> to vector<1x2x16xf32>
    %1524 = arith.mulf %1523, %1513 : vector<1x2x16xf32>
    %cst_585 = arith.constant dense<0.000000e+00> : vector<1x2xf32>
    %1525 = vector.multi_reduction <add>, %1524, %cst_585 [2] : vector<1x2x16xf32> to vector<1x2xf32>
    %1526 = vector.shape_cast %1525 : vector<1x2xf32> to vector<1x2x1xf32>
    %1527 = vector.broadcast %1514 : i32 to vector<1x1x16xi32>
    %1528 = arith.cmpi eq, %0, %1527 : vector<1x1x16xi32>
    %cst_586 = arith.constant 0.000000e+00 : f32
    %1529 = vector.shape_cast %1528 : vector<1x1x16xi1> to vector<1x1x16xi1>
    %1530 = vector.broadcast %1529 : vector<1x1x16xi1> to vector<1x2x16xi1>
    %1531 = vector.broadcast %cst_586 : f32 to vector<1x2x16xf32>
    %1532 = arith.select %1530, %1202, %1531 : vector<1x2x16xi1>, vector<1x2x16xf32>
    %cst_587 = arith.constant dense<0.000000e+00> : vector<1x2xf32>
    %1533 = vector.multi_reduction <add>, %1532, %cst_587 [2] : vector<1x2x16xf32> to vector<1x2xf32>
    %1534 = vector.shape_cast %1533 : vector<1x2xf32> to vector<1x2x1xf32>
    %1535 = arith.subf %1534, %1526 : vector<1x2x1xf32>
    %1536 = vector.broadcast %1518 : vector<1x1x1xf32> to vector<1x2x1xf32>
    %1537 = arith.mulf %1535, %1536 : vector<1x2x1xf32>
    %1538 = vector.broadcast %1514 : i32 to vector<1x1x16xi32>
    %1539 = arith.cmpi eq, %0, %1538 : vector<1x1x16xi32>
    %1540 = vector.shape_cast %1539 : vector<1x1x16xi1> to vector<1x1x16xi1>
    %1541 = vector.broadcast %1540 : vector<1x1x16xi1> to vector<1x2x16xi1>
    %1542 = vector.shape_cast %1537 : vector<1x2x1xf32> to vector<1x2x1xf32>
    %1543 = vector.broadcast %1542 : vector<1x2x1xf32> to vector<1x2x16xf32>
    %1544 = arith.select %1541, %1543, %1513 : vector<1x2x16xi1>, vector<1x2x16xf32>
    %c11_i32_588 = arith.constant 11 : i32
    %c15_i32_589 = arith.constant 15 : i32
    %1545 = arith.subi %c15_i32_589, %c11_i32_588 : i32
    %c0_590 = arith.constant 0 : index
    %1546 = arith.index_cast %1545 : i32 to index
    %c0_591 = arith.constant 0 : index
    %1547 = vector.load %arg9[%c0_590, %1546, %c0_591] : memref<1x16x16xf32, #tpu.memory_space<vmem>>, vector<1x1x16xf32>
    %c0_592 = arith.constant 0 : index
    %1548 = arith.index_cast %1545 : i32 to index
    %c0_593 = arith.constant 0 : index
    %1549 = vector.load %arg10[%c0_592, %1548, %c0_593] : memref<1x16x1xf32, #tpu.memory_space<vmem>>, vector<1x1x1xf32>
    %1550 = vector.broadcast %1545 : i32 to vector<1x1x16xi32>
    %1551 = arith.cmpi sgt, %0, %1550 : vector<1x1x16xi32>
    %cst_594 = arith.constant 0.000000e+00 : f32
    %1552 = vector.broadcast %cst_594 : f32 to vector<1x1x16xf32>
    %1553 = arith.select %1551, %1547, %1552 : vector<1x1x16xi1>, vector<1x1x16xf32>
    %1554 = vector.broadcast %1553 : vector<1x1x16xf32> to vector<1x2x16xf32>
    %1555 = arith.mulf %1554, %1544 : vector<1x2x16xf32>
    %cst_595 = arith.constant dense<0.000000e+00> : vector<1x2xf32>
    %1556 = vector.multi_reduction <add>, %1555, %cst_595 [2] : vector<1x2x16xf32> to vector<1x2xf32>
    %1557 = vector.shape_cast %1556 : vector<1x2xf32> to vector<1x2x1xf32>
    %1558 = vector.broadcast %1545 : i32 to vector<1x1x16xi32>
    %1559 = arith.cmpi eq, %0, %1558 : vector<1x1x16xi32>
    %cst_596 = arith.constant 0.000000e+00 : f32
    %1560 = vector.shape_cast %1559 : vector<1x1x16xi1> to vector<1x1x16xi1>
    %1561 = vector.broadcast %1560 : vector<1x1x16xi1> to vector<1x2x16xi1>
    %1562 = vector.broadcast %cst_596 : f32 to vector<1x2x16xf32>
    %1563 = arith.select %1561, %1202, %1562 : vector<1x2x16xi1>, vector<1x2x16xf32>
    %cst_597 = arith.constant dense<0.000000e+00> : vector<1x2xf32>
    %1564 = vector.multi_reduction <add>, %1563, %cst_597 [2] : vector<1x2x16xf32> to vector<1x2xf32>
    %1565 = vector.shape_cast %1564 : vector<1x2xf32> to vector<1x2x1xf32>
    %1566 = arith.subf %1565, %1557 : vector<1x2x1xf32>
    %1567 = vector.broadcast %1549 : vector<1x1x1xf32> to vector<1x2x1xf32>
    %1568 = arith.mulf %1566, %1567 : vector<1x2x1xf32>
    %1569 = vector.broadcast %1545 : i32 to vector<1x1x16xi32>
    %1570 = arith.cmpi eq, %0, %1569 : vector<1x1x16xi32>
    %1571 = vector.shape_cast %1570 : vector<1x1x16xi1> to vector<1x1x16xi1>
    %1572 = vector.broadcast %1571 : vector<1x1x16xi1> to vector<1x2x16xi1>
    %1573 = vector.shape_cast %1568 : vector<1x2x1xf32> to vector<1x2x1xf32>
    %1574 = vector.broadcast %1573 : vector<1x2x1xf32> to vector<1x2x16xf32>
    %1575 = arith.select %1572, %1574, %1544 : vector<1x2x16xi1>, vector<1x2x16xf32>
    %c12_i32_598 = arith.constant 12 : i32
    %c15_i32_599 = arith.constant 15 : i32
    %1576 = arith.subi %c15_i32_599, %c12_i32_598 : i32
    %c0_600 = arith.constant 0 : index
    %1577 = arith.index_cast %1576 : i32 to index
    %c0_601 = arith.constant 0 : index
    %1578 = vector.load %arg9[%c0_600, %1577, %c0_601] : memref<1x16x16xf32, #tpu.memory_space<vmem>>, vector<1x1x16xf32>
    %c0_602 = arith.constant 0 : index
    %1579 = arith.index_cast %1576 : i32 to index
    %c0_603 = arith.constant 0 : index
    %1580 = vector.load %arg10[%c0_602, %1579, %c0_603] : memref<1x16x1xf32, #tpu.memory_space<vmem>>, vector<1x1x1xf32>
    %1581 = vector.broadcast %1576 : i32 to vector<1x1x16xi32>
    %1582 = arith.cmpi sgt, %0, %1581 : vector<1x1x16xi32>
    %cst_604 = arith.constant 0.000000e+00 : f32
    %1583 = vector.broadcast %cst_604 : f32 to vector<1x1x16xf32>
    %1584 = arith.select %1582, %1578, %1583 : vector<1x1x16xi1>, vector<1x1x16xf32>
    %1585 = vector.broadcast %1584 : vector<1x1x16xf32> to vector<1x2x16xf32>
    %1586 = arith.mulf %1585, %1575 : vector<1x2x16xf32>
    %cst_605 = arith.constant dense<0.000000e+00> : vector<1x2xf32>
    %1587 = vector.multi_reduction <add>, %1586, %cst_605 [2] : vector<1x2x16xf32> to vector<1x2xf32>
    %1588 = vector.shape_cast %1587 : vector<1x2xf32> to vector<1x2x1xf32>
    %1589 = vector.broadcast %1576 : i32 to vector<1x1x16xi32>
    %1590 = arith.cmpi eq, %0, %1589 : vector<1x1x16xi32>
    %cst_606 = arith.constant 0.000000e+00 : f32
    %1591 = vector.shape_cast %1590 : vector<1x1x16xi1> to vector<1x1x16xi1>
    %1592 = vector.broadcast %1591 : vector<1x1x16xi1> to vector<1x2x16xi1>
    %1593 = vector.broadcast %cst_606 : f32 to vector<1x2x16xf32>
    %1594 = arith.select %1592, %1202, %1593 : vector<1x2x16xi1>, vector<1x2x16xf32>
    %cst_607 = arith.constant dense<0.000000e+00> : vector<1x2xf32>
    %1595 = vector.multi_reduction <add>, %1594, %cst_607 [2] : vector<1x2x16xf32> to vector<1x2xf32>
    %1596 = vector.shape_cast %1595 : vector<1x2xf32> to vector<1x2x1xf32>
    %1597 = arith.subf %1596, %1588 : vector<1x2x1xf32>
    %1598 = vector.broadcast %1580 : vector<1x1x1xf32> to vector<1x2x1xf32>
    %1599 = arith.mulf %1597, %1598 : vector<1x2x1xf32>
    %1600 = vector.broadcast %1576 : i32 to vector<1x1x16xi32>
    %1601 = arith.cmpi eq, %0, %1600 : vector<1x1x16xi32>
    %1602 = vector.shape_cast %1601 : vector<1x1x16xi1> to vector<1x1x16xi1>
    %1603 = vector.broadcast %1602 : vector<1x1x16xi1> to vector<1x2x16xi1>
    %1604 = vector.shape_cast %1599 : vector<1x2x1xf32> to vector<1x2x1xf32>
    %1605 = vector.broadcast %1604 : vector<1x2x1xf32> to vector<1x2x16xf32>
    %1606 = arith.select %1603, %1605, %1575 : vector<1x2x16xi1>, vector<1x2x16xf32>
    %c13_i32_608 = arith.constant 13 : i32
    %c15_i32_609 = arith.constant 15 : i32
    %1607 = arith.subi %c15_i32_609, %c13_i32_608 : i32
    %c0_610 = arith.constant 0 : index
    %1608 = arith.index_cast %1607 : i32 to index
    %c0_611 = arith.constant 0 : index
    %1609 = vector.load %arg9[%c0_610, %1608, %c0_611] : memref<1x16x16xf32, #tpu.memory_space<vmem>>, vector<1x1x16xf32>
    %c0_612 = arith.constant 0 : index
    %1610 = arith.index_cast %1607 : i32 to index
    %c0_613 = arith.constant 0 : index
    %1611 = vector.load %arg10[%c0_612, %1610, %c0_613] : memref<1x16x1xf32, #tpu.memory_space<vmem>>, vector<1x1x1xf32>
    %1612 = vector.broadcast %1607 : i32 to vector<1x1x16xi32>
    %1613 = arith.cmpi sgt, %0, %1612 : vector<1x1x16xi32>
    %cst_614 = arith.constant 0.000000e+00 : f32
    %1614 = vector.broadcast %cst_614 : f32 to vector<1x1x16xf32>
    %1615 = arith.select %1613, %1609, %1614 : vector<1x1x16xi1>, vector<1x1x16xf32>
    %1616 = vector.broadcast %1615 : vector<1x1x16xf32> to vector<1x2x16xf32>
    %1617 = arith.mulf %1616, %1606 : vector<1x2x16xf32>
    %cst_615 = arith.constant dense<0.000000e+00> : vector<1x2xf32>
    %1618 = vector.multi_reduction <add>, %1617, %cst_615 [2] : vector<1x2x16xf32> to vector<1x2xf32>
    %1619 = vector.shape_cast %1618 : vector<1x2xf32> to vector<1x2x1xf32>
    %1620 = vector.broadcast %1607 : i32 to vector<1x1x16xi32>
    %1621 = arith.cmpi eq, %0, %1620 : vector<1x1x16xi32>
    %cst_616 = arith.constant 0.000000e+00 : f32
    %1622 = vector.shape_cast %1621 : vector<1x1x16xi1> to vector<1x1x16xi1>
    %1623 = vector.broadcast %1622 : vector<1x1x16xi1> to vector<1x2x16xi1>
    %1624 = vector.broadcast %cst_616 : f32 to vector<1x2x16xf32>
    %1625 = arith.select %1623, %1202, %1624 : vector<1x2x16xi1>, vector<1x2x16xf32>
    %cst_617 = arith.constant dense<0.000000e+00> : vector<1x2xf32>
    %1626 = vector.multi_reduction <add>, %1625, %cst_617 [2] : vector<1x2x16xf32> to vector<1x2xf32>
    %1627 = vector.shape_cast %1626 : vector<1x2xf32> to vector<1x2x1xf32>
    %1628 = arith.subf %1627, %1619 : vector<1x2x1xf32>
    %1629 = vector.broadcast %1611 : vector<1x1x1xf32> to vector<1x2x1xf32>
    %1630 = arith.mulf %1628, %1629 : vector<1x2x1xf32>
    %1631 = vector.broadcast %1607 : i32 to vector<1x1x16xi32>
    %1632 = arith.cmpi eq, %0, %1631 : vector<1x1x16xi32>
    %1633 = vector.shape_cast %1632 : vector<1x1x16xi1> to vector<1x1x16xi1>
    %1634 = vector.broadcast %1633 : vector<1x1x16xi1> to vector<1x2x16xi1>
    %1635 = vector.shape_cast %1630 : vector<1x2x1xf32> to vector<1x2x1xf32>
    %1636 = vector.broadcast %1635 : vector<1x2x1xf32> to vector<1x2x16xf32>
    %1637 = arith.select %1634, %1636, %1606 : vector<1x2x16xi1>, vector<1x2x16xf32>
    %c14_i32_618 = arith.constant 14 : i32
    %c15_i32_619 = arith.constant 15 : i32
    %1638 = arith.subi %c15_i32_619, %c14_i32_618 : i32
    %c0_620 = arith.constant 0 : index
    %1639 = arith.index_cast %1638 : i32 to index
    %c0_621 = arith.constant 0 : index
    %1640 = vector.load %arg9[%c0_620, %1639, %c0_621] : memref<1x16x16xf32, #tpu.memory_space<vmem>>, vector<1x1x16xf32>
    %c0_622 = arith.constant 0 : index
    %1641 = arith.index_cast %1638 : i32 to index
    %c0_623 = arith.constant 0 : index
    %1642 = vector.load %arg10[%c0_622, %1641, %c0_623] : memref<1x16x1xf32, #tpu.memory_space<vmem>>, vector<1x1x1xf32>
    %1643 = vector.broadcast %1638 : i32 to vector<1x1x16xi32>
    %1644 = arith.cmpi sgt, %0, %1643 : vector<1x1x16xi32>
    %cst_624 = arith.constant 0.000000e+00 : f32
    %1645 = vector.broadcast %cst_624 : f32 to vector<1x1x16xf32>
    %1646 = arith.select %1644, %1640, %1645 : vector<1x1x16xi1>, vector<1x1x16xf32>
    %1647 = vector.broadcast %1646 : vector<1x1x16xf32> to vector<1x2x16xf32>
    %1648 = arith.mulf %1647, %1637 : vector<1x2x16xf32>
    %cst_625 = arith.constant dense<0.000000e+00> : vector<1x2xf32>
    %1649 = vector.multi_reduction <add>, %1648, %cst_625 [2] : vector<1x2x16xf32> to vector<1x2xf32>
    %1650 = vector.shape_cast %1649 : vector<1x2xf32> to vector<1x2x1xf32>
    %1651 = vector.broadcast %1638 : i32 to vector<1x1x16xi32>
    %1652 = arith.cmpi eq, %0, %1651 : vector<1x1x16xi32>
    %cst_626 = arith.constant 0.000000e+00 : f32
    %1653 = vector.shape_cast %1652 : vector<1x1x16xi1> to vector<1x1x16xi1>
    %1654 = vector.broadcast %1653 : vector<1x1x16xi1> to vector<1x2x16xi1>
    %1655 = vector.broadcast %cst_626 : f32 to vector<1x2x16xf32>
    %1656 = arith.select %1654, %1202, %1655 : vector<1x2x16xi1>, vector<1x2x16xf32>
    %cst_627 = arith.constant dense<0.000000e+00> : vector<1x2xf32>
    %1657 = vector.multi_reduction <add>, %1656, %cst_627 [2] : vector<1x2x16xf32> to vector<1x2xf32>
    %1658 = vector.shape_cast %1657 : vector<1x2xf32> to vector<1x2x1xf32>
    %1659 = arith.subf %1658, %1650 : vector<1x2x1xf32>
    %1660 = vector.broadcast %1642 : vector<1x1x1xf32> to vector<1x2x1xf32>
    %1661 = arith.mulf %1659, %1660 : vector<1x2x1xf32>
    %1662 = vector.broadcast %1638 : i32 to vector<1x1x16xi32>
    %1663 = arith.cmpi eq, %0, %1662 : vector<1x1x16xi32>
    %1664 = vector.shape_cast %1663 : vector<1x1x16xi1> to vector<1x1x16xi1>
    %1665 = vector.broadcast %1664 : vector<1x1x16xi1> to vector<1x2x16xi1>
    %1666 = vector.shape_cast %1661 : vector<1x2x1xf32> to vector<1x2x1xf32>
    %1667 = vector.broadcast %1666 : vector<1x2x1xf32> to vector<1x2x16xf32>
    %1668 = arith.select %1665, %1667, %1637 : vector<1x2x16xi1>, vector<1x2x16xf32>
    %c15_i32_628 = arith.constant 15 : i32
    %c15_i32_629 = arith.constant 15 : i32
    %1669 = arith.subi %c15_i32_629, %c15_i32_628 : i32
    %c0_630 = arith.constant 0 : index
    %1670 = arith.index_cast %1669 : i32 to index
    %c0_631 = arith.constant 0 : index
    %1671 = vector.load %arg9[%c0_630, %1670, %c0_631] : memref<1x16x16xf32, #tpu.memory_space<vmem>>, vector<1x1x16xf32>
    %c0_632 = arith.constant 0 : index
    %1672 = arith.index_cast %1669 : i32 to index
    %c0_633 = arith.constant 0 : index
    %1673 = vector.load %arg10[%c0_632, %1672, %c0_633] : memref<1x16x1xf32, #tpu.memory_space<vmem>>, vector<1x1x1xf32>
    %1674 = vector.broadcast %1669 : i32 to vector<1x1x16xi32>
    %1675 = arith.cmpi sgt, %0, %1674 : vector<1x1x16xi32>
    %cst_634 = arith.constant 0.000000e+00 : f32
    %1676 = vector.broadcast %cst_634 : f32 to vector<1x1x16xf32>
    %1677 = arith.select %1675, %1671, %1676 : vector<1x1x16xi1>, vector<1x1x16xf32>
    %1678 = vector.broadcast %1677 : vector<1x1x16xf32> to vector<1x2x16xf32>
    %1679 = arith.mulf %1678, %1668 : vector<1x2x16xf32>
    %cst_635 = arith.constant dense<0.000000e+00> : vector<1x2xf32>
    %1680 = vector.multi_reduction <add>, %1679, %cst_635 [2] : vector<1x2x16xf32> to vector<1x2xf32>
    %1681 = vector.shape_cast %1680 : vector<1x2xf32> to vector<1x2x1xf32>
    %1682 = vector.broadcast %1669 : i32 to vector<1x1x16xi32>
    %1683 = arith.cmpi eq, %0, %1682 : vector<1x1x16xi32>
    %cst_636 = arith.constant 0.000000e+00 : f32
    %1684 = vector.shape_cast %1683 : vector<1x1x16xi1> to vector<1x1x16xi1>
    %1685 = vector.broadcast %1684 : vector<1x1x16xi1> to vector<1x2x16xi1>
    %1686 = vector.broadcast %cst_636 : f32 to vector<1x2x16xf32>
    %1687 = arith.select %1685, %1202, %1686 : vector<1x2x16xi1>, vector<1x2x16xf32>
    %cst_637 = arith.constant dense<0.000000e+00> : vector<1x2xf32>
    %1688 = vector.multi_reduction <add>, %1687, %cst_637 [2] : vector<1x2x16xf32> to vector<1x2xf32>
    %1689 = vector.shape_cast %1688 : vector<1x2xf32> to vector<1x2x1xf32>
    %1690 = arith.subf %1689, %1681 : vector<1x2x1xf32>
    %1691 = vector.broadcast %1673 : vector<1x1x1xf32> to vector<1x2x1xf32>
    %1692 = arith.mulf %1690, %1691 : vector<1x2x1xf32>
    %1693 = vector.broadcast %1669 : i32 to vector<1x1x16xi32>
    %1694 = arith.cmpi eq, %0, %1693 : vector<1x1x16xi32>
    %1695 = vector.shape_cast %1694 : vector<1x1x16xi1> to vector<1x1x16xi1>
    %1696 = vector.broadcast %1695 : vector<1x1x16xi1> to vector<1x2x16xi1>
    %1697 = vector.shape_cast %1692 : vector<1x2x1xf32> to vector<1x2x1xf32>
    %1698 = vector.broadcast %1697 : vector<1x2x1xf32> to vector<1x2x16xf32>
    %1699 = arith.select %1696, %1698, %1668 : vector<1x2x16xi1>, vector<1x2x16xf32>
    %c16_i32_638 = arith.constant 16 : i32
    %c0_639 = arith.constant 0 : index
    %c0_640 = arith.constant 0 : index
    %c0_641 = arith.constant 0 : index
    %1700 = vector.load %arg6[%c0_639, %c0_640, %c0_641] : memref<1x2x16xf32, #tpu.memory_space<vmem>>, vector<1x2x16xf32>
    tpu.vector_store %arg6[%c0_639, %c0_640, %c0_641], %1699 {strides = array<i32>} : memref<1x2x16xf32, #tpu.memory_space<vmem>>, vector<1x2x16xf32>,
    %1701 = arith.mulf %738, %1699 : vector<1x2x16xf32>
    %cst_642 = arith.constant dense<0.000000e+00> : vector<1xf32>
    %1702 = vector.multi_reduction <add>, %1701, %cst_642 [1, 2] : vector<1x2x16xf32> to vector<1xf32>
    %1703 = vector.shape_cast %1702 : vector<1xf32> to vector<1x1x1xf32>
    %cst_643 = arith.constant 5.000000e-01 : f32
    %1704 = vector.broadcast %cst_643 : f32 to vector<1x1x1xf32>
    %1705 = arith.mulf %1704, %1703 : vector<1x1x1xf32>
    %1706 = arith.addf %1705, %734 : vector<1x1x1xf32>
    %cst_644 = arith.constant 14.7030163 : f32
    %1707 = vector.broadcast %cst_644 : f32 to vector<1x1x1xf32>
    %1708 = arith.addf %1706, %1707 : vector<1x1x1xf32>
    %c0_645 = arith.constant 0 : index
    %c0_646 = arith.constant 0 : index
    %c0_647 = arith.constant 0 : index
    %1709 = vector.load %arg7[%c0_645, %c0_646, %c0_647] : memref<1x1x1xf32, #tpu.memory_space<vmem>>, vector<1x1x1xf32>
    tpu.vector_store %arg7[%c0_645, %c0_646, %c0_647], %1708 {strides = array<i32>} : memref<1x1x1xf32, #tpu.memory_space<vmem>>, vector<1x1x1xf32>,
    return
  }
  func.func @transform_0(%arg0: i32) -> (i32, i32, i32) {
    %c0_i32 = arith.constant 0 : i32
    %c0_i32_0 = arith.constant 0 : i32
    %c0_i32_1 = arith.constant 0 : i32
    return %arg0, %c0_i32, %c0_i32_0 : i32, i32, i32
  }
  func.func @transform_1(%arg0: i32) -> (i32, i32, i32) {
    %c0_i32 = arith.constant 0 : i32
    %c0_i32_0 = arith.constant 0 : i32
    %c0_i32_1 = arith.constant 0 : i32
    return %arg0, %c0_i32, %c0_i32_0 : i32, i32, i32
  }
  func.func @transform_2(%arg0: i32) -> (i32, i32, i32) {
    %c0_i32 = arith.constant 0 : i32
    %c0_i32_0 = arith.constant 0 : i32
    %c0_i32_1 = arith.constant 0 : i32
    return %arg0, %c0_i32, %c0_i32_0 : i32, i32, i32
  }
  func.func @transform_3(%arg0: i32) -> (i32, i32, i32) {
    %c0_i32 = arith.constant 0 : i32
    %c0_i32_0 = arith.constant 0 : i32
    %c0_i32_1 = arith.constant 0 : i32
    return %arg0, %c0_i32, %c0_i32_0 : i32, i32, i32
  }
  func.func @transform_4(%arg0: i32) -> (i32, i32, i32) {
    %c0_i32 = arith.constant 0 : i32
    %c0_i32_0 = arith.constant 0 : i32
    %c0_i32_1 = arith.constant 0 : i32
    return %arg0, %c0_i32, %c0_i32_0 : i32, i32, i32
  }
  func.func @transform_5(%arg0: i32) -> (i32, i32, i32) {
    %c0_i32 = arith.constant 0 : i32
    %c0_i32_0 = arith.constant 0 : i32
    %c0_i32_1 = arith.constant 0 : i32
    return %arg0, %c0_i32, %c0_i32_0 : i32, i32, i32
  }
  func.func @transform_6(%arg0: i32) -> (i32, i32, i32) {
    %c0_i32 = arith.constant 0 : i32
    %c0_i32_0 = arith.constant 0 : i32
    %c0_i32_1 = arith.constant 0 : i32
    return %arg0, %c0_i32, %c0_i32_0 : i32, i32, i32
  }
  func.func @transform_7(%arg0: i32) -> (i32, i32, i32) {
    %c0_i32 = arith.constant 0 : i32
    %c0_i32_0 = arith.constant 0 : i32
    %c0_i32_1 = arith.constant 0 : i32
    return %arg0, %c0_i32, %c0_i32_0 : i32, i32, i32
  }
}

</mosaic_0001>

<bundles_post_ra>
// kernel: tpu_custom_call.1
= control target key start
LH: loop header
LB: loop body
LE: loop exit
PB: predicated region body
PF: predicated region fallthrough
CT: control target
= control target key end

     0   :  { %s4005_s0 = inlined_call_operand.hbm [shape: f32[2,16,16], index: 0, kind: input, shape index: {}]   ;;  %s4006_s1 = inlined_call_operand.vmem [shape: f32[2,2,16], index: 1, kind: input, shape index: {}]   ;;  %s4007_s2 = inlined_call_operand.vmem [shape: f32[2,2,1], index: 2, kind: input, shape index: {}]   ;;  %s4008_s3 = inlined_call_operand.vmem [shape: f32[2,1,16], index: 3, kind: input, shape index: {}]   ;;  %s4009_s4 = inlined_call_operand.hbm [shape: f32[2,16,16], index: 4, kind: output, shape index: {0}]   ;;  %s4010_s5 = inlined_call_operand.hbm [shape: f32[2,2,16], index: 5, kind: output, shape index: {1}]   ;;  %s4011_s6 = inlined_call_operand.vmem [shape: f32[2,1,1], index: 6, kind: output, shape index: {2}]   ;;  %s4012_s7 = inlined_call_operand.vmem [shape: s32[2,1,1], index: 7, kind: output, shape index: {3}]  }
   0x1   :  { %4059 = sst [smem:[#allocation17_spill]] %s4005_s0 }
   0x2   :  { %4060 = sst [smem:[#allocation18_spill]] %s4006_s1 }
   0x3   :  { %4061 = sst [smem:[#allocation19_spill]] %s4007_s2 }
   0x4   :  { %4062 = sst [smem:[#allocation20_spill]] %s4008_s3 }
   0x5   :  { %13 = vsyncpa [#allocation5], 0 }
   0x6   :  { %15 = vsyncpa [#allocation5 + $0x1], 0 }
   0x7   :  { %16 = vsyncpa [#allocation6], 0 }
   0x8   :  { %18 = vsyncpa [#allocation6 + $0x1], 0 }
   0x9   :  { %19 = vsyncpa [#allocation9], 0 }
   0xa   :  { %21 = vsyncpa [#allocation9 + $0x1], 0  ;;  %s2874_s24 = smov 0   ;;  %s2876_s25 = smov 0  }
   0xb   :  { %s2878_s26 = smov 0   ;;  %s2880_s27 = smov 0  }
   0xc LB: > { %s2895_s28 = sadd.s32 4294967295, %s2827_s27   ;;  %s2556_s29 = sadd.s32 4294967294, %s2827_s27   ;;  %s2827_s27 = sphi %s2880_s27, %s4183_s27   ;;  %s2823_s26 = sphi %s2878_s26, %s4182_s26   ;;  %s2819_s25 = sphi %s2876_s25, %s4181_s25   ;;  %s2815_s24 = sphi %s2874_s24, %s4180_s24  }
   0xd   : > { %s2899_s30 = sadd.s32 1, %s2827_s27   ;;  %s34_s8 = sadd.s32 1, %s2823_s26 }
   0xe   : > { %s31_s9 = ssub.s32 %s2827_s27, %s2899_s30  ;;  %p41_p0 = scmp.ne.s32.totalorder %s2823_s26, %s2819_s25 }
   0xf   : > { %p32_p1 = scmp.eq.s32.totalorder %s31_s9, 0  ;;  %p42_p2 = scmp.eq.s32.totalorder %s2827_s27, 0 }
  0x10   : > { %p47_p3 = scmp.ne.s32.totalorder %s2819_s25, %s2815_s24  ;;  %p48_p4 = scmp.eq.s32.totalorder %s2895_s28, 0 }
  0x11   : > { %s2911_s10 = scalar_select %p32_p1, %s2823_s26, %s34_s8  }
  0x12   : > { %p2913_p5 = por %p42_p2, %p41_p0  ;;  %p2917_p6 = por %p48_p4, %p47_p3 }
  0x13   : > { %4063 = sst [smem:[#allocation13_spill]] %s2911_s10  ;;  %p149_p7 = scmp.eq.s32.totalorder %s2895_s28, 1 }
  0x14   : > { %p155_p8 = scmp.eq.s32.totalorder %s2556_s29, 1  ;;  %p2595_p10 = scmp.lt.s32.totalorder %s2827_s27, 2 }
  0x15   : > { %p2924_p11 = por %p149_p7, %p41_p0  ;;  %s253_s15 = sand.u32 1, %s2823_s26  }
  0x16   : > { %p2928_p12 = por %p155_p8, %p47_p3  ;;  %s2576_s16 = sshll.u32 %s2827_s27, 4 }
  0x17   : > { %s2559_s17 = sshll.u32 %s253_s15, 4  ;;  %s4068_s0 = sld [smem:[#allocation17_spill]] }
  0x18   : > { %s257_s22 = scalar_lea.vmem [#allocation4], %s2559_s17  ;;  %p2939_p13 = pnand %p2595_p10, %p2913_p5 }
  0x19   : > { %s265_s23 = sshll.u32 %s257_s22, 4  ;;  %p2562_p0 = scmp.ge.s32.totalorder %s2827_s27, 1  ;;  %s266_s23 = int_to_ptr.vmem [resolvable:$true] %s265_s23 }
  0x1a   : > { %p293_p1 = scmp.lt.s32.totalorder %s2827_s27, 3  ;;  %s254_s8 = scalar_lea.sflag [#allocation5], %s253_s15 }
  0x1b   : > { %p2703_p3 = pneg %p2939_p13 }
  0x1d   : > { %s262_s20 = scalar_lea.hbm %s4068_s0, %s2576_s16  ;;  %s2706_s11 = scalar_lea.hbm %s4068_s0, 32 }
  0x1e   : > { %s263_s21 = sshll.u32 %s262_s20, 4  ;;  %s264_s21 = int_to_ptr.hbm [resolvable:$true] %s263_s21 }
  0x1f   : > { %s2699_s9 = sshra.s32 %s264_s21, 4  ;;  %s2700_s9 = int_to_ptr.hbm [resolvable:$true] %s2699_s9 }
  0x20   : > { %s2701_s10 = scalar_lea.hbm %s2700_s9, 16  ;;  %p2707_p5 = scmp.lt.s32.totalorder %s2700_s9, %s4068_s0 }
  0x21   : > { %p2702_p2 = scmp.ne.s32.totalorder %s2700_s9, %s2701_s10  ;;  %p2708_p8 = scmp.lt.s32.totalorder %s2706_s11, %s2701_s10 }
  0x23   : > { %p2704_p4 = pnand %p2703_p3, %p2702_p2  ;;  %p2709_p10 = por %p2708_p8, %p2707_p5 }
  0x25   : > { %p2705_p7 = pneg %p2704_p4 }
  0x27   : > { %p2710_p9 = pnand %p2709_p10, %p2705_p7 }
  0x29   : > { %2713 = shalt.err (!%p2710_p9)
}
  0x2a   : > { %s2829_s15 = smov 128   ;;  %s2830_s20 = smov 8  }
  0x2b   : > { %2587 = dma.hbm_to_vmem [thread:$0]  (!%p2939_p13), %s264_s21, 256, %s266_s23, %s254_s8, %s2829_s15, %s2829_s15, %s2830_s20  }
  0x2c   : > { %p294_p2 = pnand %p2562_p0, %p293_p1 }
  0x2e   : > { %297 = sbr.rel (%p294_p2) target bundleno = 10660 (0x29a4), region = 36 }
  0x33   : > { %s2960_s22 = sand.u32 1, %s2819_s25  }
  0x34   : > { %s2563_s10 = sshll.u32 %s2960_s22, 4  ;;  %s300_s9 = scalar_lea.sflag [#allocation5], %s2960_s22 }
  0x35   : > { %s2964_s16 = scalar_lea.vmem [#allocation4], %s2563_s10 }
  0x36   : > { %2802 = dma.done.wait (%p2917_p6), %s300_s9, 256  }
  0x37   : > { %2804 = vsyncadd (%p2917_p6), %s300_s9, 4294967040  ;;  %p357_p9 = scmp.lt.s32.totalorder %s2895_s28, 1  ;;  %vm4057_vm0 = vcmask 130048   ;;  %v374_v0 = vlaneseq  ;;  %v377_v1 = vld [vmem:[%s2964_s16] sm:$0xff]  ;;  %s2975_s23 = scalar_lea.vmem [#allocation7], %s2563_s10  ;;  %vm4058_vm2 = vcmask 122880  }
  0x38   : > { %380 = vst.msk [vmem:[%s2975_s23] sm:$0xff] %vm4057_vm0, %v377_v1  ;;  %s4070_s3 = sld [smem:[#allocation20_spill]]  ;;  %v4044_v8 = vmov 0   ;;  %vm410_vm6 = vcmask 0   ;;  %s2565_s8 = sshll.u32 %s2960_s22, 1 }
  0x39   : > { %s2972_s21 = scalar_select %p357_p9, %s2895_s28, 1  ;;  %v2985_v2 = vand.u32 127, %v374_v0  ;;  %2635 = vset.pattern.permute.xlu1 %v4044_v8 }
  0x3a   : > { %s4071_s2 = sld [smem:[#allocation19_spill]]  ;;  %s2356_s15 = sshll.u32 %s2975_s23, 4  ;;  %s2357_s15 = int_to_ptr.vmem [resolvable:$true] %s2356_s15 }
  0x3b   : > { %vm4015_vm1 = vcmp.eq.s32.totalorder %v2985_v2, 0  ;;  %vm405_vm8 = vcmp.gt.s32.totalorder %v2985_v2, 0  ;;  %vm4016_vm9 = vcmp.eq.s32.totalorder %v2985_v2, 1  ;;  %vm487_vm14 = vcmp.gt.s32.totalorder %v2985_v2, 1  ;;  %s2566_s17 = sshll.u32 %s2972_s21, 1  ;;  %s4072_s1 = sld [smem:[#allocation18_spill]] }
  0x3c   : > { %vm4017_vm15 = vcmp.eq.s32.totalorder %v2985_v2, 2  ;;  %s373_s29 = scalar_lea.vmem %s4012_s7, %s2972_s21  ;;  %s2749_s0 = scalar_lea.hbm %s4009_s4, 32 }
  0x3e   : > { %s2983_s12 = scalar_lea.vmem %s4070_s3, %s2972_s21 }
  0x3f   : > { %v2988_v3 = vld [vmem:[%s2983_s12] sm:$0x1] }
  0x40   : > { %v382_v4 = vld [vmem:[%s2975_s23] sm:$0x1]  ;;  %s364_s19 = scalar_lea.vmem %s4071_s2, %s2566_s17 }
  0x41   : > { %v384_v5 = vadd.f32 %v382_v4, %v2988_v3  ;;  %v444_v24 = vld [vmem:[%s2975_s23] sm:$0xff]  ;;  %s360_s10 = scalar_lea.vmem %s4072_s1, %s2566_s17  ;;  %s2577_s17 = sshll.u32 %s2895_s28, 4 }
  0x43   : > { %v385_v6 = vsel %vm4015_vm1, %v384_v5, 0.0 }
  0x44   : > { %v387_v7 = vsel %vm4058_vm2, %v385_v6, 0.0 }
  0x45   : > { %388 = vadd.xlane.f32.xlu0 %v387_v7 }
  0xb8   : > { %v2997_v9 = vpop.xlane.xlu0 %388 }
  0xb9   : > { %vm392_vm3 = vcmp.gt.f32.partialorder %v2997_v9, 0.0 }
  0xba   : > { %v393_v10 = vsel %vm392_vm3, %v2997_v9, 1.0 }
  0xbb   : > { %2654 = vrsqrt.f32 %v393_v10  ;;  %vm400_vm5 = vweird.f32 %v393_v10 }
  0xc1   : > { %v2655_v11 = vpop.eup %2654 }
  0xc2   : > { %v395_v12 = vmul.f32 %v2655_v11, %v393_v10  ;;  %vm401_vm4 = vweird.f32 %v2655_v11 }
  0xc3   : > { %vm402_vm7 = vmor %vm400_vm5, %vm401_vm4 }
  0xc4   : > { %v396_v13 = vmul.f32 %v2655_v11, %v395_v12 }
  0xc6   : > { %v397_v14 = vmul.f32 0.5, %v396_v13 }
  0xc8   : > { %v398_v15 = vsub.f32 1.5, %v397_v14 }
  0xca   : > { %v399_v16 = vmul.f32 %v2655_v11, %v398_v15 }
  0xcc   : > { %v403_v17 = vsel %vm402_vm7, %v2655_v11, %v399_v16 }
  0xcd   : > { %v404_v18 = vmul.f32 %v403_v17, %v393_v10  ;;  %v406_v19 = vmul.f32 %v403_v17, %v382_v4  ;;  %411 = vst.msk [vmem:[#allocation3] sm:$0x1] %vm410_vm6, %v403_v17 }
  0xcf   : > { %v407_v20 = vsel %vm405_vm8, %v406_v19, 0.0 }
  0xd0   : > { %v3007_v21 = vsel %vm4015_vm1, %v404_v18, %v407_v20 }
  0xd1   : > { %412 = vxpose.xlu0.b32.start.end [1/1] (short) (narrow) %v3007_v21, 16  ;;  %409 = vst.msk [vmem:[#allocation2] sm:$0x1] %vm4058_vm2, %v3007_v21  ;;  %v456_v23 = vperm.slane %v3007_v21, 0 }
 0x138   : > { %2637 = vset.pattern.permute.xlu0 %v4044_v8 }
 0x175   : > { %v428_v22 = vpop.trf.xlu0 }
 0x176   : > { %448 = vperm.xlu1 %2635, %v428_v22  }
 0x17d   : > { %v3055_v56 = vpop.trf.xlu0 }
 0x1e8   : > { %v449_v25 = vpop.permute.xlu1 %448 }
 0x1e9   : > { %v457_v26 = vmul.f32 %v456_v23, %v449_v25 }
 0x1eb   : > { %v459_v27 = vsub.f32 %v444_v24, %v457_v26 }
 0x1ed   : > { %461 = vst.msk [vmem:[%s2975_s23] sm:$0xff] %vm4057_vm0, %v459_v27 }
 0x1f4   : > { %v463_v28 = vld [vmem:[%s2975_s23 + $0x1] sm:$0x1] }
 0x1f5   : > { %v465_v29 = vadd.f32 %v463_v28, %v2988_v3  ;;  %v525_v50 = vld [vmem:[%s2975_s23] sm:$0xff] }
 0x1f7   : > { %v466_v30 = vsel %vm4016_vm9, %v465_v29, 0.0 }
 0x1f8   : > { %v467_v31 = vsel %vm4058_vm2, %v466_v30, 0.0 }
 0x1f9   : > { %468 = vadd.xlane.f32.xlu1 %v467_v31 }
 0x26c   : > { %v3025_v32 = vpop.xlane.xlu1 %468 }
 0x26d   : > { %vm474_vm10 = vcmp.gt.f32.partialorder %v3025_v32, 0.0 }
 0x26e   : > { %v475_v33 = vsel %vm474_vm10, %v3025_v32, 1.0  ;;  %vm568_vm10 = vcmp.gt.s32.totalorder %v2985_v2, 2 }
 0x26f   : > { %2656 = vrsqrt.f32 %v475_v33  ;;  %vm482_vm12 = vweird.f32 %v475_v33 }
 0x275   : > { %v2657_v34 = vpop.eup %2656 }
 0x276   : > { %v477_v35 = vmul.f32 %v2657_v34, %v475_v33  ;;  %vm483_vm11 = vweird.f32 %v2657_v34 }
 0x277   : > { %vm484_vm13 = vmor %vm482_vm12, %vm483_vm11  ;;  %vm4018_vm11 = vcmp.eq.s32.totalorder %v2985_v2, 3 }
 0x278   : > { %v478_v36 = vmul.f32 %v2657_v34, %v477_v35 }
 0x27a   : > { %v479_v37 = vmul.f32 0.5, %v478_v36 }
 0x27c   : > { %v480_v38 = vsub.f32 1.5, %v479_v37 }
 0x27e   : > { %v481_v39 = vmul.f32 %v2657_v34, %v480_v38 }
 0x280   : > { %v485_v40 = vsel %vm484_vm13, %v2657_v34, %v481_v39 }
 0x281   : > { %v486_v41 = vmul.f32 %v485_v40, %v475_v33  ;;  %v488_v42 = vmul.f32 %v485_v40, %v463_v28  ;;  %492 = vst.msk [vmem:[#allocation3 + $0x1] sm:$0x1] %vm410_vm6, %v485_v40 }
 0x283   : > { %v489_v43 = vsel %vm487_vm14, %v488_v42, 0.0 }
 0x284   : > { %v3035_v44 = vsel %vm4016_vm9, %v486_v41, %v489_v43 }
 0x285   : > { %493 = vxpose.xlu2.b32.start.end [1/1] (short) (narrow) %v3035_v44, 16  ;;  %491 = vst.msk [vmem:[#allocation2 + $0x1] sm:$0x1] %vm4058_vm2, %v3035_v44  ;;  %v537_v47 = vperm.slane %v3035_v44, 0 }
 0x2e7   : > { %2636 = vset.pattern.permute.xlu2 %v4044_v8 }
 0x31e   : > { %v509_v45 = vpop.trf.xlu2 }
 0x31f   : > { %529 = vperm.xlu2 %2636, %v509_v45  }
 0x326   : > { %v3041_v46 = vpop.trf.xlu2 }
 0x379   : > { %v530_v48 = vpop.permute.xlu2 %529 }
 0x37a   : > { %v538_v49 = vmul.f32 %v537_v47, %v530_v48 }
 0x37c   : > { %v540_v51 = vsub.f32 %v525_v50, %v538_v49 }
 0x37e   : > { %542 = vst.msk [vmem:[%s2975_s23] sm:$0xff] %vm4057_vm0, %v540_v51 }
 0x385   : > { %v544_v52 = vld [vmem:[%s2975_s23 + $0x2] sm:$0x1] }
 0x386   : > { %v546_v53 = vadd.f32 %v544_v52, %v2988_v3  ;;  %v606_v15 = vld [vmem:[%s2975_s23] sm:$0xff] }
 0x388   : > { %v547_v54 = vsel %vm4017_vm15, %v546_v53, 0.0 }
 0x389   : > { %v548_v55 = vsel %vm4058_vm2, %v547_v54, 0.0 }
 0x38a   : > { %549 = vadd.xlane.f32.xlu0 %v548_v55 }
 0x3fd   : > { %v3057_v57 = vpop.xlane.xlu0 %549 }
 0x3fe   : > { %vm555_vm3 = vcmp.gt.f32.partialorder %v3057_v57, 0.0 }
 0x3ff   : > { %v556_v58 = vsel %vm555_vm3, %v3057_v57, 1.0 }
 0x400   : > { %2658 = vrsqrt.f32 %v556_v58  ;;  %vm563_vm5 = vweird.f32 %v556_v58 }
 0x406   : > { %v2659_v59 = vpop.eup %2658 }
 0x407   : > { %v558_v60 = vmul.f32 %v2659_v59, %v556_v58  ;;  %vm564_vm4 = vweird.f32 %v2659_v59 }
 0x408   : > { %vm565_vm7 = vmor %vm563_vm5, %vm564_vm4  ;;  %vm4013_vm5 = vcmp.gt.s32.totalorder %v2985_v2, 3 }
 0x409   : > { %v559_v61 = vmul.f32 %v2659_v59, %v558_v60 }
 0x40b   : > { %v560_v62 = vmul.f32 0.5, %v559_v61 }
 0x40d   : > { %v561_v63 = vsub.f32 1.5, %v560_v62 }
 0x40f   : > { %v562_v0 = vmul.f32 %v2659_v59, %v561_v63 }
 0x411   : > { %v566_v1 = vsel %vm565_vm7, %v2659_v59, %v562_v0  ;;  %vm4019_vm7 = vcmp.eq.s32.totalorder %v2985_v2, 4 }
 0x412   : > { %v567_v4 = vmul.f32 %v566_v1, %v556_v58  ;;  %v569_v5 = vmul.f32 %v566_v1, %v544_v52  ;;  %573 = vst.msk [vmem:[#allocation3 + $0x2] sm:$0x1] %vm410_vm6, %v566_v1 }
 0x414   : > { %v570_v6 = vsel %vm568_vm10, %v569_v5, 0.0 }
 0x415   : > { %v3067_v7 = vsel %vm4017_vm15, %v567_v4, %v570_v6  ;;  %v1733_v4 = vld [vmem:[%s364_s19] sm:$0x3]  ;;  %s2355_s19 = scalar_lea.hbm %s4009_s4, %s2577_s17 }
 0x416   : > { %574 = vxpose.xlu1.b32.start.end [1/1] (short) (narrow) %v3067_v7, 16  ;;  %572 = vst.msk [vmem:[#allocation2 + $0x2] sm:$0x1] %vm4058_vm2, %v3067_v7  ;;  %v618_v12 = vperm.slane %v3067_v7, 0  ;;  %s2358_s20 = sshll.u32 %s2355_s19, 4  ;;  %s2359_s20 = int_to_ptr.hbm [resolvable:$true] %s2358_s20 }
 0x417   : > { %s2743_s9 = sshra.s32 %s2359_s20, 4  ;;  %s2744_s9 = int_to_ptr.hbm [resolvable:$true] %s2743_s9 }
 0x418   : > { %p2750_p1 = scmp.lt.s32.totalorder %s2744_s9, %s4009_s4 }
 0x4ba   : > { %v590_v10 = vpop.trf.xlu1 }
 0x4bb   : > { %610 = vperm.xlu1 %2635, %v590_v10   ;;  %v1732_v10 = vld [vmem:[%s360_s10] sm:$0x3]  ;;  %s2333_s10 = scalar_lea.sflag [#allocation6], %s2960_s22 }
 0x4c2   : > { %v3072_v11 = vpop.trf.xlu1 }
 0x52d   : > { %v611_v13 = vpop.permute.xlu1 %610 }
 0x52e   : > { %v619_v14 = vmul.f32 %v618_v12, %v611_v13 }
 0x530   : > { %v621_v16 = vsub.f32 %v606_v15, %v619_v14 }
 0x532   : > { %623 = vst.msk [vmem:[%s2975_s23] sm:$0xff] %vm4057_vm0, %v621_v16 }
 0x539   : > { %v625_v17 = vld [vmem:[%s2975_s23 + $0x3] sm:$0x1] }
 0x53a   : > { %v627_v18 = vadd.f32 %v625_v17, %v2988_v3  ;;  %v687_v41 = vld [vmem:[%s2975_s23] sm:$0xff] }
 0x53c   : > { %v628_v19 = vsel %vm4018_vm11, %v627_v18, 0.0 }
 0x53d   : > { %v629_v20 = vsel %vm4058_vm2, %v628_v19, 0.0 }
 0x53e   : > { %630 = vadd.xlane.f32.xlu2 %v629_v20 }
 0x5b1   : > { %v3086_v22 = vpop.xlane.xlu2 %630 }
 0x5b2   : > { %vm636_vm12 = vcmp.gt.f32.partialorder %v3086_v22, 0.0 }
 0x5b3   : > { %v637_v24 = vsel %vm636_vm12, %v3086_v22, 1.0 }
 0x5b4   : > { %2660 = vrsqrt.f32 %v637_v24  ;;  %vm644_vm3 = vweird.f32 %v637_v24 }
 0x5ba   : > { %v2661_v25 = vpop.eup %2660 }
 0x5bb   : > { %v639_v26 = vmul.f32 %v2661_v25, %v637_v24  ;;  %vm645_vm13 = vweird.f32 %v2661_v25 }
 0x5bc   : > { %vm646_vm4 = vmor %vm644_vm3, %vm645_vm13 }
 0x5bd   : > { %v640_v27 = vmul.f32 %v2661_v25, %v639_v26 }
 0x5bf   : > { %v641_v28 = vmul.f32 0.5, %v640_v27 }
 0x5c1   : > { %v642_v29 = vsub.f32 1.5, %v641_v28 }
 0x5c3   : > { %v643_v30 = vmul.f32 %v2661_v25, %v642_v29  ;;  %v2638_v29 = vld [vmem:[#allocation3] ss:$0 sm:$0xff] }
 0x5c5   : > { %v647_v31 = vsel %vm646_vm4, %v2661_v25, %v643_v30 }
 0x5c6   : > { %v648_v33 = vmul.f32 %v647_v31, %v637_v24  ;;  %v650_v34 = vmul.f32 %v647_v31, %v625_v17  ;;  %654 = vst.msk [vmem:[#allocation3 + $0x3] sm:$0x1] %vm410_vm6, %v647_v31 }
 0x5c8   : > { %v651_v35 = vsel %vm4013_vm5, %v650_v34, 0.0  ;;  %vm4014_vm5 = vcmp.gt.s32.totalorder %v2985_v2, 4 }
 0x5c9   : > { %v3096_v36 = vsel %vm4018_vm11, %v648_v33, %v651_v35  ;;  %v1740_v35 = vld [vmem:[#allocation2] sm:$0x1] }
 0x5ca   : > { %655 = vxpose.xlu2.b32.start.end [1/1] (short) (narrow) %v3096_v36, 16  ;;  %653 = vst.msk [vmem:[#allocation2 + $0x3] sm:$0x1] %vm4058_vm2, %v3096_v36  ;;  %v699_v38 = vperm.slane %v3096_v36, 0 }
 0x663   : > { %v671_v37 = vpop.trf.xlu2 }
 0x664   : > { %691 = vperm.xlu0 %2637, %v671_v37  }
 0x66b   : > { %v3113_v50 = vpop.trf.xlu2 }
 0x6d6   : > { %v692_v39 = vpop.permute.xlu0 %691 }
 0x6d7   : > { %v700_v40 = vmul.f32 %v699_v38, %v692_v39 }
 0x6d9   : > { %v702_v42 = vsub.f32 %v687_v41, %v700_v40  ;;  %v3163_v40 = vsel %vm405_vm8, %v1740_v35, 0.0  ;;  %vm811_vm8 = vcmp.gt.s32.totalorder %v2985_v2, 5 }
 0x6da   : > { %4074 = vst [vmem:[#allocation15_spill] sm:$0xff] %v3163_v40 }
 0x6db   : > { %704 = vst.msk [vmem:[%s2975_s23] sm:$0xff] %vm4057_vm0, %v702_v42  ;;  %v4023_v42 = vperm.slane %v3163_v40, 0 }
 0x6e2   : > { %v706_v43 = vld [vmem:[%s2975_s23 + $0x4] sm:$0x1] }
 0x6e3   : > { %v708_v45 = vadd.f32 %v706_v43, %v2988_v3  ;;  %v768_v20 = vld [vmem:[%s2975_s23] sm:$0xff] }
 0x6e5   : > { %v709_v48 = vsel %vm4019_vm7, %v708_v45, 0.0 }
 0x6e6   : > { %v710_v49 = vsel %vm4058_vm2, %v709_v48, 0.0 }
 0x6e7   : > { %711 = vadd.xlane.f32.xlu2 %v710_v49 }
 0x75a   : > { %v3115_v51 = vpop.xlane.xlu2 %711 }
 0x75b   : > { %vm717_vm12 = vcmp.gt.f32.partialorder %v3115_v51, 0.0 }
 0x75c   : > { %v718_v52 = vsel %vm717_vm12, %v3115_v51, 1.0  ;;  %vm4056_vm12 = vcmask 123904  }
 0x75d   : > { %2662 = vrsqrt.f32 %v718_v52  ;;  %vm725_vm3 = vweird.f32 %v718_v52 }
 0x763   : > { %v2663_v53 = vpop.eup %2662 }
 0x764   : > { %v720_v54 = vmul.f32 %v2663_v53, %v718_v52  ;;  %vm726_vm13 = vweird.f32 %v2663_v53 }
 0x765   : > { %vm727_vm4 = vmor %vm725_vm3, %vm726_vm13  ;;  %vm4020_vm13 = vcmp.eq.s32.totalorder %v2985_v2, 5 }
 0x766   : > { %v721_v55 = vmul.f32 %v2663_v53, %v720_v54 }
 0x768   : > { %v722_v58 = vmul.f32 0.5, %v721_v55 }
 0x76a   : > { %v723_v59 = vsub.f32 1.5, %v722_v58 }
 0x76c   : > { %v724_v60 = vmul.f32 %v2663_v53, %v723_v59 }
 0x76e   : > { %v728_v61 = vsel %vm727_vm4, %v2663_v53, %v724_v60 }
 0x76f   : > { %v729_v62 = vmul.f32 %v728_v61, %v718_v52  ;;  %v731_v63 = vmul.f32 %v728_v61, %v706_v43  ;;  %735 = vst.msk [vmem:[#allocation3 + $0x4] sm:$0x1] %vm410_vm6, %v728_v61 }
 0x771   : > { %v732_v0 = vsel %vm4014_vm5, %v731_v63, 0.0 }
 0x772   : > { %v3125_v1 = vsel %vm4019_vm7, %v729_v62, %v732_v0  ;;  %v2639_v0 = vld [vmem:[#allocation3 + $0x1] ss:$0 sm:$0xff] }
 0x773   : > { %736 = vxpose.xlu1.b32.start.end [1/1] (short) (narrow) %v3125_v1, 16  ;;  %734 = vst.msk [vmem:[#allocation2 + $0x4] sm:$0x1] %vm4058_vm2, %v3125_v1  ;;  %v780_v17 = vperm.slane %v3125_v1, 0 }
 0x7d5   : > { %1736 = vperm.xlu1 %2635, %v1733_v4  }
 0x817   : > { %v752_v5 = vpop.trf.xlu1 }
 0x818   : > { %772 = vperm.xlu0 %2637, %v752_v5  }
 0x81f   : > { %v3134_v6 = vpop.trf.xlu1 }
 0x847   : > { %v1737_v13 = vpop.permute.xlu1 %1736 }
 0x848   : > { %v3139_v14 = vsub.f32 %v1732_v10, %v1737_v13  ;;  %v1761_v13 = vld [vmem:[#allocation2 + $0x1] sm:$0x1] }
 0x84a   : > { %4073 = vst [vmem:[#allocation14_spill] sm:$0xff] %v3139_v14  ;;  %v1744_v15 = vsel %vm4015_vm1, %v3139_v14, 0.0 }
 0x84b   : > { %v1746_v16 = vsel %vm4056_vm12, %v1744_v15, 0.0  ;;  %v3187_v15 = vsel %vm487_vm14, %v1761_v13, 0.0  ;;  %vm4021_vm14 = vcmp.eq.s32.totalorder %v2985_v2, 6 }
 0x84c   : > { %1747 = vadd.xlane.f32.xlu2 %v1746_v16  ;;  %4075 = vst [vmem:[#allocation16_spill] sm:$0xff] %v3187_v15  ;;  %v4024_v16 = vperm.slane %v3187_v15, 0 }
 0x88a   : > { %v773_v18 = vpop.permute.xlu0 %772 }
 0x88b   : > { %v781_v19 = vmul.f32 %v780_v17, %v773_v18 }
 0x88d   : > { %v783_v24 = vsub.f32 %v768_v20, %v781_v19 }
 0x88f   : > { %785 = vst.msk [vmem:[%s2975_s23] sm:$0xff] %vm4057_vm0, %v783_v24 }
 0x896   : > { %v787_v25 = vld [vmem:[%s2975_s23 + $0x5] sm:$0x1] }
 0x897   : > { %v789_v26 = vadd.f32 %v787_v25, %v2988_v3 }
 0x899   : > { %v790_v27 = vsel %vm4020_vm13, %v789_v26, 0.0 }
 0x89a   : > { %v791_v28 = vsel %vm4058_vm2, %v790_v27, 0.0 }
 0x89b   : > { %792 = vadd.xlane.f32.xlu0 %v791_v28 }
 0x8bf   : > { %v1748_v30 = vpop.xlane.xlu2 %1747 }
 0x8c0   : > { %v1750_v31 = vmul.f32 %v2638_v29, %v1748_v30 }
 0x8c2   : > { %1754 = vperm.xlu2 %2636, %v1750_v31   ;;  %v849_v31 = vld [vmem:[%s2975_s23] sm:$0xff] }
 0x90e   : > { %v3157_v33 = vpop.xlane.xlu0 %792 }
 0x90f   : > { %vm798_vm3 = vcmp.gt.f32.partialorder %v3157_v33, 0.0 }
 0x910   : > { %v799_v34 = vsel %vm798_vm3, %v3157_v33, 1.0 }
 0x911   : > { %2664 = vrsqrt.f32 %v799_v34  ;;  %vm806_vm3 = vweird.f32 %v799_v34 }
 0x917   : > { %v2665_v37 = vpop.eup %2664 }
 0x918   : > { %v801_v39 = vmul.f32 %v2665_v37, %v799_v34  ;;  %vm807_vm4 = vweird.f32 %v2665_v37 }
 0x919   : > { %vm808_vm5 = vmor %vm806_vm3, %vm807_vm4 }
 0x91a   : > { %v802_v41 = vmul.f32 %v2665_v37, %v801_v39 }
 0x91c   : > { %v803_v43 = vmul.f32 0.5, %v802_v41  ;;  %v1755_v45 = vpop.permute.xlu2 %1754 }
 0x91d   : > { %v1758_v48 = vmul.f32 %v4023_v42, %v1755_v45 }
 0x91e   : > { %v804_v49 = vsub.f32 1.5, %v803_v43  ;;  %v2640_v43 = vld [vmem:[#allocation3 + $0x2] ss:$0 sm:$0xff] }
 0x91f   : > { %v1759_v52 = vsub.f32 %v3139_v14, %v1758_v48 }
 0x920   : > { %v805_v53 = vmul.f32 %v2665_v37, %v804_v49 }
 0x921   : > { %v1760_v54 = vsel %vm4015_vm1, %v1755_v45, %v1759_v52 }
 0x922   : > { %v809_v55 = vsel %vm808_vm5, %v2665_v37, %v805_v53  ;;  %v1765_v58 = vsel %vm4016_vm9, %v1760_v54, 0.0 }
 0x923   : > { %v810_v59 = vmul.f32 %v809_v55, %v799_v34  ;;  %816 = vst.msk [vmem:[#allocation3 + $0x5] sm:$0x1] %vm410_vm6, %v809_v55  ;;  %v1766_v60 = vsel %vm4056_vm12, %v1765_v58, 0.0  ;;  %v812_v61 = vmul.f32 %v809_v55, %v787_v25 }
 0x924   : > { %1767 = vadd.xlane.f32.xlu1 %v1766_v60 }
 0x925   : > { %v813_v62 = vsel %vm811_vm8, %v812_v61, 0.0 }
 0x926   : > { %v3180_v63 = vsel %vm4020_vm13, %v810_v59, %v813_v62 }
 0x927   : > { %817 = vxpose.xlu0.b32.start.end [1/1] (short) (narrow) %v3180_v63, 16  ;;  %815 = vst.msk [vmem:[#allocation2 + $0x5] sm:$0x1] %vm4058_vm2, %v3180_v63  ;;  %v861_v28 = vperm.slane %v3180_v63, 0 }
 0x997   : > { %v1768_v4 = vpop.xlane.xlu1 %1767 }
 0x998   : > { %v1770_v5 = vmul.f32 %v2639_v0, %v1768_v4  ;;  %v1781_v4 = vld [vmem:[#allocation2 + $0x2] sm:$0x1] }
 0x99a   : > { %1774 = vperm.xlu1 %2635, %v1770_v5   ;;  %v3228_v5 = vsel %vm568_vm10, %v1781_v4, 0.0  ;;  %vm4022_vm10 = vcmp.eq.s32.totalorder %v2985_v2, 7 }
 0x9cb   : > { %v833_v10 = vpop.trf.xlu0 }
 0x9cc   : > { %853 = vperm.xlu0 %2637, %v833_v10   ;;  %v4025_v10 = vperm.slane %v3228_v5, 0 }
 0x9d3   : > { %v834_v27 = vpop.trf.xlu0 }
 0xa0c   : > { %v1775_v18 = vpop.permute.xlu1 %1774 }
 0xa0d   : > { %v1778_v19 = vmul.f32 %v4024_v16, %v1775_v18 }
 0xa0f   : > { %v1779_v20 = vsub.f32 %v1760_v54, %v1778_v19 }
 0xa11   : > { %v1780_v24 = vsel %vm4016_vm9, %v1775_v18, %v1779_v20  ;;  %vm892_vm9 = vcmp.gt.s32.totalorder %v2985_v2, 6 }
 0xa12   : > { %v1785_v25 = vsel %vm4017_vm15, %v1780_v24, 0.0 }
 0xa13   : > { %v1786_v26 = vsel %vm4056_vm12, %v1785_v25, 0.0 }
 0xa14   : > { %1787 = vadd.xlane.f32.xlu1 %v1786_v26 }
 0xa3e   : > { %v854_v29 = vpop.permute.xlu0 %853 }
 0xa3f   : > { %v862_v30 = vmul.f32 %v861_v28, %v854_v29  ;;  %v2641_v29 = vld [vmem:[#allocation3 + $0x3] ss:$0 sm:$0xff] }
 0xa41   : > { %v864_v34 = vsub.f32 %v849_v31, %v862_v30 }
 0xa43   : > { %866 = vst.msk [vmem:[%s2975_s23] sm:$0xff] %vm4057_vm0, %v864_v34 }
 0xa4a   : > { %v868_v35 = vld [vmem:[%s2975_s23 + $0x6] sm:$0x1] }
 0xa4b   : > { %v870_v37 = vadd.f32 %v868_v35, %v2988_v3 }
 0xa4d   : > { %v871_v39 = vsel %vm4021_vm14, %v870_v37, 0.0 }
 0xa4e   : > { %v872_v41 = vsel %vm4058_vm2, %v871_v39, 0.0 }
 0xa4f   : > { %873 = vadd.xlane.f32.xlu2 %v872_v41 }
 0xa87   : > { %v1788_v45 = vpop.xlane.xlu1 %1787 }
 0xa88   : > { %v1790_v48 = vmul.f32 %v2640_v43, %v1788_v45 }
 0xa8a   : > { %1794 = vperm.xlu0 %2637, %v1790_v48  }
 0xa92   : > { %615 = vperm.xlu0 %2637, %v3072_v11  }
 0xa9a   : > { %777 = vperm.xlu0 %2637, %v3134_v6  }
 0xac2   : > { %v3211_v49 = vpop.xlane.xlu2 %873 }
 0xac3   : > { %vm879_vm5 = vcmp.gt.f32.partialorder %v3211_v49, 0.0 }
 0xac4   : > { %v880_v52 = vsel %vm879_vm5, %v3211_v49, 1.0 }
 0xac5   : > { %2666 = vrsqrt.f32 %v880_v52  ;;  %vm887_vm3 = vweird.f32 %v880_v52 }
 0xacb   : > { %v2667_v53 = vpop.eup %2666 }
 0xacc   : > { %v882_v54 = vmul.f32 %v2667_v53, %v880_v52  ;;  %vm888_vm4 = vweird.f32 %v2667_v53 }
 0xacd   : > { %vm889_vm1 = vmor %vm887_vm3, %vm888_vm4 }
 0xace   : > { %v883_v55 = vmul.f32 %v2667_v53, %v882_v54 }
 0xad0   : > { %v884_v58 = vmul.f32 0.5, %v883_v55  ;;  %v1801_v55 = vld [vmem:[#allocation2 + $0x3] sm:$0x1] }
 0xad2   : > { %v885_v59 = vsub.f32 1.5, %v884_v58 }
 0xad4   : > { %v886_v60 = vmul.f32 %v2667_v53, %v885_v59 }
 0xad6   : > { %v890_v61 = vsel %vm889_vm1, %v2667_v53, %v886_v60  ;;  %vm4076_vm1 = vcmp.gt.s32.totalorder %v2985_v2, 3 }
 0xad7   : > { %v891_v11 = vmul.f32 %v890_v61, %v880_v52  ;;  %v893_v6 = vmul.f32 %v890_v61, %v868_v35  ;;  %897 = vst.msk [vmem:[#allocation3 + $0x6] sm:$0x1] %vm410_vm6, %v890_v61  ;;  %v378_v35 = vld [vmem:[%s2964_s16 + $0x8] sm:$0xff]  ;;  %s2745_s16 = scalar_lea.hbm %s2744_s9, 16 }
 0xad8   : > { %381 = vst.msk [vmem:[%s2975_s23 + $0x8] sm:$0xff] %vm4057_vm0, %v378_v35  ;;  %v2642_v35 = vld [vmem:[#allocation3 + $0x4] ss:$0 sm:$0xff]  ;;  %p2746_p6 = scmp.ne.s32.totalorder %s2744_s9, %s2745_s16  ;;  %p2751_p3 = scmp.lt.s32.totalorder %s2749_s0, %s2745_s16 }
 0xad9   : > { %v894_v62 = vsel %vm892_vm9, %v893_v6, 0.0 }
 0xada   : > { %v3221_v0 = vsel %vm4021_vm14, %v891_v11, %v894_v62  ;;  %p2747_p13 = pnand %p2746_p6, %p2924_p11  ;;  %p2752_p4 = por %p2751_p3, %p2750_p1 }
 0xadb   : > { %898 = vxpose.xlu2.b32.start.end [1/1] (short) (narrow) %v3221_v0, 16  ;;  %896 = vst.msk [vmem:[#allocation2 + $0x6] sm:$0x1] %vm4058_vm2, %v3221_v0 }
 0xadc   : > { %p2748_p0 = pneg %p2747_p13 }
 0xade   : > { %p2753_p7 = pnand %p2752_p4, %p2748_p0 }
 0xafc   : > { %v1795_v13 = vpop.permute.xlu0 %1794 }
 0xafd   : > { %v1798_v18 = vmul.f32 %v4025_v10, %v1795_v13 }
 0xaff   : > { %v1799_v19 = vsub.f32 %v1780_v24, %v1798_v18  ;;  %v942_v18 = vperm.slane %v3221_v0, 0 }
 0xb01   : > { %v1800_v20 = vsel %vm4017_vm15, %v1795_v13, %v1799_v19  ;;  %v930_v19 = vld [vmem:[%s2975_s23] sm:$0xff]  ;;  %vm973_vm15 = vcmp.gt.s32.totalorder %v2985_v2, 7 }
 0xb02   : > { %v1805_v25 = vsel %vm4018_vm11, %v1800_v20, 0.0 }
 0xb03   : > { %v1806_v26 = vsel %vm4056_vm12, %v1805_v25, 0.0 }
 0xb04   : > { %1807 = vadd.xlane.f32.xlu1 %v1806_v26  ;;  %v616_v45 = vpop.permute.xlu0 %615 }
 0xb05   : > { %v620_v48 = vmul.f32 %v618_v12, %v616_v45  ;;  %v3268_v12 = vsel %vm4076_vm1, %v1801_v55, 0.0 }
 0xb06   : > { %v4026_v36 = vperm.slane %v3268_v12, 0 }
 0xb0c   : > { %v778_v54 = vpop.permute.xlu0 %777 }
 0xb0d   : > { %v782_v7 = vmul.f32 %v780_v17, %v778_v54 }
 0xb1d   : > { %534 = vperm.xlu1 %2635, %v3041_v46   ;;  %v445_v46 = vld [vmem:[%s2975_s23 + $0x8] sm:$0xff] }
 0xb25   : > { %696 = vperm.xlu1 %2635, %v3113_v50  }
 0xb2d   : > { %858 = vperm.xlu1 %2635, %v834_v27  }
 0xb4c   : > { %453 = vperm.xlu2 %2636, %v3055_v56  }
 0xb74   : > { %v914_v24 = vpop.trf.xlu2 }
 0xb75   : > { %934 = vperm.xlu0 %2637, %v914_v24  }
 0xb77   : > { %v1808_v30 = vpop.xlane.xlu1 %1807 }
 0xb78   : > { %v1810_v31 = vmul.f32 %v2641_v29, %v1808_v30 }
 0xb7a   : > { %1814 = vperm.xlu2 %2636, %v1810_v31  }
 0xb7c   : > { %v915_v34 = vpop.trf.xlu2 }
 0xb7d   : > { %939 = vperm.xlu1 %2635, %v915_v34  }
 0xb8f   : > { %v535_v37 = vpop.permute.xlu1 %534 }
 0xb90   : > { %v539_v39 = vmul.f32 %v537_v47, %v535_v37 }
 0xb97   : > { %v697_v52 = vpop.permute.xlu1 %696 }
 0xb98   : > { %v701_v53 = vmul.f32 %v699_v38, %v697_v52 }
 0xb9f   : > { %v859_v61 = vpop.permute.xlu1 %858 }
 0xba0   : > { %v863_v17 = vmul.f32 %v861_v28, %v859_v61 }
 0xba6   : > { %v454_v50 = vpop.permute.xlu2 %453 }
 0xba7   : > { %v458_v56 = vmul.f32 %v456_v23, %v454_v50 }
 0xba9   : > { %v460_v27 = vsub.f32 %v445_v46, %v458_v56 }
 0xbab   : > { %462 = vst.msk [vmem:[%s2975_s23 + $0x8] sm:$0xff] %vm4057_vm0, %v460_v27 }
 0xbb2   : > { %v526_v41 = vld [vmem:[%s2975_s23 + $0x8] sm:$0xff] }
 0xbb3   : > { %v541_v43 = vsub.f32 %v526_v41, %v539_v39 }
 0xbb5   : > { %543 = vst.msk [vmem:[%s2975_s23 + $0x8] sm:$0xff] %vm4057_vm0, %v541_v43 }
 0xbbc   : > { %v607_v21 = vld [vmem:[%s2975_s23 + $0x8] sm:$0xff] }
 0xbbd   : > { %v622_v23 = vsub.f32 %v607_v21, %v620_v48 }
 0xbbf   : > { %624 = vst.msk [vmem:[%s2975_s23 + $0x8] sm:$0xff] %vm4057_vm0, %v622_v23 }
 0xbc6   : > { %v688_v44 = vld [vmem:[%s2975_s23 + $0x8] sm:$0xff] }
 0xbc7   : > { %v703_v47 = vsub.f32 %v688_v44, %v701_v53 }
 0xbc9   : > { %705 = vst.msk [vmem:[%s2975_s23 + $0x8] sm:$0xff] %vm4057_vm0, %v703_v47  ;;  %v1821_v47 = vld [vmem:[#allocation2 + $0x4] sm:$0x1] }
 0xbd0   : > { %v769_v58 = vld [vmem:[%s2975_s23 + $0x8] sm:$0xff] }
 0xbd1   : > { %v784_v59 = vsub.f32 %v769_v58, %v782_v7 }
 0xbd3   : > { %786 = vst.msk [vmem:[%s2975_s23 + $0x8] sm:$0xff] %vm4057_vm0, %v784_v59 }
 0xbd4   : > { %v1815_v38 = vpop.permute.xlu2 %1814 }
 0xbd5   : > { %v1818_v60 = vmul.f32 %v4026_v36, %v1815_v38 }
 0xbd7   : > { %v1819_v1 = vsub.f32 %v1800_v20, %v1818_v60 }
 0xbd9   : > { %v1820_v11 = vsel %vm4018_vm11, %v1815_v38, %v1819_v1  ;;  %v2643_v1 = vld [vmem:[#allocation3 + $0x5] ss:$0 sm:$0xff] }
 0xbda   : > { %v1825_v6 = vsel %vm4019_vm7, %v1820_v11, 0.0  ;;  %v850_v62 = vld [vmem:[%s2975_s23 + $0x8] sm:$0xff] }
 0xbdb   : > { %v1826_v4 = vsel %vm4056_vm12, %v1825_v6, 0.0  ;;  %v865_v13 = vsub.f32 %v850_v62, %v863_v17 }
 0xbdc   : > { %1827 = vadd.xlane.f32.xlu2 %v1826_v4 }
 0xbdd   : > { %867 = vst.msk [vmem:[%s2975_s23 + $0x8] sm:$0xff] %vm4057_vm0, %v865_v13 }
 0xbe4   : > { %v931_v24 = vld [vmem:[%s2975_s23 + $0x8] sm:$0xff] }
 0xbe7   : > { %v935_v63 = vpop.permute.xlu0 %934 }
 0xbe8   : > { %v943_v28 = vmul.f32 %v942_v18, %v935_v63 }
 0xbea   : > { %v945_v20 = vsub.f32 %v930_v19, %v943_v28 }
 0xbec   : > { %947 = vst.msk [vmem:[%s2975_s23] sm:$0xff] %vm4057_vm0, %v945_v20 }
 0xbef   : > { %v940_v25 = vpop.permute.xlu1 %939 }
 0xbf0   : > { %v944_v26 = vmul.f32 %v942_v18, %v940_v25 }
 0xbf2   : > { %v946_v29 = vsub.f32 %v931_v24, %v944_v26 }
 0xbf3   : > { %v949_v30 = vld [vmem:[%s2975_s23 + $0x7] sm:$0x1] }
 0xbf4   : > { %948 = vst.msk [vmem:[%s2975_s23 + $0x8] sm:$0xff] %vm4057_vm0, %v946_v29  ;;  %v951_v31 = vadd.f32 %v949_v30, %v2988_v3 }
 0xbf6   : > { %v952_v0 = vsel %vm4022_vm10, %v951_v31, 0.0 }
 0xbf7   : > { %v953_v34 = vsel %vm4058_vm2, %v952_v0, 0.0 }
 0xbf8   : > { %954 = vadd.xlane.f32.xlu0 %v953_v34 }
 0xbfb   : > { %v1012_v63 = vld [vmem:[%s2975_s23 + $0x8] sm:$0xff] }
 0xc4f   : > { %v1828_v46 = vpop.xlane.xlu2 %1827 }
 0xc50   : > { %v1830_v50 = vmul.f32 %v2642_v35, %v1828_v46 }
 0xc52   : > { %1834 = vperm.xlu2 %2636, %v1830_v50  }
 0xc6b   : > { %v3299_v56 = vpop.xlane.xlu0 %954 }
 0xc6c   : > { %vm960_vm5 = vcmp.gt.f32.partialorder %v3299_v56, 0.0 }
 0xc6d   : > { %v961_v27 = vsel %vm960_vm5, %v3299_v56, 1.0  ;;  %vm4077_vm5 = vcmp.gt.s32.totalorder %v2985_v2, 4 }
 0xc6e   : > { %2668 = vrsqrt.f32 %v961_v27  ;;  %vm968_vm3 = vweird.f32 %v961_v27  ;;  %v3316_v54 = vsel %vm4077_vm5, %v1821_v47, 0.0 }
 0xc6f   : > { %v4034_v55 = vperm.slane %v3316_v54, 0 }
 0xc74   : > { %v2669_v37 = vpop.eup %2668 }
 0xc75   : > { %v963_v39 = vmul.f32 %v2669_v37, %v961_v27  ;;  %vm969_vm4 = vweird.f32 %v2669_v37 }
 0xc76   : > { %vm970_vm1 = vmor %vm968_vm3, %vm969_vm4  ;;  %vm4050_vm4 = vcmp.eq.s32.totalorder %v2985_v2, 8 }
 0xc77   : > { %v964_v41 = vmul.f32 %v2669_v37, %v963_v39 }
 0xc79   : > { %v965_v43 = vmul.f32 0.5, %v964_v41 }
 0xc7b   : > { %v966_v45 = vsub.f32 1.5, %v965_v43 }
 0xc7d   : > { %v967_v48 = vmul.f32 %v2669_v37, %v966_v45 }
 0xc7f   : > { %v971_v21 = vsel %vm970_vm1, %v2669_v37, %v967_v48 }
 0xc80   : > { %v972_v23 = vmul.f32 %v971_v21, %v961_v27  ;;  %978 = vst.msk [vmem:[#allocation3 + $0x7] sm:$0x1] %vm410_vm6, %v971_v21  ;;  %v974_v52 = vmul.f32 %v971_v21, %v949_v30 }
 0xc82   : > { %v975_v53 = vsel %vm973_vm15, %v974_v52, 0.0  ;;  %v1841_v52 = vld [vmem:[#allocation2 + $0x5] sm:$0x1] }
 0xc83   : > { %v3309_v44 = vsel %vm4022_vm10, %v972_v23, %v975_v53 }
 0xc84   : > { %979 = vxpose.xlu0.b32.start.end [1/1] (short) (narrow) %v3309_v44, 16  ;;  %977 = vst.msk [vmem:[#allocation2 + $0x7] sm:$0x1] %vm4058_vm2, %v3309_v44  ;;  %v4032_v4 = vperm.slane %v3309_v44, 0 }
 0xcac   : > { %v1835_v7 = vpop.permute.xlu2 %1834 }
 0xcad   : > { %v1838_v58 = vmul.f32 %v4034_v55, %v1835_v7 }
 0xcaf   : > { %v1839_v59 = vsub.f32 %v1820_v11, %v1838_v58 }
 0xcb1   : > { %v3323_v38 = vsel %vm4019_vm7, %v1835_v7, %v1839_v59  ;;  %vm1054_vm7 = vcmp.gt.s32.totalorder %v2985_v2, 8  ;;  %v3366_v7 = vsel %vm811_vm8, %v1841_v52, 0.0 }
 0xcb2   : > { %v1845_v60 = vsel %vm4020_vm13, %v3323_v38, 0.0  ;;  %v4035_v59 = vperm.slane %v3366_v7, 0 }
 0xcb3   : > { %v1846_v61 = vsel %vm4056_vm12, %v1845_v60, 0.0 }
 0xcb4   : > { %1847 = vadd.xlane.f32.xlu2 %v1846_v61 }
 0xd27   : > { %v1848_v17 = vpop.xlane.xlu2 %1847 }
 0xd28   : > { %v1850_v6 = vmul.f32 %v2643_v1, %v1848_v17  ;;  %v3329_v62 = vpop.trf.xlu0 }
 0xd2a   : > { %1854 = vperm.xlu2 %2636, %v1850_v6  }
 0xd30   : > { %v996_v11 = vpop.trf.xlu0 }
 0xd31   : > { %1020 = vperm.xlu0 %2637, %v996_v11  }
 0xd84   : > { %v1855_v58 = vpop.permute.xlu2 %1854 }
 0xd85   : > { %v1858_v60 = vmul.f32 %v4035_v59, %v1855_v58 }
 0xd87   : > { %v1859_v17 = vsub.f32 %v3323_v38, %v1858_v60  ;;  %v2644_v38 = vld [vmem:[#allocation3 + $0x6] ss:$0 sm:$0xff] }
 0xda3   : > { %v1021_v13 = vpop.permute.xlu0 %1020 }
 0xda4   : > { %v1025_v18 = vmul.f32 %v4032_v4, %v1021_v13  ;;  %v1860_v13 = vsel %vm4020_vm13, %v1855_v58, %v1859_v17  ;;  %vm1135_vm13 = vcmp.gt.s32.totalorder %v2985_v2, 9 }
 0xda6   : > { %v1027_v28 = vsub.f32 %v1012_v63, %v1025_v18  ;;  %v1865_v18 = vsel %vm4021_vm14, %v1860_v13, 0.0 }
 0xda7   : > { %v1866_v63 = vsel %vm4056_vm12, %v1865_v18, 0.0 }
 0xda8   : > { %1029 = vst.msk [vmem:[%s2975_s23 + $0x8] sm:$0xff] %vm4057_vm0, %v1027_v28 }
 0xdaf   : > { %v1030_v19 = vld [vmem:[%s2975_s23 + $0x8] sm:$0x1] }
 0xdb0   : > { %v1032_v20 = vadd.f32 %v1030_v19, %v2988_v3  ;;  %v1093_v53 = vld [vmem:[%s2975_s23 + $0x8] sm:$0xff] }
 0xdb2   : > { %v1033_v25 = vsel %vm4050_vm4, %v1032_v20, 0.0 }
 0xdb3   : > { %v1034_v26 = vsel %vm4058_vm2, %v1033_v25, 0.0 }
 0xdb4   : > { %1035 = vadd.xlane.f32.xlu1 %v1034_v26 }
 0xe27   : > { %v3343_v24 = vpop.xlane.xlu1 %1035 }
 0xe28   : > { %vm1041_vm3 = vcmp.gt.f32.partialorder %v3343_v24, 0.0 }
 0xe29   : > { %v1042_v29 = vsel %vm1041_vm3, %v3343_v24, 1.0 }
 0xe2a   : > { %2670 = vrsqrt.f32 %v1042_v29  ;;  %vm1049_vm5 = vweird.f32 %v1042_v29 }
 0xe30   : > { %v2671_v30 = vpop.eup %2670 }
 0xe31   : > { %v1044_v31 = vmul.f32 %v2671_v30, %v1042_v29  ;;  %vm1050_vm1 = vweird.f32 %v2671_v30 }
 0xe32   : > { %vm1051_vm11 = vmor %vm1049_vm5, %vm1050_vm1 }
 0xe33   : > { %v1045_v0 = vmul.f32 %v2671_v30, %v1044_v31 }
 0xe35   : > { %v1046_v34 = vmul.f32 0.5, %v1045_v0 }
 0xe37   : > { %v1047_v35 = vsub.f32 1.5, %v1046_v34 }
 0xe39   : > { %v1048_v46 = vmul.f32 %v2671_v30, %v1047_v35 }
 0xe3b   : > { %v1052_v50 = vsel %vm1051_vm11, %v2671_v30, %v1048_v46  ;;  %vm4051_vm11 = vcmp.eq.s32.totalorder %v2985_v2, 9 }
 0xe3c   : > { %v1053_v27 = vmul.f32 %v1052_v50, %v1042_v29  ;;  %1059 = vst.msk [vmem:[#allocation3 + $0x8] sm:$0x1] %vm410_vm6, %v1052_v50  ;;  %v1055_v37 = vmul.f32 %v1052_v50, %v1030_v19 }
 0xe3e   : > { %v1056_v39 = vsel %vm1054_vm7, %v1055_v37, 0.0  ;;  %v1861_v37 = vld [vmem:[#allocation2 + $0x6] sm:$0x1] }
 0xe3f   : > { %v3353_v41 = vsel %vm4050_vm4, %v1053_v27, %v1056_v39  ;;  %v3402_v39 = vsel %vm892_vm9, %v1861_v37, 0.0  ;;  %vm4033_vm9 = vcmp.eq.s32.totalorder %v2985_v2, 10 }
 0xe40   : > { %1060 = vxpose.xlu1.b32.start.end [1/1] (short) (narrow) %v3353_v41, 16  ;;  %1058 = vst.msk [vmem:[#allocation2 + $0x8] sm:$0x1] %vm4058_vm2, %v3353_v41  ;;  %v4031_v48 = vperm.slane %v3353_v41, 0 }
 0xee4   : > { %v3358_v43 = vpop.trf.xlu1 }
 0xeec   : > { %v1077_v45 = vpop.trf.xlu1 }
 0xeed   : > { %1101 = vperm.xlu1 %2635, %v1077_v45  }
 0xf5f   : > { %v1102_v21 = vpop.permute.xlu1 %1101 }
 0xf60   : > { %v1106_v23 = vmul.f32 %v4031_v48, %v1102_v21  ;;  %v4036_v21 = vperm.slane %v3402_v39, 0 }
 0xf62   : > { %v1108_v47 = vsub.f32 %v1093_v53, %v1106_v23 }
 0xf64   : > { %1110 = vst.msk [vmem:[%s2975_s23 + $0x8] sm:$0xff] %vm4057_vm0, %v1108_v47 }
 0xf6b   : > { %v1111_v61 = vld [vmem:[%s2975_s23 + $0x9] sm:$0x1] }
 0xf6c   : > { %v1113_v1 = vadd.f32 %v1111_v61, %v2988_v3 }
 0xf6e   : > { %v1114_v6 = vsel %vm4051_vm11, %v1113_v1, 0.0  ;;  %v2645_v1 = vld [vmem:[#allocation3 + $0x7] ss:$0 sm:$0xff] }
 0xf6f   : > { %v1115_v11 = vsel %vm4058_vm2, %v1114_v6, 0.0 }
 0xf70   : > { %1116 = vadd.xlane.f32.xlu0 %v1115_v11 }
 0xf78   : > { %1867 = vadd.xlane.f32.xlu0 %v1866_v63  ;;  %v1174_v63 = vld [vmem:[%s2975_s23 + $0x8] sm:$0xff] }
 0xfe3   : > { %v3385_v28 = vpop.xlane.xlu0 %1116 }
 0xfe4   : > { %vm1122_vm8 = vcmp.gt.f32.partialorder %v3385_v28, 0.0 }
 0xfe5   : > { %v1123_v3 = vsel %vm1122_vm8, %v3385_v28, 1.0 }
 0xfe6   : > { %2672 = vrsqrt.f32 %v1123_v3  ;;  %vm1130_vm1 = vweird.f32 %v1123_v3 }
 0xfeb   : > { %v1868_v19 = vpop.xlane.xlu0 %1867 }
 0xfec   : > { %v2673_v20 = vpop.eup %2672  ;;  %v1870_v25 = vmul.f32 %v2644_v38, %v1868_v19  ;;  %v3423_v19 = vld [vmem:[%s2983_s12] sm:$0x1]  ;;  %s3945_s12 = scalar_lea.vmem [#allocation8], %s2565_s8 }
 0xfed   : > { %v1125_v26 = vmul.f32 %v2673_v20, %v1123_v3  ;;  %vm1131_vm3 = vweird.f32 %v2673_v20 }
 0xfee   : > { %1874 = vperm.xlu1 %2635, %v1870_v25   ;;  %vm1132_vm5 = vmor %vm1130_vm1, %vm1131_vm3 }
 0xfef   : > { %v1126_v29 = vmul.f32 %v2673_v20, %v1125_v26 }
 0xff1   : > { %v1127_v30 = vmul.f32 0.5, %v1126_v29 }
 0xff3   : > { %v1128_v31 = vsub.f32 1.5, %v1127_v30 }
 0xff5   : > { %v1129_v0 = vmul.f32 %v2673_v20, %v1128_v31 }
 0xff7   : > { %v1133_v34 = vsel %vm1132_vm5, %v2673_v20, %v1129_v0 }
 0xff8   : > { %v1134_v35 = vmul.f32 %v1133_v34, %v1123_v3  ;;  %1140 = vst.msk [vmem:[#allocation3 + $0x9] sm:$0x1] %vm410_vm6, %v1133_v34  ;;  %v1136_v46 = vmul.f32 %v1133_v34, %v1111_v61 }
 0xffa   : > { %v1137_v50 = vsel %vm1135_vm13, %v1136_v46, 0.0 }
 0xffb   : > { %v3395_v27 = vsel %vm4051_vm11, %v1134_v35, %v1137_v50 }
 0xffc   : > { %1141 = vxpose.xlu2.b32.start.end [1/1] (short) (narrow) %v3395_v27, 16  ;;  %1139 = vst.msk [vmem:[#allocation2 + $0x9] sm:$0x1] %vm4058_vm2, %v3395_v27  ;;  %v4029_v11 = vperm.slane %v3395_v27, 0 }
0x1060   : > { %v1875_v45 = vpop.permute.xlu1 %1874 }
0x1061   : > { %v1878_v23 = vmul.f32 %v4036_v21, %v1875_v45 }
0x1063   : > { %v1879_v52 = vsub.f32 %v1860_v13, %v1878_v23 }
0x1065   : > { %v1880_v53 = vsel %vm4021_vm14, %v1875_v45, %v1879_v52  ;;  %vm1216_vm14 = vcmp.gt.s32.totalorder %v2985_v2, 10 }
0x1066   : > { %v1885_v47 = vsel %vm4022_vm10, %v1880_v53, 0.0 }
0x1067   : > { %v1886_v58 = vsel %vm4056_vm12, %v1885_v47, 0.0 }
0x1075   : > { %1887 = vadd.xlane.f32.xlu2 %v1886_v58 }
0x1095   : > { %v3412_v60 = vpop.trf.xlu2 }
0x109d   : > { %v1158_v61 = vpop.trf.xlu2 }
0x109e   : > { %1182 = vperm.xlu0 %2637, %v1158_v61  }
0x10e8   : > { %v1888_v17 = vpop.xlane.xlu2 %1887 }
0x10e9   : > { %v1890_v6 = vmul.f32 %v2645_v1, %v1888_v17  ;;  %v1881_v17 = vld [vmem:[#allocation2 + $0x7] sm:$0x1] }
0x10eb   : > { %1894 = vperm.xlu1 %2635, %v1890_v6   ;;  %v3448_v6 = vsel %vm973_vm15, %v1881_v17, 0.0  ;;  %vm4052_vm15 = vcmp.eq.s32.totalorder %v2985_v2, 11 }
0x1110   : > { %v1183_v13 = vpop.permute.xlu0 %1182 }
0x1111   : > { %v1187_v18 = vmul.f32 %v4029_v11, %v1183_v13  ;;  %v4037_v13 = vperm.slane %v3448_v6, 0 }
0x1113   : > { %v1189_v3 = vsub.f32 %v1174_v63, %v1187_v18 }
0x1115   : > { %1191 = vst.msk [vmem:[%s2975_s23 + $0x8] sm:$0xff] %vm4057_vm0, %v1189_v3 }
0x111c   : > { %v1192_v38 = vld [vmem:[%s2975_s23 + $0xa] sm:$0x1] }
0x111d   : > { %v1194_v20 = vadd.f32 %v3423_v19, %v1192_v38 }
0x111f   : > { %v1195_v25 = vsel %vm4033_vm9, %v1194_v20, 0.0 }
0x1120   : > { %v1196_v26 = vsel %vm4058_vm2, %v1195_v25, 0.0 }
0x1121   : > { %1197 = vadd.xlane.f32.xlu0 %v1196_v26 }
0x115d   : > { %v1895_v58 = vpop.permute.xlu1 %1894 }
0x115e   : > { %v1898_v18 = vmul.f32 %v4037_v13, %v1895_v58 }
0x1160   : > { %v1899_v63 = vsub.f32 %v1880_v53, %v1898_v18 }
0x1162   : > { %v1900_v3 = vsel %vm4022_vm10, %v1895_v58, %v1899_v63  ;;  %vm1297_vm10 = vcmp.gt.s32.totalorder %v2985_v2, 11 }
0x1194   : > { %v3429_v29 = vpop.xlane.xlu0 %1197 }
0x1195   : > { %vm1203_vm8 = vcmp.gt.f32.partialorder %v3429_v29, 0.0 }
0x1196   : > { %v1204_v30 = vsel %vm1203_vm8, %v3429_v29, 1.0 }
0x1197   : > { %2674 = vrsqrt.f32 %v1204_v30  ;;  %vm1211_vm1 = vweird.f32 %v1204_v30 }
0x119d   : > { %v2675_v31 = vpop.eup %2674 }
0x119e   : > { %v1206_v0 = vmul.f32 %v2675_v31, %v1204_v30  ;;  %vm1212_vm3 = vweird.f32 %v2675_v31 }
0x119f   : > { %vm1213_vm5 = vmor %vm1211_vm1, %vm1212_vm3 }
0x11a0   : > { %v1207_v34 = vmul.f32 %v2675_v31, %v1206_v0 }
0x11a2   : > { %v1208_v35 = vmul.f32 0.5, %v1207_v34 }
0x11a4   : > { %v1209_v46 = vsub.f32 1.5, %v1208_v35 }
0x11a6   : > { %v1210_v50 = vmul.f32 %v2675_v31, %v1209_v46 }
0x11a8   : > { %v1214_v37 = vsel %vm1213_vm5, %v2675_v31, %v1210_v50  ;;  %v1255_v31 = vld [vmem:[%s2975_s23 + $0x8] sm:$0xff] }
0x11a9   : > { %v1215_v45 = vmul.f32 %v1214_v37, %v1204_v30  ;;  %1221 = vst.msk [vmem:[#allocation3 + $0xa] sm:$0x1] %vm410_vm6, %v1214_v37  ;;  %v1217_v23 = vmul.f32 %v1214_v37, %v1192_v38  ;;  %v1905_v38 = vsel %vm4050_vm4, %v1900_v3, 0.0  ;;  %v3470_v50 = vld [vmem:[#allocation3 + $0x8] ss:$0 sm:$0xff] }
0x11aa   : > { %v1906_v20 = vsel %vm4056_vm12, %v1905_v38, 0.0 }
0x11ab   : > { %v1218_v52 = vsel %vm1216_vm14, %v1217_v23, 0.0 }
0x11ac   : > { %v3439_v47 = vsel %vm4033_vm9, %v1215_v45, %v1218_v52 }
0x11ad   : > { %1222 = vxpose.xlu1.b32.start.end [1/1] (short) (narrow) %v3439_v47, 16  ;;  %1220 = vst.msk [vmem:[#allocation2 + $0xa] sm:$0x1] %vm4058_vm2, %v3439_v47  ;;  %v4028_v25 = vperm.slane %v3439_v47, 0 }
0x1251   : > { %v3444_v61 = vpop.trf.xlu1 }
0x1259   : > { %v1239_v1 = vpop.trf.xlu1 }
0x125a   : > { %1263 = vperm.xlu0 %2637, %v1239_v1  }
0x1284   : > { %1907 = vadd.xlane.f32.xlu0 %v1906_v20 }
0x12cc   : > { %v1264_v26 = vpop.permute.xlu0 %1263 }
0x12cd   : > { %v1268_v30 = vmul.f32 %v4028_v25, %v1264_v26 }
0x12cf   : > { %v1270_v0 = vsub.f32 %v1255_v31, %v1268_v30  ;;  %v1901_v31 = vld [vmem:[#allocation2 + $0x8] sm:$0x1] }
0x12d1   : > { %1272 = vst.msk [vmem:[%s2975_s23 + $0x8] sm:$0xff] %vm4057_vm0, %v1270_v0 }
0x12d8   : > { %v1273_v53 = vld [vmem:[%s2975_s23 + $0xb] sm:$0x1] }
0x12d9   : > { %v1275_v34 = vadd.f32 %v3423_v19, %v1273_v53 }
0x12db   : > { %v1276_v35 = vsel %vm4052_vm15, %v1275_v34, 0.0 }
0x12dc   : > { %v1277_v46 = vsel %vm4058_vm2, %v1276_v35, 0.0  ;;  %v3487_v35 = vsel %vm1054_vm7, %v1901_v31, 0.0  ;;  %v1921_v31 = vld [vmem:[#allocation2 + $0x9] sm:$0x1]  ;;  %vm4054_vm7 = vcmp.eq.s32.totalorder %v2985_v2, 12 }
0x12dd   : > { %1278 = vadd.xlane.f32.xlu1 %v1277_v46  ;;  %v4038_v46 = vperm.slane %v3487_v35, 0 }
0x12f7   : > { %v1908_v37 = vpop.xlane.xlu0 %1907 }
0x12f8   : > { %v1910_v45 = vmul.f32 %v3470_v50, %v1908_v37 }
0x12fa   : > { %1914 = vperm.xlu0 %2637, %v1910_v45  }
0x1350   : > { %v3473_v23 = vpop.xlane.xlu1 %1278 }
0x1351   : > { %vm1284_vm8 = vcmp.gt.f32.partialorder %v3473_v23, 0.0 }
0x1352   : > { %v1285_v52 = vsel %vm1284_vm8, %v3473_v23, 1.0 }
0x1353   : > { %2676 = vrsqrt.f32 %v1285_v52  ;;  %vm1292_vm1 = vweird.f32 %v1285_v52 }
0x1359   : > { %v2677_v58 = vpop.eup %2676 }
0x135a   : > { %v1287_v1 = vmul.f32 %v2677_v58, %v1285_v52  ;;  %vm1293_vm3 = vweird.f32 %v2677_v58 }
0x135b   : > { %vm1294_vm5 = vmor %vm1292_vm1, %vm1293_vm3 }
0x135c   : > { %v1288_v17 = vmul.f32 %v2677_v58, %v1287_v1 }
0x135e   : > { %v1289_v18 = vmul.f32 0.5, %v1288_v17 }
0x1360   : > { %v1290_v63 = vsub.f32 1.5, %v1289_v18 }
0x1362   : > { %v1291_v38 = vmul.f32 %v2677_v58, %v1290_v63 }
0x1364   : > { %v1295_v20 = vsel %vm1294_vm5, %v2677_v58, %v1291_v38  ;;  %v3502_v38 = vld [vmem:[#allocation3 + $0x9] ss:$0 sm:$0xff]  ;;  %vm1378_vm5 = vcmp.gt.s32.totalorder %v2985_v2, 12 }
0x1365   : > { %v1296_v26 = vmul.f32 %v1295_v20, %v1285_v52  ;;  %1302 = vst.msk [vmem:[#allocation3 + $0xb] sm:$0x1] %vm410_vm6, %v1295_v20  ;;  %v1298_v30 = vmul.f32 %v1295_v20, %v1273_v53 }
0x1367   : > { %v1299_v0 = vsel %vm1297_vm10, %v1298_v30, 0.0 }
0x1368   : > { %v3483_v34 = vsel %vm4052_vm15, %v1296_v26, %v1299_v0  ;;  %v1336_v0 = vld [vmem:[%s2975_s23 + $0x8] sm:$0xff] }
0x1369   : > { %1301 = vst.msk [vmem:[#allocation2 + $0xb] sm:$0x1] %vm4058_vm2, %v3483_v34  ;;  %1303 = vxpose.xlu0.b32.start.end [1/1] (short) (narrow) %v3483_v34, 16  ;;  %v4027_v20 = vperm.slane %v3483_v34, 0 }
0x136c   : > { %v1915_v53 = vpop.permute.xlu0 %1914 }
0x136d   : > { %v1918_v37 = vmul.f32 %v4038_v46, %v1915_v53 }
0x136f   : > { %v1919_v45 = vsub.f32 %v1900_v3, %v1918_v37  ;;  %v3511_v37 = vsel %vm1135_vm13, %v1921_v31, 0.0 }
0x1371   : > { %v1920_v52 = vsel %vm4050_vm4, %v1915_v53, %v1919_v45  ;;  %v4039_v45 = vperm.slane %v3511_v37, 0 }
0x1372   : > { %v1925_v58 = vsel %vm4051_vm11, %v1920_v52, 0.0 }
0x1373   : > { %v1926_v1 = vsel %vm4056_vm12, %v1925_v58, 0.0 }
0x1374   : > { %1927 = vadd.xlane.f32.xlu2 %v1926_v1 }
0x13e7   : > { %v1928_v63 = vpop.xlane.xlu2 %1927 }
0x13e8   : > { %v1930_v3 = vmul.f32 %v3502_v38, %v1928_v63 }
0x140d   : > { %v3500_v17 = vpop.trf.xlu0 }
0x1415   : > { %v1320_v18 = vpop.trf.xlu0 }
0x1416   : > { %1344 = vperm.xlu2 %2636, %v1320_v18  }
0x141e   : > { %1934 = vperm.xlu2 %2636, %v1930_v3  }
0x1470   : > { %v1345_v26 = vpop.permute.xlu2 %1344 }
0x1471   : > { %v1349_v30 = vmul.f32 %v4027_v20, %v1345_v26 }
0x1473   : > { %v1351_v53 = vsub.f32 %v1336_v0, %v1349_v30 }
0x1475   : > { %1353 = vst.msk [vmem:[%s2975_s23 + $0x8] sm:$0xff] %vm4057_vm0, %v1351_v53 }
0x1478   : > { %v1935_v58 = vpop.permute.xlu2 %1934 }
0x1479   : > { %v1938_v1 = vmul.f32 %v4039_v45, %v1935_v58 }
0x147b   : > { %v1939_v18 = vsub.f32 %v1920_v52, %v1938_v1  ;;  %v3529_v52 = vld [vmem:[#allocation3 + $0xa] ss:$0 sm:$0xff] }
0x147c   : > { %v1354_v63 = vld [vmem:[%s2975_s23 + $0xc] sm:$0x1] }
0x147d   : > { %v1940_v3 = vsel %vm4051_vm11, %v1935_v58, %v1939_v18  ;;  %v1356_v26 = vadd.f32 %v3423_v19, %v1354_v63  ;;  %v1417_v25 = vld [vmem:[%s2975_s23 + $0x8] sm:$0xff] }
0x147e   : > { %v1945_v30 = vsel %vm4033_vm9, %v1940_v3, 0.0 }
0x147f   : > { %v1946_v31 = vsel %vm4056_vm12, %v1945_v30, 0.0  ;;  %v1357_v0 = vsel %vm4054_vm7, %v1356_v26, 0.0 }
0x1480   : > { %1947 = vadd.xlane.f32.xlu2 %v1946_v31  ;;  %v1358_v53 = vsel %vm4058_vm2, %v1357_v0, 0.0 }
0x1481   : > { %1359 = vadd.xlane.f32.xlu0 %v1358_v53 }
0x14f3   : > { %v1948_v1 = vpop.xlane.xlu2 %1947 }
0x14f4   : > { %v1950_v42 = vmul.f32 %v3529_v52, %v1948_v1  ;;  %v3532_v58 = vpop.xlane.xlu0 %1359 }
0x14f5   : > { %vm1365_vm13 = vcmp.gt.f32.partialorder %v3532_v58, 0.0 }
0x14f6   : > { %v1366_v18 = vsel %vm1365_vm13, %v3532_v58, 1.0  ;;  %1954 = vperm.xlu1 %2635, %v1950_v42  }
0x14f7   : > { %2678 = vrsqrt.f32 %v1366_v18  ;;  %vm1373_vm3 = vweird.f32 %v1366_v18 }
0x14fd   : > { %v2679_v30 = vpop.eup %2678 }
0x14fe   : > { %v1368_v16 = vmul.f32 %v2679_v30, %v1366_v18  ;;  %vm1374_vm8 = vweird.f32 %v2679_v30 }
0x14ff   : > { %vm1375_vm1 = vmor %vm1373_vm3, %vm1374_vm8 }
0x1500   : > { %v1369_v26 = vmul.f32 %v2679_v30, %v1368_v16 }
0x1502   : > { %v1370_v31 = vmul.f32 0.5, %v1369_v26 }
0x1504   : > { %v1371_v10 = vsub.f32 1.5, %v1370_v31 }
0x1506   : > { %v1372_v0 = vmul.f32 %v2679_v30, %v1371_v10 }
0x1508   : > { %v1376_v53 = vsel %vm1375_vm1, %v2679_v30, %v1372_v0 }
0x1509   : > { %v1377_v1 = vmul.f32 %v1376_v53, %v1366_v18  ;;  %1383 = vst.msk [vmem:[#allocation3 + $0xc] sm:$0x1] %vm410_vm6, %v1376_v53  ;;  %v1379_v36 = vmul.f32 %v1376_v53, %v1354_v63  ;;  %v1941_v63 = vld [vmem:[#allocation2 + $0xa] sm:$0x1] }
0x150b   : > { %v1380_v42 = vsel %vm1378_vm5, %v1379_v36, 0.0  ;;  %v3551_v36 = vsel %vm1216_vm14, %v1941_v63, 0.0  ;;  %vm4053_vm14 = vcmp.eq.s32.totalorder %v2985_v2, 13 }
0x150c   : > { %v3542_v20 = vsel %vm4054_vm7, %v1377_v1, %v1380_v42  ;;  %v4041_v30 = vperm.slane %v3551_v36, 0 }
0x150d   : > { %1382 = vst.msk [vmem:[#allocation2 + $0xc] sm:$0x1] %vm4058_vm2, %v3542_v20  ;;  %v4030_v42 = vperm.slane %v3542_v20, 0 }
0x152b   : > { %1384 = vxpose.xlu1.b32.start.end [1/1] (short) (narrow) %v3542_v20, 16 }
0x1568   : > { %v1955_v16 = vpop.permute.xlu1 %1954 }
0x1569   : > { %v1958_v26 = vmul.f32 %v4041_v30, %v1955_v16 }
0x156b   : > { %v1959_v31 = vsub.f32 %v1940_v3, %v1958_v26 }
0x156d   : > { %v1960_v0 = vsel %vm4033_vm9, %v1955_v16, %v1959_v31  ;;  %vm1459_vm9 = vcmp.gt.s32.totalorder %v2985_v2, 13 }
0x156e   : > { %v1965_v53 = vsel %vm4052_vm15, %v1960_v0, 0.0 }
0x156f   : > { %v1966_v1 = vsel %vm4056_vm12, %v1965_v53, 0.0  ;;  %v3573_v53 = vld [vmem:[#allocation3 + $0xb] ss:$0 sm:$0xff] }
0x15cf   : > { %v3547_v10 = vpop.trf.xlu1 }
0x15d7   : > { %v1401_v18 = vpop.trf.xlu1 }
0x15d8   : > { %1425 = vperm.xlu2 %2636, %v1401_v18  }
0x1601   : > { %1967 = vadd.xlane.f32.xlu2 %v1966_v1 }
0x1632   : > { %v1426_v18 = vpop.permute.xlu2 %1425 }
0x1633   : > { %v1430_v63 = vmul.f32 %v4030_v42, %v1426_v18 }
0x1635   : > { %v1432_v11 = vsub.f32 %v1417_v25, %v1430_v63 }
0x1637   : > { %1434 = vst.msk [vmem:[%s2975_s23 + $0x8] sm:$0xff] %vm4057_vm0, %v1432_v11 }
0x163e   : > { %v1435_v3 = vld [vmem:[%s2975_s23 + $0xd] sm:$0x1] }
0x163f   : > { %v1437_v16 = vadd.f32 %v3423_v19, %v1435_v3  ;;  %v1498_v21 = vld [vmem:[%s2975_s23 + $0x8] sm:$0xff] }
0x1641   : > { %v1438_v26 = vsel %vm4053_vm14, %v1437_v16, 0.0 }
0x1642   : > { %v1439_v31 = vsel %vm4058_vm2, %v1438_v26, 0.0 }
0x1643   : > { %1440 = vadd.xlane.f32.xlu2 %v1439_v31 }
0x1674   : > { %v1968_v1 = vpop.xlane.xlu2 %1967 }
0x1675   : > { %v1970_v18 = vmul.f32 %v3573_v53, %v1968_v1 }
0x1677   : > { %1974 = vperm.xlu1 %2635, %v1970_v18  }
0x16b6   : > { %v3576_v25 = vpop.xlane.xlu2 %1440 }
0x16b7   : > { %vm1446_vm13 = vcmp.gt.f32.partialorder %v3576_v25, 0.0 }
0x16b8   : > { %v1447_v11 = vsel %vm1446_vm13, %v3576_v25, 1.0 }
0x16b9   : > { %2680 = vrsqrt.f32 %v1447_v11  ;;  %vm1454_vm3 = vweird.f32 %v1447_v11 }
0x16bf   : > { %v2681_v63 = vpop.eup %2680 }
0x16c0   : > { %v1449_v42 = vmul.f32 %v2681_v63, %v1447_v11  ;;  %vm1455_vm8 = vweird.f32 %v2681_v63 }
0x16c1   : > { %vm1456_vm1 = vmor %vm1454_vm3, %vm1455_vm8 }
0x16c2   : > { %v1450_v48 = vmul.f32 %v2681_v63, %v1449_v42 }
0x16c4   : > { %v1451_v16 = vmul.f32 0.5, %v1450_v48 }
0x16c6   : > { %v1452_v4 = vsub.f32 1.5, %v1451_v16 }
0x16c8   : > { %v1453_v26 = vmul.f32 %v2681_v63, %v1452_v4  ;;  %v1961_v4 = vld [vmem:[#allocation2 + $0xb] sm:$0x1] }
0x16c9   : > { %v3593_v48 = vsel %vm1297_vm10, %v1961_v4, 0.0  ;;  %v3605_v4 = vld [vmem:[#allocation3 + $0xc] ss:$0 sm:$0xff]  ;;  %vm4055_vm10 = vcmp.eq.s32.totalorder %v2985_v2, 14 }
0x16ca   : > { %v1457_v31 = vsel %vm1456_vm1, %v2681_v63, %v1453_v26  ;;  %v4042_v42 = vperm.slane %v3593_v48, 0  ;;  %vm1540_vm1 = vcmp.gt.s32.totalorder %v2985_v2, 14 }
0x16cb   : > { %v1458_v1 = vmul.f32 %v1457_v31, %v1447_v11  ;;  %1464 = vst.msk [vmem:[#allocation3 + $0xd] sm:$0x1] %vm410_vm6, %v1457_v31  ;;  %v1460_v18 = vmul.f32 %v1457_v31, %v1435_v3 }
0x16cd   : > { %v1461_v55 = vsel %vm1459_vm9, %v1460_v18, 0.0 }
0x16ce   : > { %v3586_v59 = vsel %vm4053_vm14, %v1458_v1, %v1461_v55 }
0x16cf   : > { %1465 = vxpose.xlu0.b32.start.end [1/1] (short) (narrow) %v3586_v59, 16  ;;  %1463 = vst.msk [vmem:[#allocation2 + $0xd] sm:$0x1] %vm4058_vm2, %v3586_v59 }
0x16e9   : > { %v1975_v3 = vpop.permute.xlu1 %1974 }
0x16ea   : > { %v1978_v11 = vmul.f32 %v4042_v42, %v1975_v3 }
0x16ec   : > { %v1979_v63 = vsub.f32 %v1960_v0, %v1978_v11 }
0x16ee   : > { %v1980_v55 = vsel %vm4052_vm15, %v1975_v3, %v1979_v63  ;;  %v4040_v3 = vperm.slane %v3586_v59, 0  ;;  %vm632_vm15 = vcmp.le.f32.partialorder %v3086_v22, 0.0 }
0x16ef   : > { %v1985_v16 = vsel %vm4054_vm7, %v1980_v55, 0.0 }
0x16f0   : > { %v1986_v26 = vsel %vm4056_vm12, %v1985_v16, 0.0  ;;  %v1981_v16 = vld [vmem:[#allocation2 + $0xc] sm:$0x1] }
0x16f1   : > { %1987 = vadd.xlane.f32.xlu2 %v1986_v26  ;;  %v3614_v13 = vsel %vm1378_vm5, %v1981_v16, 0.0 }
0x1764   : > { %v1988_v18 = vpop.xlane.xlu2 %1987 }
0x1765   : > { %v1990_v0 = vmul.f32 %v3605_v4, %v1988_v18 }
0x1773   : > { %v3603_v31 = vpop.trf.xlu0 }
0x177b   : > { %v1482_v1 = vpop.trf.xlu0 }
0x177c   : > { %1506 = vperm.xlu2 %2636, %v1482_v1   ;;  %v4043_v1 = vperm.slane %v3614_v13, 0 }
0x1784   : > { %1994 = vperm.xlu2 %2636, %v1990_v0  }
0x17d6   : > { %v1507_v11 = vpop.permute.xlu2 %1506 }
0x17d7   : > { %v1511_v63 = vmul.f32 %v4040_v3, %v1507_v11 }
0x17d9   : > { %v1513_v26 = vsub.f32 %v1498_v21, %v1511_v63 }
0x17db   : > { %1515 = vst.msk [vmem:[%s2975_s23 + $0x8] sm:$0xff] %vm4057_vm0, %v1513_v26 }
0x17de   : > { %v1995_v46 = vpop.permute.xlu2 %1994 }
0x17df   : > { %v1998_v18 = vmul.f32 %v4043_v1, %v1995_v46 }
0x17e1   : > { %v1999_v0 = vsub.f32 %v1980_v55, %v1998_v18  ;;  %v3632_v55 = vld [vmem:[#allocation3 + $0xd] ss:$0 sm:$0xff] }
0x17e2   : > { %v1516_v45 = vld [vmem:[%s2975_s23 + $0xe] sm:$0x1] }
0x17e3   : > { %v2000_v11 = vsel %vm4054_vm7, %v1995_v46, %v1999_v0  ;;  %v1518_v21 = vadd.f32 %v3423_v19, %v1516_v45 }
0x17e4   : > { %v2005_v63 = vsel %vm4053_vm14, %v2000_v11, 0.0 }
0x17e5   : > { %v2006_v16 = vsel %vm4056_vm12, %v2005_v63, 0.0  ;;  %v1519_v26 = vsel %vm4055_vm10, %v1518_v21, 0.0 }
0x17e6   : > { %2007 = vadd.xlane.f32.xlu2 %v2006_v16  ;;  %v1520_v3 = vsel %vm4058_vm2, %v1519_v26, 0.0 }
0x17e7   : > { %1521 = vadd.xlane.f32.xlu0 %v1520_v3 }
0x1859   : > { %v2008_v18 = vpop.xlane.xlu2 %2007 }
0x185a   : > { %v2010_v30 = vmul.f32 %v3632_v55, %v2008_v18  ;;  %v3635_v46 = vpop.xlane.xlu0 %1521 }
0x185b   : > { %vm1527_vm5 = vcmp.gt.f32.partialorder %v3635_v46, 0.0 }
0x185c   : > { %v1528_v0 = vsel %vm1527_vm5, %v3635_v46, 1.0  ;;  %2014 = vperm.xlu1 %2635, %v2010_v30   ;;  %vm390_vm5 = vcmp.le.f32.partialorder %v2997_v9, 0.0 }
0x185d   : > { %2682 = vrsqrt.f32 %v1528_v0  ;;  %vm1535_vm8 = vweird.f32 %v1528_v0 }
0x1863   : > { %v2683_v63 = vpop.eup %2682 }
0x1864   : > { %v1530_v42 = vmul.f32 %v2683_v63, %v1528_v0  ;;  %vm1536_vm13 = vweird.f32 %v2683_v63 }
0x1865   : > { %vm1537_vm3 = vmor %vm1535_vm8, %vm1536_vm13  ;;  %vm470_vm13 = vcmp.le.f32.partialorder %v3025_v32, 0.0 }
0x1866   : > { %v1531_v21 = vmul.f32 %v2683_v63, %v1530_v42  ;;  %v2001_v42 = vld [vmem:[#allocation2 + $0xd] sm:$0x1]  ;;  %vm2568_vm8 = vmneg %vm390_vm5 }
0x1868   : > { %v1532_v16 = vmul.f32 0.5, %v1531_v21 }
0x186a   : > { %v1533_v1 = vsub.f32 1.5, %v1532_v16 }
0x186c   : > { %v1534_v3 = vmul.f32 %v2683_v63, %v1533_v1  ;;  %v3652_v1 = vsel %vm1459_vm9, %v2001_v42, 0.0  ;;  %vm1598_vm9 = vcmp.eq.s32.totalorder %v2985_v2, 15 }
0x186e   : > { %v1538_v26 = vsel %vm1537_vm3, %v2683_v63, %v1534_v3  ;;  %vm472_vm3 = vmand %vm470_vm13, %vm2568_vm8  ;;  %vm794_vm13 = vcmp.le.f32.partialorder %v3157_v33, 0.0 }
0x186f   : > { %v1539_v18 = vmul.f32 %v1538_v26, %v1528_v0  ;;  %1545 = vst.msk [vmem:[#allocation3 + $0xe] sm:$0x1] %vm410_vm6, %v1538_v26  ;;  %v1541_v8 = vmul.f32 %v1538_v26, %v1516_v45  ;;  %v4046_v0 = vperm.slane %v3652_v1, 0 }
0x1871   : > { %v1542_v30 = vsel %vm1540_vm1, %v1541_v8, 0.0 }
0x1872   : > { %v3645_v14 = vsel %vm4055_vm10, %v1539_v18, %v1542_v30 }
0x1873   : > { %1544 = vst.msk [vmem:[#allocation2 + $0xe] sm:$0x1] %vm4058_vm2, %v3645_v14 }
0x1876   : > { %v3664_v30 = vld [vmem:[#allocation3 + $0xe] ss:$0 sm:$0xff] }
0x1891   : > { %1546 = vxpose.xlu1.b32.start.end [1/1] (short) (narrow) %v3645_v14, 16 }
0x18ce   : > { %v2015_v45 = vpop.permute.xlu1 %2014 }
0x18cf   : > { %v2018_v8 = vmul.f32 %v4046_v0, %v2015_v45  ;;  %v1579_v0 = vld [vmem:[%s2975_s23 + $0x8] sm:$0xff] }
0x18d1   : > { %v2019_v63 = vsub.f32 %v2000_v11, %v2018_v8 }
0x18d3   : > { %v2020_v21 = vsel %vm4053_vm14, %v2015_v45, %v2019_v63  ;;  %v4049_v45 = vperm.slane %v3645_v14, 0 }
0x18d4   : > { %v2025_v16 = vsel %vm4055_vm10, %v2020_v21, 0.0 }
0x18d5   : > { %v2026_v3 = vsel %vm4056_vm12, %v2025_v16, 0.0 }
0x18d6   : > { %2027 = vadd.xlane.f32.xlu2 %v2026_v3  ;;  %v2021_v3 = vld [vmem:[#allocation2 + $0xe] sm:$0x1] }
0x1935   : > { %v3662_v26 = vpop.trf.xlu1 }
0x193d   : > { %v1563_v18 = vpop.trf.xlu1 }
0x193e   : > { %1587 = vperm.xlu2 %2636, %v1563_v18   ;;  %v3675_v18 = vsel %vm1540_vm1, %v2021_v3, 0.0  ;;  %vm551_vm1 = vcmp.le.f32.partialorder %v3057_v57, 0.0 }
0x1949   : > { %v2028_v42 = vpop.xlane.xlu2 %2027 }
0x194a   : > { %v2030_v11 = vmul.f32 %v3664_v30, %v2028_v42  ;;  %v2037_v42 = vperm.slane %v3675_v18, 0 }
0x194c   : > { %2034 = vperm.xlu2 %2636, %v2030_v11  }
0x1998   : > { %v1588_v8 = vpop.permute.xlu2 %1587 }
0x1999   : > { %v1592_v63 = vmul.f32 %v4049_v45, %v1588_v8 }
0x199b   : > { %v1594_v16 = vsub.f32 %v1579_v0, %v1592_v63 }
0x199d   : > { %1596 = vst.msk [vmem:[%s2975_s23 + $0x8] sm:$0xff] %vm4057_vm0, %v1594_v16 }
0x19a4   : > { %v3678_v40 = vld [vmem:[%s2975_s23 + $0xf] sm:$0x1] }
0x19a5   : > { %v1599_v11 = vadd.f32 %v3423_v19, %v3678_v40 }
0x19a6   : > { %v2035_v15 = vpop.permute.xlu2 %2034 }
0x19a7   : > { %v2038_v0 = vmul.f32 %v2037_v42, %v2035_v15  ;;  %v1600_v8 = vsel %vm1598_vm9, %v1599_v11, 0.0  ;;  %v4078_v11 = vmov 0  }
0x19a8   : > { %v1601_v63 = vsel %vm4058_vm2, %v1600_v8, 0.0 }
0x19a9   : > { %v2039_v16 = vsub.f32 %v2020_v21, %v2038_v0  ;;  %1602 = vadd.xlane.f32.xlu2 %v1601_v63  ;;  %v391_v21 = vsel %vm390_vm5, 1, %v4078_v11 }
0x19aa   : > { %v473_v0 = vsel %vm472_vm3, 2, %v391_v21  ;;  %vm875_vm3 = vcmp.le.f32.partialorder %v3211_v49, 0.0 }
0x19ab   : > { %v3691_v3 = vsel %vm4055_vm10, %v2035_v15, %v2039_v16  ;;  %vm552_vm4 = vcmp.eq.s32.totalorder %v473_v0, 0  ;;  %vm713_vm10 = vcmp.le.f32.partialorder %v3115_v51, 0.0 }
0x19ac   : > { %v2045_v45 = vsel %vm1598_vm9, %v3691_v3, 0.0  ;;  %vm553_vm11 = vmand %vm551_vm1, %vm552_vm4 }
0x19ad   : > { %v2046_v19 = vsel %vm4056_vm12, %v2045_v45, 0.0  ;;  %v554_v15 = vsel %vm553_vm11, 3, %v473_v0  ;;  %vm956_vm11 = vcmp.le.f32.partialorder %v3299_v56, 0.0 }
0x19ae   : > { %2047 = vadd.xlane.f32.xlu1 %v2046_v19  ;;  %vm633_vm14 = vcmp.eq.s32.totalorder %v554_v15, 0 }
0x19af   : > { %vm634_vm7 = vmand %vm632_vm15, %vm633_vm14 }
0x19b0   : > { %v635_v45 = vsel %vm634_vm7, 4, %v554_v15  ;;  %vm1037_vm7 = vcmp.le.f32.partialorder %v3343_v24, 0.0 }
0x19b1   : > { %vm714_vm12 = vcmp.eq.s32.totalorder %v635_v45, 0 }
0x19b2   : > { %vm715_vm0 = vmand %vm713_vm10, %vm714_vm12 }
0x19b3   : > { %v716_v9 = vsel %vm715_vm0, 5, %v635_v45  ;;  %vm1118_vm0 = vcmp.le.f32.partialorder %v3385_v28, 0.0 }
0x19b4   : > { %vm795_vm8 = vcmp.eq.s32.totalorder %v716_v9, 0 }
0x19b5   : > { %vm796_vm5 = vmand %vm794_vm13, %vm795_vm8  ;;  %vm1199_vm8 = vcmp.le.f32.partialorder %v3429_v29, 0.0 }
0x19b6   : > { %v797_v32 = vsel %vm796_vm5, 6, %v716_v9 }
0x19b7   : > { %vm876_vm2 = vcmp.eq.s32.totalorder %v797_v32, 0 }
0x19b8   : > { %vm877_vm4 = vmand %vm875_vm3, %vm876_vm2  ;;  %vm1280_vm3 = vcmp.le.f32.partialorder %v3473_v23, 0.0 }
0x19b9   : > { %v878_v57 = vsel %vm877_vm4, 7, %v797_v32 }
0x19ba   : > { %vm957_vm1 = vcmp.eq.s32.totalorder %v878_v57, 0 }
0x19bb   : > { %vm958_vm15 = vmand %vm956_vm11, %vm957_vm1  ;;  %vm1361_vm1 = vcmp.le.f32.partialorder %v3532_v58, 0.0 }
0x19bc   : > { %v959_v22 = vsel %vm958_vm15, 8, %v878_v57 }
0x19bd   : > { %vm1038_vm14 = vcmp.eq.s32.totalorder %v959_v22, 0 }
0x19be   : > { %vm1039_vm12 = vmand %vm1037_vm7, %vm1038_vm14  ;;  %vm1442_vm14 = vcmp.le.f32.partialorder %v3576_v25, 0.0 }
0x19bf   : > { %v1040_v51 = vsel %vm1039_vm12, 9, %v959_v22 }
0x19c0   : > { %vm1119_vm10 = vcmp.eq.s32.totalorder %v1040_v51, 0 }
0x19c1   : > { %vm1120_vm13 = vmand %vm1118_vm0, %vm1119_vm10  ;;  %vm1523_vm10 = vcmp.le.f32.partialorder %v3635_v46, 0.0 }
0x19c2   : > { %v1121_v33 = vsel %vm1120_vm13, 10, %v1040_v51 }
0x19c3   : > { %vm1200_vm5 = vcmp.eq.s32.totalorder %v1121_v33, 0 }
0x19c4   : > { %vm1201_vm2 = vmand %vm1199_vm8, %vm1200_vm5 }
0x19c5   : > { %v1202_v49 = vsel %vm1201_vm2, 11, %v1121_v33 }
0x19c6   : > { %vm1281_vm4 = vcmp.eq.s32.totalorder %v1202_v49, 0 }
0x19c7   : > { %vm1282_vm11 = vmand %vm1280_vm3, %vm1281_vm4 }
0x19c8   : > { %v1283_v56 = vsel %vm1282_vm11, 12, %v1202_v49 }
0x19c9   : > { %vm1362_vm15 = vcmp.eq.s32.totalorder %v1283_v56, 0 }
0x19ca   : > { %vm1363_vm7 = vmand %vm1361_vm1, %vm1362_vm15 }
0x19cb   : > { %v1364_v24 = vsel %vm1363_vm7, 13, %v1283_v56  ;;  %vm1621_vm7 = vcmp.gt.s32.totalorder %v2985_v2, 15 }
0x19cc   : > { %vm1443_vm12 = vcmp.eq.s32.totalorder %v1364_v24, 0 }
0x19cd   : > { %vm1444_vm0 = vmand %vm1442_vm14, %vm1443_vm12  ;;  %vm4079_vm14 = vcmask 122880   ;;  %vm4080_vm12 = vcmask 130048  }
0x19ce   : > { %v1445_v28 = vsel %vm1444_vm0, 14, %v1364_v24  ;;  %vm4081_vm0 = vcmask 123904  }
0x19cf   : > { %vm1524_vm13 = vcmp.eq.s32.totalorder %v1445_v28, 0 }
0x19d0   : > { %vm1525_vm8 = vmand %vm1523_vm10, %vm1524_vm13  ;;  %vm4082_vm10 = vcmp.eq.s32.totalorder %v2985_v2, 14 }
0x19d1   : > { %v1526_v29 = vsel %vm1525_vm8, 15, %v1445_v28  ;;  %vm4083_vm13 = vmmov %vm4081_vm0 }
0x19d2   : > { %vm1605_vm2 = vcmp.eq.s32.totalorder %v1526_v29, 0  ;;  %vm4084_vm8 = vmmov %vm4081_vm0 }
0x1a1c   : > { %v1603_v23 = vpop.xlane.xlu2 %1602 }
0x1a1d   : > { %vm1604_vm5 = vcmp.le.f32.partialorder %v1603_v23, 0.0  ;;  %vm1608_vm3 = vcmp.gt.f32.partialorder %v1603_v23, 0.0 }
0x1a1e   : > { %vm1606_vm4 = vmand %vm1604_vm5, %vm1605_vm2  ;;  %v1609_v58 = vsel %vm1608_vm3, %v1603_v23, 1.0  ;;  %vm4085_vm5 = vcmp.eq.s32.totalorder %v2985_v2, 12 }
0x1a1f   : > { %v1607_v8 = vsel %vm1606_vm4, 16, %v1526_v29  ;;  %2684 = vrsqrt.f32 %v1609_v58  ;;  %vm1616_vm1 = vweird.f32 %v1609_v58  ;;  %vm4086_vm2 = vmmov %vm4081_vm0  ;;  %vm4090_vm4 = vcmp.eq.s32.totalorder %v2985_v2, 13 }
0x1a20   : > { %1678 = vst.msk [vmem:[%s373_s29] sm:$0x1] %vm410_vm6, %v1607_v8  ;;  %vm4089_vm3 = vmmov %vm4081_vm0 }
0x1a21   : > { %v2048_v57 = vpop.xlane.xlu1 %2047 }
0x1a25   : > { %v2685_v25 = vpop.eup %2684 }
0x1a26   : > { %v1611_v63 = vmul.f32 %v2685_v25, %v1609_v58  ;;  %vm1617_vm11 = vweird.f32 %v2685_v25 }
0x1a27   : > { %vm1618_vm15 = vmor %vm1616_vm1, %vm1617_vm11 }
0x1a28   : > { %v1612_v46 = vmul.f32 %v2685_v25, %v1611_v63  ;;  %vm4091_vm11 = vmmov %vm4081_vm0 }
0x1a29   : > { %vm4092_vm1 = vmmov %vm4090_vm4 }
0x1a2a   : > { %v1613_v16 = vmul.f32 0.5, %v1612_v46 }
0x1a2c   : > { %v1614_v19 = vsub.f32 1.5, %v1613_v16 }
0x1a2e   : > { %v1615_v11 = vmul.f32 %v2685_v25, %v1614_v19 }
0x1a30   : > { %v1619_v21 = vsel %vm1618_vm15, %v2685_v25, %v1615_v11  ;;  %vm4094_vm15 = vmmov %vm4081_vm0 }
0x1a31   : > { %v1620_v0 = vmul.f32 %v1619_v21, %v1609_v58  ;;  %1626 = vst.msk [vmem:[#allocation3 + $0xf] sm:$0x1] %vm410_vm6, %v1619_v21  ;;  %v1622_v15 = vmul.f32 %v1619_v21, %v3678_v40 }
0x1a33   : > { %v1623_v45 = vsel %vm1621_vm7, %v1622_v15, 0.0 }
0x1a34   : > { %v3723_v9 = vsel %vm1598_vm9, %v1620_v0, %v1623_v45 }
0x1a35   : > { %1625 = vst.msk [vmem:[#allocation2 + $0xf] sm:$0x1] %vm4079_vm14, %v3723_v9  ;;  %vm4096_vm14 = vmmov %vm4081_vm0 }
0x1a38   : > { %v2653_v32 = vld [vmem:[#allocation3 + $0xf] ss:$0 sm:$0xff] }
0x1a39   : > { %v2050_v22 = vmul.f32 %v2653_v32, %v2048_v57 }
0x1a3b   : > { %2054 = vperm.xlu2 %2636, %v2050_v22  }
0x1a3c   : > { %v2041_v51 = vld [vmem:[#allocation2 + $0xf] sm:$0x1] }
0x1a3d   : > { %v2051_v33 = vsel %vm1621_vm7, %v2041_v51, 0.0  ;;  %vm4095_vm7 = vcmp.eq.s32.totalorder %v2985_v2, 11 }
0x1a3e   : > { %v2057_v49 = vperm.slane %v2051_v33, 0 }
0x1a40   : > { %v2061_v56 = vmul.f32 0.0, %v2057_v49 }
0x1a42   : > { %v2062_v24 = vsel %vm4080_vm12, %v2061_v56, 0.0  ;;  %vm4097_vm12 = vcmp.eq.s32.totalorder %v2985_v2, 9 }
0x1a43   : > { %2063 = vadd.xlane.f32.xlu0 %v2062_v24 }
0x1a95   : > { %v2055_v40 = vpop.permute.xlu2 %2054 }
0x1a96   : > { %v2065_v28 = vsel %vm1598_vm9, %v2055_v40, 0.0  ;;  %v2058_v63 = vmul.f32 %v2057_v49, %v2055_v40 }
0x1a97   : > { %v2066_v29 = vsel %vm4081_vm0, %v2065_v28, 0.0 }
0x1a98   : > { %2067 = vadd.xlane.f32.xlu0 %v2066_v29  ;;  %v2059_v46 = vsub.f32 %v3691_v3, %v2058_v63 }
0x1a9a   : > { %v3734_v16 = vsel %vm1598_vm9, %v2055_v40, %v2059_v46 }
0x1a9b   : > { %v2081_v19 = vsel %vm4082_vm10, %v3734_v16, 0.0  ;;  %v2113_v51 = vsel %vm4085_vm5, %v3734_v16, 0.0  ;;  %vm4101_vm5 = vmmov %vm4081_vm0 }
0x1a9c   : > { %v2082_v11 = vsel %vm4083_vm13, %v2081_v19, 0.0  ;;  %v2114_v33 = vsel %vm4086_vm2, %v2113_v51, 0.0  ;;  %vm4099_vm13 = vmmov %vm4081_vm0  ;;  %vm4102_vm2 = vcmp.eq.s32.totalorder %v2985_v2, 6 }
0x1ab6   : > { %v2064_v23 = vpop.xlane.xlu0 %2063 }
0x1b0b   : > { %v2068_v58 = vpop.xlane.xlu0 %2067 }
0x1b0c   : > { %v2069_v8 = vsub.f32 %v2068_v58, %v2064_v23 }
0x1b0e   : > { %v2070_v25 = vmul.f32 %v2653_v32, %v2069_v8 }
0x1b10   : > { %2073 = vperm.xlu0 %2637, %v2070_v25   ;;  %v4093_v25 = vperm.slane %v3614_v13, 0  ;;  %v2161_v13 = vsel %vm4097_vm12, %v3734_v16, 0.0  ;;  %vm4113_vm12 = vmmov %vm4081_vm0 }
0x1b3a   : > { %2083 = vadd.xlane.f32.xlu0 %v2082_v11 }
0x1b82   : > { %v2074_v21 = vpop.permute.xlu0 %2073 }
0x1b83   : > { %v2076_v0 = vsel %vm1598_vm9, %v2074_v21, 0.0  ;;  %vm4087_vm9 = vmmov %vm4082_vm10  ;;  %vm4098_vm10 = vcmp.eq.s32.totalorder %v2985_v2, 8 }
0x1b84   : > { %v2077_v15 = vmul.f32 %v2076_v0, %v2037_v42  ;;  %v4088_v42 = vperm.slane %v3652_v1, 0 }
0x1b86   : > { %v2078_v3 = vsel %vm4084_vm8, %v2077_v15, 0.0  ;;  %vm4100_vm8 = vcmp.eq.s32.totalorder %v2985_v2, 7 }
0x1b87   : > { %2079 = vadd.xlane.f32.xlu2 %v2078_v3  ;;  %v2162_v3 = vsel %vm4081_vm0, %v2161_v13, 0.0  ;;  %v4117_v13 = vperm.slane %v3511_v37, 0 }
0x1bad   : > { %v2084_v45 = vpop.xlane.xlu0 %2083 }
0x1bfa   : > { %v2080_v32 = vpop.xlane.xlu2 %2079 }
0x1bfb   : > { %v2085_v57 = vsub.f32 %v2084_v45, %v2080_v32  ;;  %v2177_v45 = vsel %vm4098_vm10, %v3734_v16, 0.0  ;;  %v2193_v32 = vsel %vm4100_vm8, %v3734_v16, 0.0 }
0x1bfd   : > { %v2086_v22 = vmul.f32 %v3664_v30, %v2085_v57  ;;  %v2097_v30 = vsel %vm4090_vm4, %v3734_v16, 0.0  ;;  %v2194_v57 = vsel %vm4101_vm5, %v2193_v32, 0.0  ;;  %vm4105_vm4 = vmmov %vm4081_vm0  ;;  %vm4119_vm5 = vcmp.eq.s32.totalorder %v2985_v2, 9 }
0x1bfe   : > { %v2098_v40 = vsel %vm4091_vm11, %v2097_v30, 0.0  ;;  %vm4106_vm11 = vcmp.eq.s32.totalorder %v2985_v2, 4  ;;  %v4109_v30 = vperm.slane %v3593_v48, 0 }
0x1bff   : > { %2089 = vperm.xlu2 %2636, %v2086_v22   ;;  %v2209_v22 = vsel %vm4102_vm2, %v3734_v16, 0.0 }
0x1c28   : > { %2115 = vadd.xlane.f32.xlu2 %v2114_v33 }
0x1c59   : > { %v2090_v49 = vpop.permute.xlu2 %2089 }
0x1c5a   : > { %v2092_v18 = vsel %vm4087_vm9, %v2090_v49, %v2076_v0  ;;  %vm4103_vm9 = vmmov %vm4081_vm0 }
0x1c5b   : > { %v2093_v56 = vmul.f32 %v2092_v18, %v4088_v42  ;;  %v2210_v51 = vsel %vm4103_vm9, %v2209_v22, 0.0  ;;  %vm4122_vm9 = vcmp.eq.s32.totalorder %v2985_v2, 8 }
0x1c5d   : > { %v2094_v24 = vsel %vm4089_vm3, %v2093_v56, 0.0  ;;  %vm4104_vm3 = vcmp.eq.s32.totalorder %v2985_v2, 5 }
0x1c5e   : > { %2095 = vadd.xlane.f32.xlu1 %v2094_v24  ;;  %v2225_v33 = vsel %vm4104_vm3, %v3734_v16, 0.0 }
0x1c5f   : > { %v2226_v49 = vsel %vm4105_vm4, %v2225_v33, 0.0  ;;  %v4120_v33 = vperm.slane %v3487_v35, 0  ;;  %vm4125_vm4 = vcmp.eq.s32.totalorder %v2985_v2, 7 }
0x1c66   : > { %2099 = vadd.xlane.f32.xlu1 %v2098_v40 }
0x1c9b   : > { %v2116_v19 = vpop.xlane.xlu2 %2115 }
0x1cd1   : > { %v2096_v28 = vpop.xlane.xlu1 %2095 }
0x1cd9   : > { %v2100_v29 = vpop.xlane.xlu1 %2099 }
0x1cda   : > { %v2101_v23 = vsub.f32 %v2100_v29, %v2096_v28 }
0x1cdc   : > { %v2102_v58 = vmul.f32 %v3632_v55, %v2101_v23  ;;  %v2129_v55 = vsel %vm4095_vm7, %v3734_v16, 0.0  ;;  %vm4110_vm7 = vmmov %vm4081_vm0 }
0x1cdd   : > { %v2130_v15 = vsel %vm4096_vm14, %v2129_v55, 0.0  ;;  %vm4111_vm14 = vcmp.eq.s32.totalorder %v2985_v2, 11 }
0x1cde   : > { %2105 = vperm.xlu0 %2637, %v2102_v58  }
0x1d50   : > { %v2106_v8 = vpop.permute.xlu0 %2105 }
0x1d51   : > { %v2108_v1 = vsel %vm4092_vm1, %v2106_v8, %v2092_v18  ;;  %v2241_v18 = vsel %vm4106_vm11, %v3734_v16, 0.0  ;;  %vm4107_vm1 = vmmov %vm4081_vm0  ;;  %vm4114_vm0 = vcmp.eq.s32.totalorder %v2985_v2, 10 }
0x1d52   : > { %v2109_v63 = vmul.f32 %v2108_v1, %v4093_v25  ;;  %v2242_v42 = vsel %vm4107_vm1, %v2241_v18, 0.0  ;;  %v2145_v48 = vsel %vm4114_vm0, %v3734_v16, 0.0  ;;  %vm4115_vm10 = vmmov %vm4107_vm1 }
0x1d53   : > { %vm4118_vm8 = vmmov %vm4107_vm1 }
0x1d54   : > { %v2110_v46 = vsel %vm4094_vm15, %v2109_v63, 0.0  ;;  %vm4108_vm15 = vcmp.eq.s32.totalorder %v2985_v2, 12  ;;  %vm4121_vm2 = vmmov %vm4107_vm1 }
0x1d55   : > { %2111 = vadd.xlane.f32.xlu1 %v2110_v46  ;;  %v4112_v46 = vperm.slane %v3551_v36, 0  ;;  %vm4124_vm3 = vmmov %vm4107_vm1 }
0x1d56   : > { %vm4127_vm11 = vmmov %vm4107_vm1  ;;  %vm4128_vm1 = vcmp.eq.s32.totalorder %v2985_v2, 6 }
0x1dc8   : > { %v2112_v11 = vpop.xlane.xlu1 %2111 }
0x1dc9   : > { %v2117_v21 = vsub.f32 %v2116_v19, %v2112_v11  ;;  %v2146_v11 = vsel %vm4115_vm10, %v2145_v48, 0.0  ;;  %vm4137_vm10 = vcmask 130048  }
0x1dcb   : > { %v2118_v0 = vmul.f32 %v3605_v4, %v2117_v21  ;;  %v2178_v4 = vsel %vm4099_vm13, %v2177_v45, 0.0  ;;  %vm4116_vm13 = vmmov %vm4114_vm0 }
0x1dcc   : > { %vm4135_vm0 = vmmov %vm4121_vm2 }
0x1dcd   : > { %2121 = vperm.xlu1 %2635, %v2118_v0  }
0x1df7   : > { %2131 = vadd.xlane.f32.xlu1 %v2130_v15 }
0x1dff   : > { %2163 = vadd.xlane.f32.xlu1 %v2162_v3 }
0x1e07   : > { %2179 = vadd.xlane.f32.xlu1 %v2178_v4 }
0x1e0f   : > { %2195 = vadd.xlane.f32.xlu1 %v2194_v57 }
0x1e17   : > { %2211 = vadd.xlane.f32.xlu1 %v2210_v51 }
0x1e1f   : > { %2227 = vadd.xlane.f32.xlu1 %v2226_v49 }
0x1e27   : > { %2243 = vadd.xlane.f32.xlu1 %v2242_v42 }
0x1e3f   : > { %v2122_v56 = vpop.permute.xlu1 %2121 }
0x1e40   : > { %v2124_v24 = vsel %vm4108_vm15, %v2122_v56, %v2108_v1  ;;  %vm4130_vm15 = vmmov %vm4121_vm2 }
0x1e41   : > { %v2125_v40 = vmul.f32 %v2124_v24, %v4109_v30 }
0x1e43   : > { %v2126_v28 = vsel %vm4110_vm7, %v2125_v40, 0.0  ;;  %v4123_v40 = vperm.slane %v3448_v6, 0  ;;  %vm4131_vm7 = vcmp.eq.s32.totalorder %v2985_v2, 3 }
0x1e44   : > { %2127 = vadd.xlane.f32.xlu0 %v2126_v28 }
0x1e6a   : > { %v2132_v29 = vpop.xlane.xlu1 %2131 }
0x1e72   : > { %v2164_v4 = vpop.xlane.xlu1 %2163 }
0x1e7a   : > { %v2180_v37 = vpop.xlane.xlu1 %2179 }
0x1e82   : > { %v2196_v35 = vpop.xlane.xlu1 %2195 }
0x1e8a   : > { %v2212_v6 = vpop.xlane.xlu1 %2211 }
0x1eb7   : > { %v2128_v23 = vpop.xlane.xlu0 %2127 }
0x1eb8   : > { %v2133_v58 = vsub.f32 %v2132_v29, %v2128_v23 }
0x1eba   : > { %v2134_v8 = vmul.f32 %v3573_v53, %v2133_v58 }
0x1ebc   : > { %2137 = vperm.xlu2 %2636, %v2134_v8   ;;  %v2691_v8 = vld [vmem:[#allocation3 + $0x7] ss:$0 sm:$0xff] }
0x1f16   : > { %v2138_v25 = vpop.permute.xlu2 %2137 }
0x1f17   : > { %v2140_v63 = vsel %vm4111_vm14, %v2138_v25, %v2124_v24  ;;  %vm4132_vm14 = vmmov %vm4121_vm2 }
0x1f18   : > { %v2141_v19 = vmul.f32 %v2140_v63, %v4112_v46  ;;  %v4126_v46 = vperm.slane %v3402_v39, 0  ;;  %v2228_v39 = vpop.xlane.xlu1 %2227 }
0x1f1a   : > { %v2142_v1 = vsel %vm4113_vm12, %v2141_v19, 0.0  ;;  %vm4133_vm12 = vcmp.eq.s32.totalorder %v2985_v2, 5 }
0x1f1b   : > { %2143 = vadd.xlane.f32.xlu0 %v2142_v1 }
0x1f23   : > { %2147 = vadd.xlane.f32.xlu0 %v2146_v11 }
0x1f8e   : > { %v2144_v21 = vpop.xlane.xlu0 %2143 }
0x1f96   : > { %v2148_v53 = vpop.xlane.xlu0 %2147 }
0x1f97   : > { %v2149_v0 = vsub.f32 %v2148_v53, %v2144_v21  ;;  %v2692_v21 = vld [vmem:[#allocation3 + $0x6] ss:$0 sm:$0xff] }
0x1f99   : > { %v2150_v55 = vmul.f32 %v3529_v52, %v2149_v0 }
0x1f9b   : > { %2153 = vperm.xlu2 %2636, %v2150_v55  }
0x1ff5   : > { %v2154_v15 = vpop.permute.xlu2 %2153 }
0x1ff6   : > { %v2156_v36 = vsel %vm4116_vm13, %v2154_v15, %v2140_v63  ;;  %v4129_v15 = vperm.slane %v3366_v7, 0  ;;  %vm4139_vm13 = vmmov %vm4137_vm10 }
0x1ff7   : > { %v2157_v3 = vmul.f32 %v2156_v36, %v4117_v13 }
0x1ff9   : > { %v2158_v45 = vsel %vm4118_vm8, %v2157_v3, 0.0  ;;  %vm4141_vm8 = vmmov %vm4137_vm10 }
0x1ffa   : > { %2159 = vadd.xlane.f32.xlu0 %v2158_v45 }
0x206d   : > { %v2160_v32 = vpop.xlane.xlu0 %2159 }
0x206e   : > { %v2165_v57 = vsub.f32 %v2164_v4, %v2160_v32  ;;  %v2693_v4 = vld [vmem:[#allocation3 + $0x5] ss:$0 sm:$0xff] }
0x2070   : > { %v2166_v22 = vmul.f32 %v3502_v38, %v2165_v57  ;;  %v2257_v57 = vsel %vm4131_vm7, %v3734_v16, 0.0 }
0x2072   : > { %2169 = vperm.xlu2 %2636, %v2166_v22   ;;  %v2258_v22 = vsel %vm4132_vm14, %v2257_v57, 0.0  ;;  %v4155_v57 = vperm.slane %v3645_v14, 0 }
0x20cc   : > { %v2170_v51 = vpop.permute.xlu2 %2169 }
0x20cd   : > { %v2172_v52 = vsel %vm4119_vm5, %v2170_v51, %v2156_v36  ;;  %v4134_v51 = vperm.slane %v3316_v54, 0  ;;  %vm4143_vm5 = vmmov %vm4141_vm8 }
0x20ce   : > { %v2173_v49 = vmul.f32 %v2172_v52, %v4120_v33 }
0x20d0   : > { %v2174_v18 = vsel %vm4121_vm2, %v2173_v49, 0.0  ;;  %v1011_v49 = vld [vmem:[%s2975_s23] sm:$0xff]  ;;  %vm4145_vm2 = vmmov %vm4143_vm5 }
0x20d1   : > { %2175 = vadd.xlane.f32.xlu0 %v2174_v18  ;;  %vm4156_vm7 = vmmov %vm4145_vm2 }
0x20d2   : > { %vm4157_vm14 = vmmov %vm4145_vm2 }
0x2144   : > { %v2176_v42 = vpop.xlane.xlu0 %2175 }
0x2145   : > { %v2181_v56 = vsub.f32 %v2180_v37, %v2176_v42  ;;  %v4138_v37 = vperm.slane %v3353_v41, 0 }
0x2147   : > { %v2182_v24 = vmul.f32 %v3470_v50, %v2181_v56 }
0x2149   : > { %2185 = vperm.xlu2 %2636, %v2182_v24  }
0x21a3   : > { %v2186_v30 = vpop.permute.xlu2 %2185 }
0x21a4   : > { %v2188_v38 = vsel %vm4122_vm9, %v2186_v30, %v2172_v52  ;;  %vm4147_vm9 = vmmov %vm4145_vm2 }
0x21a5   : > { %v2189_v28 = vmul.f32 %v2188_v38, %v4123_v40 }
0x21a7   : > { %v2190_v29 = vsel %vm4124_vm3, %v2189_v28, 0.0  ;;  %v4142_v28 = vperm.slane %v3439_v47, 0  ;;  %vm4149_vm3 = vmmov %vm4145_vm2 }
0x21a8   : > { %2191 = vadd.xlane.f32.xlu0 %v2190_v29 }
0x221b   : > { %v2192_v23 = vpop.xlane.xlu0 %2191 }
0x221c   : > { %v2197_v58 = vsub.f32 %v2196_v35, %v2192_v23 }
0x221e   : > { %v2198_v25 = vmul.f32 %v2691_v8, %v2197_v58  ;;  %v4144_v58 = vperm.slane %v3483_v34, 0 }
0x2220   : > { %2201 = vperm.xlu2 %2636, %v2198_v25  }
0x227a   : > { %v2202_v63 = vpop.permute.xlu2 %2201 }
0x227b   : > { %v2204_v50 = vsel %vm4125_vm4, %v2202_v63, %v2188_v38  ;;  %v2244_v63 = vpop.xlane.xlu1 %2243  ;;  %vm4150_vm4 = vcmp.eq.s32.totalorder %v2985_v2, 1 }
0x227c   : > { %v2205_v19 = vmul.f32 %v2204_v50, %v4126_v46  ;;  %v2694_v46 = vld [vmem:[#allocation3 + $0x4] ss:$0 sm:$0xff] }
0x227e   : > { %v2206_v1 = vsel %vm4127_vm11, %v2205_v19, 0.0  ;;  %vm4151_vm11 = vmmov %vm4135_vm0 }
0x227f   : > { %2207 = vadd.xlane.f32.xlu0 %v2206_v1 }
0x22f2   : > { %v2208_v48 = vpop.xlane.xlu0 %2207 }
0x22f3   : > { %v2213_v11 = vsub.f32 %v2212_v6, %v2208_v48  ;;  %v4146_v6 = vperm.slane %v3542_v20, 0  ;;  %v2289_v20 = vsel %vm4150_vm4, %v3734_v16, 0.0 }
0x22f5   : > { %v2214_v53 = vmul.f32 %v2692_v21, %v2213_v11 }
0x22f7   : > { %2217 = vperm.xlu2 %2636, %v2214_v53   ;;  %v4148_v53 = vperm.slane %v3586_v59, 0 }
0x2351   : > { %v2218_v0 = vpop.permute.xlu2 %2217 }
0x2352   : > { %v2220_v55 = vsel %vm4128_vm1, %v2218_v0, %v2204_v50  ;;  %vm4152_vm1 = vcmp.eq.s32.totalorder %v2985_v2, 4 }
0x2353   : > { %v2221_v36 = vmul.f32 %v2220_v55, %v4129_v15 }
0x2355   : > { %v2222_v13 = vsel %vm4130_vm15, %v2221_v36, 0.0  ;;  %v2290_v36 = vsel %vm4151_vm11, %v2289_v20, 0.0  ;;  %vm4154_vm15 = vmmov %vm4135_vm0 }
0x2356   : > { %2223 = vadd.xlane.f32.xlu0 %v2222_v13  ;;  %vm4171_vm11 = vmmov %vm4135_vm0 }
0x236a   : > { %1096 = vperm.xlu0 %2637, %v3358_v43  }
0x23c9   : > { %v2224_v3 = vpop.xlane.xlu0 %2223 }
0x23ca   : > { %v2229_v45 = vsub.f32 %v2228_v39, %v2224_v3 }
0x23cc   : > { %v2230_v32 = vmul.f32 %v2693_v4, %v2229_v45  ;;  %v4153_v45 = vperm.slane %v3268_v12, 0  ;;  %v1671_v12 = vperm.slane %v3723_v9, 0 }
0x23ce   : > { %2233 = vperm.xlu2 %2636, %v2230_v32  }
0x23dc   : > { %v1097_v18 = vpop.permute.xlu0 %1096 }
0x23dd   : > { %v1105_v42 = vmul.f32 %v4138_v37, %v1097_v18 }
0x23f7   : > { %2259 = vadd.xlane.f32.xlu2 %v2258_v22 }
0x240f   : > { %1015 = vperm.xlu2 %2636, %v3329_v62  }
0x2417   : > { %1177 = vperm.xlu2 %2636, %v3412_v60  }
0x241f   : > { %1258 = vperm.xlu2 %2636, %v3444_v61   ;;  %v4136_v61 = vperm.slane %v3309_v44, 0  ;;  %v4140_v44 = vperm.slane %v3395_v27, 0 }
0x2427   : > { %1339 = vperm.xlu2 %2636, %v3500_v17  }
0x2428   : > { %v2234_v43 = vpop.permute.xlu2 %2233 }
0x2429   : > { %v2236_v7 = vsel %vm4133_vm12, %v2234_v43, %v2220_v55  ;;  %vm4158_vm12 = vcmp.eq.s32.totalorder %v2985_v2, 2 }
0x242a   : > { %v2237_v52 = vmul.f32 %v2236_v7, %v4134_v51  ;;  %v2273_v37 = vsel %vm4158_vm12, %v3734_v16, 0.0 }
0x242c   : > { %v2238_v33 = vsel %vm4135_vm0, %v2237_v52, 0.0  ;;  %v1679_v52 = vld [vmem:[#allocation2] sm:$0xff] }
0x242d   : > { %2239 = vadd.xlane.f32.xlu0 %v2238_v33 }
0x242f   : > { %1501 = vperm.xlu2 %2636, %v3603_v31  }
0x2441   : > { %1420 = vperm.xlu0 %2637, %v3547_v10  }
0x246a   : > { %v3853_v62 = vpop.xlane.xlu2 %2259 }
0x2472   : > { %v1016_v60 = vpop.permute.xlu2 %1015 }
0x2473   : > { %v1024_v17 = vmul.f32 %v4136_v61, %v1016_v60 }
0x2475   : > { %v1026_v54 = vsub.f32 %v1011_v49, %v1024_v17 }
0x2477   : > { %1028 = vst.msk [vmem:[%s2975_s23] sm:$0xff] %vm4137_vm10, %v1026_v54  ;;  %v2695_v54 = vld [vmem:[#allocation3 + $0x3] ss:$0 sm:$0xff]  ;;  %vm4159_vm10 = vmmov %vm4145_vm2 }
0x247a   : > { %v1178_v56 = vpop.permute.xlu2 %1177 }
0x247b   : > { %v1186_v24 = vmul.f32 %v4140_v44, %v1178_v56  ;;  %v4161_v56 = vperm.slane %v3228_v5, 0 }
0x247e   : > { %v1092_v31 = vld [vmem:[%s2975_s23] sm:$0xff] }
0x247f   : > { %v1107_v10 = vsub.f32 %v1092_v31, %v1105_v42  ;;  %v2274_v42 = vsel %vm4135_vm0, %v2273_v37, 0.0 }
0x2481   : > { %1109 = vst.msk [vmem:[%s2975_s23] sm:$0xff] %vm4139_vm13, %v1107_v10  ;;  %vm4160_vm13 = vcmp.eq.s32.totalorder %v2985_v2, 3 }
0x2482   : > { %v1259_v40 = vpop.permute.xlu2 %1258 }
0x2483   : > { %v1267_v29 = vmul.f32 %v4142_v28, %v1259_v40  ;;  %v2696_v28 = vld [vmem:[#allocation3 + $0x2] ss:$0 sm:$0xff] }
0x2488   : > { %v1173_v30 = vld [vmem:[%s2975_s23] sm:$0xff] }
0x2489   : > { %v1188_v38 = vsub.f32 %v1173_v30, %v1186_v24 }
0x248a   : > { %v1340_v23 = vpop.permute.xlu2 %1339 }
0x248b   : > { %1190 = vst.msk [vmem:[%s2975_s23] sm:$0xff] %vm4141_vm8, %v1188_v38  ;;  %v1348_v8 = vmul.f32 %v4144_v58, %v1340_v23  ;;  %vm4162_vm8 = vmmov %vm4135_vm0  ;;  %v4164_v23 = vld [vmem:[#allocation16_spill] sm:$0xff] }
0x248c   : > { %v4165_v58 = vperm.slane %v4164_v23, 0 }
0x2492   : > { %v1254_v41 = vld [vmem:[%s2975_s23] sm:$0xff]  ;;  %v1502_v34 = vpop.permute.xlu2 %1501 }
0x2493   : > { %v1269_v35 = vsub.f32 %v1254_v41, %v1267_v29  ;;  %v1510_v0 = vmul.f32 %v4148_v53, %v1502_v34 }
0x2495   : > { %1271 = vst.msk [vmem:[%s2975_s23] sm:$0xff] %vm4143_vm5, %v1269_v35  ;;  %vm4163_vm5 = vmmov %vm4158_vm12 }
0x2496   : > { %vm4177_vm12 = vmmov %vm4135_vm0 }
0x249c   : > { %v1335_v27 = vld [vmem:[%s2975_s23] sm:$0xff] }
0x249d   : > { %v1350_v25 = vsub.f32 %v1335_v27, %v1348_v8 }
0x249f   : > { %1352 = vst.msk [vmem:[%s2975_s23] sm:$0xff] %vm4145_vm2, %v1350_v25  ;;  %vm4166_vm2 = vmmov %vm4135_vm0 }
0x24a0   : > { %v2240_v50 = vpop.xlane.xlu0 %2239 }
0x24a1   : > { %v2245_v47 = vsub.f32 %v2244_v63, %v2240_v50  ;;  %v2697_v50 = vld [vmem:[#allocation3 + $0x1] ss:$0 sm:$0xff] }
0x24a3   : > { %v2246_v19 = vmul.f32 %v2694_v46, %v2245_v47 }
0x24a5   : > { %2249 = vperm.xlu1 %2635, %v2246_v19  }
0x24a6   : > { %v1416_v11 = vld [vmem:[%s2975_s23] sm:$0xff] }
0x24b3   : > { %v1421_v1 = vpop.permute.xlu0 %1420 }
0x24b4   : > { %v1429_v48 = vmul.f32 %v4146_v6, %v1421_v1 }
0x24b6   : > { %v1431_v21 = vsub.f32 %v1416_v11, %v1429_v48  ;;  %v4169_v48 = vld [vmem:[#allocation15_spill] sm:$0xff] }
0x24b7   : > { %v4170_v11 = vperm.slane %v4169_v48, 0 }
0x24b8   : > { %1433 = vst.msk [vmem:[%s2975_s23] sm:$0xff] %vm4147_vm9, %v1431_v21  ;;  %vm4167_vm9 = vcmp.eq.s32.totalorder %v2985_v2, 0 }
0x24b9   : > { %v2305_v46 = vsel %vm4167_vm9, %v3734_v16, 0.0 }
0x24bf   : > { %v1497_v55 = vld [vmem:[%s2975_s23] sm:$0xff] }
0x24c0   : > { %v1512_v15 = vsub.f32 %v1497_v55, %v1510_v0  ;;  %v2698_v55 = vld [vmem:[#allocation3] ss:$0 sm:$0xff] }
0x24c2   : > { %1514 = vst.msk [vmem:[%s2975_s23] sm:$0xff] %vm4149_vm3, %v1512_v15  ;;  %vm4168_vm3 = vmmov %vm4135_vm0 }
0x24c3   : > { %v2306_v19 = vsel %vm4168_vm3, %v2305_v46, 0.0 }
0x24c9   : > { %v1578_v43 = vld [vmem:[%s2975_s23] sm:$0xff] }
0x24da   : > { %1627 = vxpose.xlu1.b32.start.end [1/1] (short) (narrow) %v3723_v9, 16 }
0x2517   : > { %v2250_v13 = vpop.permute.xlu1 %2249 }
0x2518   : > { %v2252_v39 = vsel %vm4152_vm1, %v2250_v13, %v2236_v7  ;;  %v1680_v7 = vld [vmem:[#allocation2 + $0x8] sm:$0xff]  ;;  %vm4172_vm1 = vmmov %vm4156_vm7 }
0x2519   : > { %v2253_v4 = vmul.f32 %v2252_v39, %v4153_v45  ;;  %v1660_v13 = vld [vmem:[%s2975_s23 + $0x8] sm:$0xff] }
0x251a   : > { %v4175_v45 = vld [vmem:[#allocation14_spill] sm:$0xff] }
0x253c   : > { %1582 = vperm.xlu1 %2635, %v3662_v26   ;;  %v2254_v26 = vsel %vm4154_vm15, %v2253_v4, 0.0  ;;  %vm4173_vm15 = vmmov %vm4172_vm1 }
0x2566   : > { %2291 = vadd.xlane.f32.xlu1 %v2290_v36 }
0x257e   : > { %v1643_v59 = vpop.trf.xlu1 }
0x257f   : > { %1663 = vperm.xlu0 %2637, %v1643_v59  }
0x2586   : > { %v1644_v3 = vpop.trf.xlu1 }
0x25a9   : > { %2255 = vadd.xlane.f32.xlu0 %v2254_v26 }
0x25ae   : > { %v1583_v32 = vpop.permute.xlu1 %1582 }
0x25af   : > { %v1591_v22 = vmul.f32 %v4155_v57, %v1583_v32 }
0x25b1   : > { %v1593_v51 = vsub.f32 %v1578_v43, %v1591_v22 }
0x25b3   : > { %1595 = vst.msk [vmem:[%s2975_s23] sm:$0xff] %vm4156_vm7, %v1593_v51  ;;  %vm4174_vm7 = vmmov %vm4167_vm9 }
0x25ba   : > { %v1659_v61 = vld [vmem:[%s2975_s23] sm:$0xff] }
0x25d2   : > { %1681 = vxpose.xlu0.b32.start [1/2] (short) (narrow) %v1679_v52, 16 }
0x25d9   : > { %v2292_v27 = vpop.xlane.xlu1 %2291 }
0x25da   : > { %1682 = vxpose.xlu0.b32.end [2/2] (short) (narrow) %v1680_v7, 16 }
0x25f1   : > { %v1664_v33 = vpop.permute.xlu0 %1663 }
0x25f2   : > { %v1672_v60 = vmul.f32 %v1671_v12, %v1664_v33 }
0x25f4   : > { %v1674_v17 = vsub.f32 %v1659_v61, %v1672_v60 }
0x25f6   : > { %1676 = vst.msk [vmem:[%s2975_s23] sm:$0xff] %vm4157_vm14, %v1674_v17  ;;  %vm4176_vm14 = vmmov %vm4135_vm0 }
0x261c   : > { %v2256_v49 = vpop.xlane.xlu0 %2255 }
0x261d   : > { %v2261_v14 = vsub.f32 %v3853_v62, %v2256_v49 }
0x261f   : > { %v2262_v18 = vmul.f32 %v2695_v54, %v2261_v14 }
0x2621   : > { %2265 = vperm.xlu2 %2636, %v2262_v18  }
0x264b   : > { %2275 = vadd.xlane.f32.xlu0 %v2274_v42 }
0x2676   : > { %v1697_v9 = vpop.trf.xlu0 }
0x2677   : > { %1713 = vst.msk [vmem:[%s2975_s23] sm:$0xff] %vm4159_vm10, %v1697_v9 }
0x267b   : > { %v2266_v31 = vpop.permute.xlu2 %2265 }
0x267c   : > { %v2268_v10 = vsel %vm4160_vm13, %v2266_v31, %v2252_v39 }
0x267d   : > { %v2269_v62 = vmul.f32 %v2268_v10, %v4161_v56 }
0x267e   : > { %v1698_v24 = vpop.trf.xlu0 }
0x267f   : > { %v2270_v44 = vsel %vm4162_vm8, %v2269_v62, 0.0 }
0x2680   : > { %2271 = vadd.xlane.f32.xlu2 %v2270_v44 }
0x26be   : > { %v2276_v30 = vpop.xlane.xlu0 %2275 }
0x26f3   : > { %v2272_v38 = vpop.xlane.xlu2 %2271 }
0x26f4   : > { %v2277_v40 = vsub.f32 %v2276_v30, %v2272_v38 }
0x26f6   : > { %v2278_v29 = vmul.f32 %v2696_v28, %v2277_v40 }
0x26f8   : > { %2281 = vperm.xlu2 %2636, %v2278_v29  }
0x2752   : > { %v2282_v41 = vpop.permute.xlu2 %2281 }
0x2753   : > { %v2284_v35 = vsel %vm4163_vm5, %v2282_v41, %v2268_v10 }
0x2754   : > { %v2285_v8 = vmul.f32 %v2284_v35, %v4165_v58 }
0x2756   : > { %v2286_v5 = vsel %vm4166_vm2, %v2285_v8, 0.0 }
0x2757   : > { %2287 = vadd.xlane.f32.xlu2 %v2286_v5 }
0x27ca   : > { %v2288_v25 = vpop.xlane.xlu2 %2287 }
0x27cb   : > { %v2293_v63 = vsub.f32 %v2292_v27, %v2288_v25 }
0x27cd   : > { %v2294_v47 = vmul.f32 %v2697_v50, %v2293_v63 }
0x27cf   : > { %2297 = vperm.xlu2 %2636, %v2294_v47  }
0x27f8   : > { %2307 = vadd.xlane.f32.xlu2 %v2306_v19 }
0x2829   : > { %v2298_v1 = vpop.permute.xlu2 %2297 }
0x282a   : > { %v2300_v6 = vsel %vm4150_vm4, %v2298_v1, %v2284_v35 }
0x282b   : > { %v2301_v21 = vmul.f32 %v2300_v6, %v4170_v11 }
0x282d   : > { %v2302_v34 = vsel %vm4171_vm11, %v2301_v21, 0.0 }
0x282e   : > { %2303 = vadd.xlane.f32.xlu1 %v2302_v34 }
0x2847   : > { %1668 = vperm.xlu1 %2635, %v1644_v3  }
0x286b   : > { %v2308_v53 = vpop.xlane.xlu2 %2307 }
0x28a1   : > { %v2304_v16 = vpop.xlane.xlu1 %2303 }
0x28a2   : > { %v2309_v0 = vsub.f32 %v2308_v53, %v2304_v16 }
0x28a4   : > { %v2310_v15 = vmul.f32 %v2698_v55, %v2309_v0 }
0x28a6   : > { %2313 = vperm.xlu1 %2635, %v2310_v15  }
0x28b9   : > { %v1669_v20 = vpop.permute.xlu1 %1668 }
0x28ba   : > { %v1673_v36 = vmul.f32 %v1671_v12, %v1669_v20 }
0x28bc   : > { %v1675_v59 = vsub.f32 %v1660_v13, %v1673_v36 }
0x28be   : > { %1677 = vst.msk [vmem:[%s2975_s23 + $0x8] sm:$0xff] %vm4172_vm1, %v1675_v59 }
0x28bf   : > { %1714 = vst.msk [vmem:[%s2975_s23 + $0x8] sm:$0xff] %vm4173_vm15, %v1698_v24 }
0x2918   : > { %v2314_v39 = vpop.permute.xlu1 %2313 }
0x2919   : > { %v2316_v3 = vsel %vm4174_vm7, %v2314_v39, %v2300_v6 }
0x291a   : > { %v2318_v4 = vmul.f32 %v2316_v3, %v4175_v45  ;;  %2317 = vst.msk [vmem:[%s3945_s12] sm:$0x3] %vm4176_vm14, %v2316_v3 }
0x291c   : > { %v2319_v26 = vsel %vm4177_vm12, %v2318_v4, 0.0 }
0x291d   : > { %2320 = vadd.xlane.f32.xlu0 %v2319_v26 }
0x291e   : > { %2756 = shalt.err (!%p2753_p7)
}
0x291f   : > { %s2832_s23 = smov 128   ;;  %s2833_s17 = smov 8  }
0x2920   : > { %2580 = dma.vmem_to_hbm [thread:$0]  (%p2924_p11), %s2357_s15, 256, %s2359_s20, %s2333_s10, %s2832_s23, %s2832_s23, %s2833_s17  }
0x2921   : > { %s2573_s11 = sshll.u32 %s2895_s28, 1  ;;  %s2373_s18 = sshll.u32 %s3945_s12, 4  ;;  %s2374_s18 = int_to_ptr.vmem [resolvable:$true] %s2373_s18 }
0x2922   : > { %s2371_s1 = scalar_lea.hbm %s4010_s5, %s2573_s11  ;;  %s2338_s2 = scalar_lea.sflag [#allocation9], %s2960_s22 }
0x2923   : > { %s2375_s0 = sshll.u32 %s2371_s1, 4  ;;  %s2777_s28 = scalar_lea.hbm %s4010_s5, 4  ;;  %s2376_s0 = int_to_ptr.hbm [resolvable:$true] %s2375_s0 }
0x2924   : > { %s2771_s9 = sshra.s32 %s2376_s0, 4  ;;  %s2772_s9 = int_to_ptr.hbm [resolvable:$true] %s2771_s9 }
0x2925   : > { %s2773_s16 = scalar_lea.hbm %s2772_s9, 2  ;;  %p2778_p2 = scmp.lt.s32.totalorder %s2772_s9, %s4010_s5 }
0x2926   : > { %p2774_p5 = scmp.ne.s32.totalorder %s2772_s9, %s2773_s16  ;;  %p2779_p9 = scmp.lt.s32.totalorder %s2777_s28, %s2773_s16 }
0x2928   : > { %p2775_p8 = pnand %p2774_p5, %p2924_p11  ;;  %p2780_p6 = por %p2779_p9, %p2778_p2 }
0x292a   : > { %p2776_p10 = pneg %p2775_p8 }
0x292c   : > { %p2781_p13 = pnand %p2780_p6, %p2776_p10 }
0x292e   : > { %2784 = shalt.err (!%p2781_p13)
}
0x292f   : > { %2581 = dma.vmem_to_hbm [thread:$0]  (%p2924_p11), %s2374_s18, 32, %s2376_s0, %s2338_s2   ;;  %v1716_v2 = vld [vmem:[#allocation3 + $0x8] sm:$0xff]  ;;  %v1715_v32 = vld [vmem:[#allocation3] sm:$0xff]  ;;  %vm1721_vm0 = vcmask 7168  }
0x2930   : > { %2686 = vlog2.f32 %v1716_v2  ;;  %s370_s22 = scalar_lea.vmem %s4011_s6, %s2972_s21 }
0x2931   : > { %2688 = vlog2.f32 %v1715_v32 }
0x2936   : > { %v2687_v57 = vpop.eup %2686 }
0x2937   : > { %v2689_v22 = vpop.eup %2688  ;;  %v1720_v43 = vmul.f32 0.6931472, %v2687_v57 }
0x2938   : > { %v1718_v51 = vmul.f32 0.6931472, %v2689_v22 }
0x2939   : > { %v1723_v52 = vsel %vm1721_vm0, %v1720_v43, 0.0 }
0x293a   : > { %v1722_v7 = vsel %vm1721_vm0, %v1718_v51, 0.0 }
0x293b   : > { %v1724_v12 = vadd.f32 %v1723_v52, %v1722_v7 }
0x293d   : > { %v1725_v33 = vrot.slane %v1724_v12, 4 }
0x293f   : > { %v1726_v60 = vadd.f32 %v1725_v33, %v1724_v12 }
0x2941   : > { %v1727_v61 = vrot.slane %v1726_v60, 2 }
0x2943   : > { %v1728_v49 = vadd.f32 %v1727_v61, %v1726_v60 }
0x2945   : > { %v1729_v18 = vrot.slane %v1728_v49, 1 }
0x2947   : > { %v1730_v9 = vadd.f32 %v1729_v18, %v1728_v49 }
0x2949   : > { %v1731_v56 = vsub.f32 0.0, %v1730_v9 }
0x2990   : > { %v2321_v17 = vpop.xlane.xlu0 %2320 }
0x2991   : > { %v2322_v14 = vrot.slane %v2321_v17, 4 }
0x2993   : > { %v2323_v54 = vadd.f32 %v2322_v14, %v2321_v17 }
0x2995   : > { %v2324_v37 = vrot.slane %v2323_v54, 2 }
0x2997   : > { %v2325_v42 = vadd.f32 %v2324_v37, %v2323_v54 }
0x2999   : > { %v2326_v31 = vrot.slane %v2325_v42, 1 }
0x299b   : > { %v2327_v10 = vadd.f32 %v2326_v31, %v2325_v42 }
0x299d   : > { %v2328_v62 = vmul.f32 0.5, %v2327_v10 }
0x299f   : > { %v2329_v44 = vadd.f32 %v2328_v62, %v1731_v56 }
0x29a1   : > { %v2330_v24 = vadd.f32 14.703016, %v2329_v44 }
0x29a3   : > { %2331 = vst.msk [vmem:[%s370_s22] sm:$0x1] %vm410_vm6, %v2330_v24 }
0x29a4 PF: > { %s2393_s20 = sand.u32 1, %s2815_s24   ;;  %p4178_p11 = scmp.ge.s32.totalorder %s2827_s27, 2 }
0x29a5   : > { %s2394_s10 = scalar_lea.sflag [#allocation6], %s2393_s20 }
0x29a6   : > { %p2589_p0 = pnand %p4178_p11, %p2928_p12 }
0x29a8   : > { %p2590_p1 = pneg %p2589_p0 }
0x29aa   : > { %2806 = dma.done.wait (%p2590_p1), %s2394_s10, 256  }
0x29ab   : > { %2808 = vsyncadd (%p2590_p1), %s2394_s10, 4294967040  ;;  %s2404_s23 = scalar_lea.sflag [#allocation9], %s2393_s20 }
0x29ac   : > { %2810 = dma.done.wait (%p2590_p1), %s2404_s23, 32  }
0x29ad   : > { %2812 = vsyncadd (%p2590_p1), %s2404_s23, 4294967264  ;;  %s4179_s21 = sld [smem:[#allocation13_spill]]  ;;  %p24_p3 = scmp.ge.s32.totalorder %s2899_s30, 4  }
0x29ae   : > { %s4180_s24 = smov %s2819_s25  ;;  %s4181_s25 = smov %s2823_s26 }
0x29af   : > { %s4183_s27 = smov %s2899_s30  ;;  %26 = sbr.rel (!%p24_p3) target bundleno = 12 (0xc), region = 131 }
0x29b3   : > { %s4182_s26 = smov %s4179_s21 }
0x29b4   :  { %2422 = vsyncpa [#allocation5], 1 }
0x29b5   :  { %2424 = vsyncpa [#allocation5 + $0x1], 1 }
0x29b6   :  { %2425 = vsyncpa [#allocation6], 1 }
0x29b7   :  { %2427 = vsyncpa [#allocation6 + $0x1], 1 }
0x29b8   :  { %2428 = vsyncpa [#allocation9], 1 }
0x29b9   :  { %2430 = vsyncpa [#allocation9 + $0x1], 1 }

</bundles_post_ra>
